<compile_context>
chip_gen: v7x
topology: tpu7x:2x2x1
jax: 0.10.0
libtpu: 0.0.40
codegen_flags: <defaults>
</compile_context>

<pallas_src>
import functools

import jax
import jax.numpy as jnp
from jax.experimental import pallas as pl
from jax.experimental.pallas import tpu as pltpu

HIDDEN = 800        # fc1/fc3 width in the PyTorch module
HIDDEN_PAD = 896    # 800 rounded up to a multiple of 128 (7 full MXU tiles)


def _round_up(x, m):
    return (x + m - 1) // m * m


def _make_vae_kernel(lat_pad, training):
    """Builds the whole-VAE kernel for one batch tile (x arrives as bf16)."""

    def kernel(x_ref, w1_ref, b1_ref, w2_ref, b2_ref, w3_ref, b3_ref,
               w4_ref, b4_ref, *rest):
        if training:
            eps_ref, recon_ref, mu_ref, logvar_ref, z_ref = rest
        else:
            recon_ref, mu_ref, logvar_ref = rest

        # encode: h1 = relu(x @ W1 + b1); bf16 MXU inputs, f32 accumulate.
        h1 = jnp.dot(x_ref[...], w1_ref[...],
                     preferred_element_type=jnp.float32)
        h1 = jnp.maximum(h1 + b1_ref[...], 0.0)

        # fused fc21|fc22: one [tile_b, 2*lat_pad] matmul, lane-aligned split.
        ml = jnp.dot(h1.astype(jnp.bfloat16), w2_ref[...],
                     preferred_element_type=jnp.float32) + b2_ref[...]
        mu = ml[:, :lat_pad]
        logvar = ml[:, lat_pad:]

        if training:
            # z = eps * exp(0.5*logvar) + mu   (f32 elementwise)
            z = eps_ref[...] * jnp.exp(0.5 * logvar) + mu
        else:
            z = mu  # PyTorch reparameterize() returns mu in eval mode

        # decode: sigmoid(relu(z @ W3 + b3) @ W4 + b4)
        h3 = jnp.dot(z.astype(jnp.bfloat16), w3_ref[...],
                     preferred_element_type=jnp.float32)
        h3 = jnp.maximum(h3 + b3_ref[...], 0.0)
        logits = jnp.dot(h3.astype(jnp.bfloat16), w4_ref[...],
                         preferred_element_type=jnp.float32) + b4_ref[...]

        # sigmoid(x) = 1 / (1 + exp(-x)); exp + approx reciprocal both run on
        # the EUP slot, which is free alongside the MXU-bound matmuls.
        recon_ref[...] = pl.reciprocal(1.0 + jnp.exp(-logits), approx=True)
        mu_ref[...] = mu
        logvar_ref[...] = logvar
        if training:
            z_ref[...] = z

    return kernel


def _pick_tile_b(B):
    """Batch tile size: >=16 rows (full bf16 sublane tile); >=2 tiles for
    mid-size batches so v7x's two TensorCores both get work; 256-row tiles at
    large B to amortize per-grid-step overhead."""
    if B >= 512:
        return 256
    if B > 16:
        return _round_up(-(-B // 2), 16)
    return 16


@functools.partial(jax.jit, static_argnames=("n_shape", "training"))
def vanilla_vae_forward(x, pparams, eps, *, n_shape, training=True):
    """x: [B, C, 28, 28] f32. Returns (recon [B,C,28,28], mu, logvar, z)."""
    B = x.shape[0]
    d_in = x.shape[1] * x.shape[2] * x.shape[3]

    d_in_pad, hid_pad = pparams["w1"].shape
    lat_pad = pparams["w2"].shape[1] // 2

    tile_b = _pick_tile_b(B)
    b_pad = _round_up(B, tile_b)
    n_tiles = b_pad // tile_b

    # Flatten + zero-pad x directly to bf16 (halves the x DMA per tile; x
    # already fed the MXU as bf16, so numerics are unchanged).
    x_flat = x.reshape(B, d_in).astype(jnp.bfloat16)   # == torch x.view(B,-1)
    x_p = jnp.zeros((b_pad, d_in_pad), jnp.bfloat16).at[:B, :d_in].set(x_flat)

    inputs = [x_p,
              pparams["w1"], pparams["b1"], pparams["w2"], pparams["b2"],
              pparams["w3"], pparams["b3"], pparams["w4"], pparams["b4"]]

    def row_spec(cols):        # activation tiles: advance with the batch grid
        return pl.BlockSpec((tile_b, cols), lambda i: (i, 0))

    def pinned(shape):         # weights/biases: same block every step -> resident
        return pl.BlockSpec(shape, lambda i: (0, 0))

    in_specs = [row_spec(d_in_pad),
                pinned((d_in_pad, hid_pad)), pinned((1, hid_pad)),
                pinned((hid_pad, 2 * lat_pad)), pinned((1, 2 * lat_pad)),
                pinned((lat_pad, hid_pad)), pinned((1, hid_pad)),
                pinned((hid_pad, d_in_pad)), pinned((1, d_in_pad))]

    if training:
        eps_p = jnp.zeros((b_pad, lat_pad), jnp.float32).at[:B, :n_shape].set(
            eps.astype(jnp.float32))
        inputs.append(eps_p)
        in_specs.append(row_spec(lat_pad))

    out_shapes = [
        jax.ShapeDtypeStruct((b_pad, d_in_pad), jnp.float32),   # recon (flat)
        jax.ShapeDtypeStruct((b_pad, lat_pad), jnp.float32),    # mu
        jax.ShapeDtypeStruct((b_pad, lat_pad), jnp.float32),    # logvar
    ]
    out_specs = [row_spec(d_in_pad), row_spec(lat_pad), row_spec(lat_pad)]
    if training:
        out_shapes.append(jax.ShapeDtypeStruct((b_pad, lat_pad), jnp.float32))
        out_specs.append(row_spec(lat_pad))                     # z

    flops = 2 * b_pad * (d_in_pad * hid_pad + hid_pad * 2 * lat_pad
                         + lat_pad * hid_pad + hid_pad * d_in_pad)
    transcendentals = 2 * b_pad * d_in_pad + (b_pad * lat_pad if training else 0)
    weight_bytes = sum(int(v.size) * v.dtype.itemsize for v in pparams.values())
    act_bytes = (2 * b_pad * d_in_pad            # x (bf16 in)
                 + 4 * b_pad * d_in_pad          # recon (f32 out)
                 + 4 * b_pad * lat_pad * (4 if training else 2))
    cost = pl.CostEstimate(flops=flops, transcendentals=transcendentals,
                           bytes_accessed=weight_bytes + act_bytes)

    outs = pl.pallas_call(
        _make_vae_kernel(lat_pad, training),
        out_shape=tuple(out_shapes),
        grid=(n_tiles,),
        in_specs=in_specs,
        out_specs=tuple(out_specs),
        compiler_params=pltpu.CompilerParams(
            dimension_semantics=("parallel",),   # shards batch tiles on v7x 2xTC
            vmem_limit_bytes=32 << 20),
        cost_estimate=cost,
    )(*inputs)

    if training:
        recon_p, mu_p, logvar_p, z_p = outs
    else:
        recon_p, mu_p, logvar_p = outs
        z_p = mu_p        # eval: z == mu; skip the redundant HBM store

    recon = recon_p[:B, :d_in].reshape(x.shape)
    return (recon, mu_p[:B, :n_shape], logvar_p[:B, :n_shape],
            z_p[:B, :n_shape])


def init_params(key, n_shape=80, n_channel=1):
    """PyTorch-style Linear init U(-1/sqrt(fan_in), 1/sqrt(fan_in)).
    Weights stored [in, out] (transposed w.r.t. nn.Linear storage)."""
    d_in = 28 * 28 * n_channel
    dims = {
        "1": (d_in, HIDDEN),
        "21": (HIDDEN, n_shape),
        "22": (HIDDEN, n_shape),
        "3": (n_shape, HIDDEN),
        "4": (HIDDEN, d_in),
    }
    params = {}
    keys = jax.random.split(key, 2 * len(dims))
    for i, (name, (fin, fout)) in enumerate(dims.items()):
        bound = 1.0 / jnp.sqrt(jnp.float32(fin))
        params[f"w{name}"] = jax.random.uniform(
            keys[2 * i], (fin, fout), jnp.float32, -bound, bound)
        params[f"b{name}"] = jax.random.uniform(
            keys[2 * i + 1], (1, fout), jnp.float32, -bound, bound)
    return params


def prepare_vae_params(params, n_shape=80, n_channel=1):
    """One-time prep: zero-pad to lane-aligned shapes, fuse fc21/fc22 into one
    weight, cast weights to bf16 (biases stay f32)."""
    d_in = 28 * 28 * n_channel
    d_in_pad = _round_up(d_in, 128)
    lat_pad = _round_up(n_shape, 128)

    def pad(a, rows, cols):
        out = jnp.zeros((rows, cols), jnp.float32)
        return out.at[:a.shape[0], :a.shape[1]].set(a)

    w2 = jnp.zeros((HIDDEN_PAD, 2 * lat_pad), jnp.float32)
    w2 = w2.at[:HIDDEN, :n_shape].set(params["w21"])
    w2 = w2.at[:HIDDEN, lat_pad:lat_pad + n_shape].set(params["w22"])
    b2 = jnp.zeros((1, 2 * lat_pad), jnp.float32)
    b2 = b2.at[:, :n_shape].set(params["b21"])
    b2 = b2.at[:, lat_pad:lat_pad + n_shape].set(params["b22"])

    return {
        "w1": pad(params["w1"], d_in_pad, HIDDEN_PAD).astype(jnp.bfloat16),
        "b1": pad(params["b1"], 1, HIDDEN_PAD),
        "w2": w2.astype(jnp.bfloat16),
        "b2": b2,
        "w3": pad(params["w3"], lat_pad, HIDDEN_PAD).astype(jnp.bfloat16),
        "b3": pad(params["b3"], 1, HIDDEN_PAD),
        "w4": pad(params["w4"], HIDDEN_PAD, d_in_pad).astype(jnp.bfloat16),
        "b4": pad(params["b4"], 1, d_in_pad),
    }


def _reference_forward(x, params, eps):
    """Pure-JAX reference with matching numerics (bf16 dot inputs, f32 acc)."""
    def mm(a, w):
        return jnp.dot(a.astype(jnp.bfloat16), w.astype(jnp.bfloat16),
                       preferred_element_type=jnp.float32)

    B = x.shape[0]
    xf = x.reshape(B, -1)
    h1 = jax.nn.relu(mm(xf, params["w1"]) + params["b1"])
    mu = mm(h1, params["w21"]) + params["b21"]
    logvar = mm(h1, params["w22"]) + params["b22"]
    z = eps * jnp.exp(0.5 * logvar) + mu
    h3 = jax.nn.relu(mm(z, params["w3"]) + params["b3"])
    recon = jax.nn.sigmoid(mm(h3, params["w4"]) + params["b4"])
    return recon.reshape(x.shape), mu, logvar, z


if __name__ == "__main__":
    key = jax.random.PRNGKey(0)
    k_param, k_x, k_eps = jax.random.split(key, 3)

    n_shape, n_channel = 80, 1
    B = 2
    params = init_params(k_param, n_shape=n_shape, n_channel=n_channel)
    pparams = prepare_vae_params(params, n_shape=n_shape, n_channel=n_channel)

    x = jax.random.uniform(k_x, (B, n_channel, 28, 28), jnp.float32)
    eps = jax.random.normal(k_eps, (B, n_shape), jnp.float32)

    # training-mode forward (reparameterize with provided eps)
    recon, mu, logvar, z = vanilla_vae_forward(
        x, pparams, eps, n_shape=n_shape, training=True)
    jax.block_until_ready((recon, mu, logvar, z))

    r_recon, r_mu, r_logvar, r_z = _reference_forward(x, params, eps)
    assert recon.shape == x.shape
    assert jnp.allclose(recon, r_recon, atol=5e-3, rtol=5e-3)
    assert jnp.allclose(mu, r_mu, atol=5e-3, rtol=5e-3)
    assert jnp.allclose(logvar, r_logvar, atol=5e-3, rtol=5e-3)
    assert jnp.allclose(z, r_z, atol=5e-3, rtol=5e-3)

    # eval-mode forward (z = mu, no eps, no exp, no z store)
    e_recon, e_mu, e_logvar, e_z = vanilla_vae_forward(
        x, pparams, None, n_shape=n_shape, training=False)
    jax.block_until_ready((e_recon, e_mu, e_logvar, e_z))
    assert e_recon.shape == x.shape
    assert jnp.allclose(e_z, e_mu)
    assert jnp.allclose(e_mu, r_mu, atol=5e-3, rtol=5e-3)

    print("KERNEL_OK")
</pallas_src>

<mosaic_0001>
module attributes {stable_mosaic.version = 11 : i64} {
  func.func @kernel(%arg0: i32, %arg1: memref<16x896xbf16, #tpu.memory_space<vmem>>, %arg2: memref<896x896xbf16, #tpu.memory_space<vmem>>, %arg3: memref<1x896xf32, #tpu.memory_space<vmem>>, %arg4: memref<896x256xbf16, #tpu.memory_space<vmem>>, %arg5: memref<1x256xf32, #tpu.memory_space<vmem>>, %arg6: memref<128x896xbf16, #tpu.memory_space<vmem>>, %arg7: memref<1x896xf32, #tpu.memory_space<vmem>>, %arg8: memref<896x896xbf16, #tpu.memory_space<vmem>>, %arg9: memref<1x896xf32, #tpu.memory_space<vmem>>, %arg10: memref<16x128xf32, #tpu.memory_space<vmem>>, %arg11: memref<16x896xf32, #tpu.memory_space<vmem>>, %arg12: memref<16x128xf32, #tpu.memory_space<vmem>>, %arg13: memref<16x128xf32, #tpu.memory_space<vmem>>, %arg14: memref<16x128xf32, #tpu.memory_space<vmem>>) attributes {dimension_semantics = [#tpu.dimension_semantics<parallel>], iteration_bounds = array<i64: 1>, scalar_prefetch = 0 : i64, scratch_operands = 0 : i64, tpu.core_type = #tpu.core_type<tc>, window_params = [{transform_indices = @transform_0, window_bounds = array<i64: 16, 896>}, {pipeline_mode = #tpu.pipeline_mode<synchronous>, transform_indices = @transform_1, window_bounds = array<i64: 896, 896>}, {pipeline_mode = #tpu.pipeline_mode<synchronous>, transform_indices = @transform_2, window_bounds = array<i64: 1, 896>}, {pipeline_mode = #tpu.pipeline_mode<synchronous>, transform_indices = @transform_3, window_bounds = array<i64: 896, 256>}, {pipeline_mode = #tpu.pipeline_mode<synchronous>, transform_indices = @transform_4, window_bounds = array<i64: 1, 256>}, {pipeline_mode = #tpu.pipeline_mode<synchronous>, transform_indices = @transform_5, window_bounds = array<i64: 128, 896>}, {pipeline_mode = #tpu.pipeline_mode<synchronous>, transform_indices = @transform_6, window_bounds = array<i64: 1, 896>}, {pipeline_mode = #tpu.pipeline_mode<synchronous>, transform_indices = @transform_7, window_bounds = array<i64: 896, 896>}, {pipeline_mode = #tpu.pipeline_mode<synchronous>, transform_indices = @transform_8, window_bounds = array<i64: 1, 896>}, {transform_indices = @transform_9, window_bounds = array<i64: 16, 128>}, {transform_indices = @transform_10, window_bounds = array<i64: 16, 896>}, {transform_indices = @transform_11, window_bounds = array<i64: 16, 128>}, {transform_indices = @transform_12, window_bounds = array<i64: 16, 128>}, {transform_indices = @transform_13, window_bounds = array<i64: 16, 128>}]} {
    %c0 = arith.constant 0 : index
    %c0_0 = arith.constant 0 : index
    %0 = vector.load %arg1[%c0, %c0_0] : memref<16x896xbf16, #tpu.memory_space<vmem>>, vector<16x896xbf16>
    %c0_1 = arith.constant 0 : index
    %c0_2 = arith.constant 0 : index
    %1 = vector.load %arg2[%c0_1, %c0_2] : memref<896x896xbf16, #tpu.memory_space<vmem>>, vector<896x896xbf16>
    %cst = arith.constant dense<0.000000e+00> : vector<16x896xf32>
    %2 = tpu.matmul %0, %1, %cst {dimension_numbers = #tpu.dot_dimension_numbers<[1], [0], [0], [1], [0, 0, 1, 1], [], []>} : vector<16x896xbf16>, vector<896x896xbf16>, vector<16x896xf32> -> vector<16x896xf32>
    %c0_3 = arith.constant 0 : index
    %c0_4 = arith.constant 0 : index
    %3 = vector.load %arg3[%c0_3, %c0_4] : memref<1x896xf32, #tpu.memory_space<vmem>>, vector<1x896xf32>
    %4 = vector.broadcast %3 : vector<1x896xf32> to vector<16x896xf32>
    %5 = arith.addf %2, %4 : vector<16x896xf32>
    %cst_5 = arith.constant 0.000000e+00 : f32
    %6 = vector.broadcast %cst_5 : f32 to vector<16x896xf32>
    %7 = arith.maximumf %5, %6 : vector<16x896xf32>
    %8 = arith.truncf %7 : vector<16x896xf32> to vector<16x896xbf16>
    %c0_6 = arith.constant 0 : index
    %c0_7 = arith.constant 0 : index
    %9 = vector.load %arg4[%c0_6, %c0_7] : memref<896x256xbf16, #tpu.memory_space<vmem>>, vector<896x256xbf16>
    %cst_8 = arith.constant dense<0.000000e+00> : vector<16x256xf32>
    %10 = tpu.matmul %8, %9, %cst_8 {dimension_numbers = #tpu.dot_dimension_numbers<[1], [0], [0], [1], [0, 0, 1, 1], [], []>} : vector<16x896xbf16>, vector<896x256xbf16>, vector<16x256xf32> -> vector<16x256xf32>
    %c0_9 = arith.constant 0 : index
    %c0_10 = arith.constant 0 : index
    %11 = vector.load %arg5[%c0_9, %c0_10] : memref<1x256xf32, #tpu.memory_space<vmem>>, vector<1x256xf32>
    %12 = vector.broadcast %11 : vector<1x256xf32> to vector<16x256xf32>
    %13 = arith.addf %10, %12 : vector<16x256xf32>
    %14 = vector.extract_strided_slice %13 {offsets = [0, 0], sizes = [16, 128], strides = [1, 1]} : vector<16x256xf32> to vector<16x128xf32>
    %15 = vector.extract_strided_slice %13 {offsets = [0, 128], sizes = [16, 128], strides = [1, 1]} : vector<16x256xf32> to vector<16x128xf32>
    %c0_11 = arith.constant 0 : index
    %c0_12 = arith.constant 0 : index
    %16 = vector.load %arg10[%c0_11, %c0_12] : memref<16x128xf32, #tpu.memory_space<vmem>>, vector<16x128xf32>
    %cst_13 = arith.constant 5.000000e-01 : f32
    %17 = vector.broadcast %cst_13 : f32 to vector<16x128xf32>
    %18 = arith.mulf %17, %15 : vector<16x128xf32>
    %19 = math.exp %18 : vector<16x128xf32>
    %20 = arith.mulf %16, %19 : vector<16x128xf32>
    %21 = arith.addf %20, %14 : vector<16x128xf32>
    %22 = arith.truncf %21 : vector<16x128xf32> to vector<16x128xbf16>
    %c0_14 = arith.constant 0 : index
    %c0_15 = arith.constant 0 : index
    %23 = vector.load %arg6[%c0_14, %c0_15] : memref<128x896xbf16, #tpu.memory_space<vmem>>, vector<128x896xbf16>
    %cst_16 = arith.constant dense<0.000000e+00> : vector<16x896xf32>
    %24 = tpu.matmul %22, %23, %cst_16 {dimension_numbers = #tpu.dot_dimension_numbers<[1], [0], [0], [1], [0, 0, 1, 1], [], []>} : vector<16x128xbf16>, vector<128x896xbf16>, vector<16x896xf32> -> vector<16x896xf32>
    %c0_17 = arith.constant 0 : index
    %c0_18 = arith.constant 0 : index
    %25 = vector.load %arg7[%c0_17, %c0_18] : memref<1x896xf32, #tpu.memory_space<vmem>>, vector<1x896xf32>
    %26 = vector.broadcast %25 : vector<1x896xf32> to vector<16x896xf32>
    %27 = arith.addf %24, %26 : vector<16x896xf32>
    %cst_19 = arith.constant 0.000000e+00 : f32
    %28 = vector.broadcast %cst_19 : f32 to vector<16x896xf32>
    %29 = arith.maximumf %27, %28 : vector<16x896xf32>
    %30 = arith.truncf %29 : vector<16x896xf32> to vector<16x896xbf16>
    %c0_20 = arith.constant 0 : index
    %c0_21 = arith.constant 0 : index
    %31 = vector.load %arg8[%c0_20, %c0_21] : memref<896x896xbf16, #tpu.memory_space<vmem>>, vector<896x896xbf16>
    %cst_22 = arith.constant dense<0.000000e+00> : vector<16x896xf32>
    %32 = tpu.matmul %30, %31, %cst_22 {dimension_numbers = #tpu.dot_dimension_numbers<[1], [0], [0], [1], [0, 0, 1, 1], [], []>} : vector<16x896xbf16>, vector<896x896xbf16>, vector<16x896xf32> -> vector<16x896xf32>
    %c0_23 = arith.constant 0 : index
    %c0_24 = arith.constant 0 : index
    %33 = vector.load %arg9[%c0_23, %c0_24] : memref<1x896xf32, #tpu.memory_space<vmem>>, vector<1x896xf32>
    %34 = vector.broadcast %33 : vector<1x896xf32> to vector<16x896xf32>
    %35 = arith.addf %32, %34 : vector<16x896xf32>
    %cst_25 = arith.constant 0.000000e+00 : f32
    %36 = vector.broadcast %cst_25 : f32 to vector<16x896xf32>
    %37 = arith.subf %36, %35 : vector<16x896xf32>
    %38 = math.exp %37 : vector<16x896xf32>
    %cst_26 = arith.constant 1.000000e+00 : f32
    %39 = vector.broadcast %cst_26 : f32 to vector<16x896xf32>
    %40 = arith.addf %39, %38 : vector<16x896xf32>
    %41 = tpu.reciprocal %40 {approx = true} : vector<16x896xf32> -> vector<16x896xf32>
    %c0_27 = arith.constant 0 : index
    %c0_28 = arith.constant 0 : index
    %42 = vector.load %arg11[%c0_27, %c0_28] : memref<16x896xf32, #tpu.memory_space<vmem>>, vector<16x896xf32>
    tpu.vector_store %arg11[%c0_27, %c0_28], %41 {strides = array<i32>} : memref<16x896xf32, #tpu.memory_space<vmem>>, vector<16x896xf32>,
    %c0_29 = arith.constant 0 : index
    %c0_30 = arith.constant 0 : index
    %43 = vector.load %arg12[%c0_29, %c0_30] : memref<16x128xf32, #tpu.memory_space<vmem>>, vector<16x128xf32>
    tpu.vector_store %arg12[%c0_29, %c0_30], %14 {strides = array<i32>} : memref<16x128xf32, #tpu.memory_space<vmem>>, vector<16x128xf32>,
    %c0_31 = arith.constant 0 : index
    %c0_32 = arith.constant 0 : index
    %44 = vector.load %arg13[%c0_31, %c0_32] : memref<16x128xf32, #tpu.memory_space<vmem>>, vector<16x128xf32>
    tpu.vector_store %arg13[%c0_31, %c0_32], %15 {strides = array<i32>} : memref<16x128xf32, #tpu.memory_space<vmem>>, vector<16x128xf32>,
    %c0_33 = arith.constant 0 : index
    %c0_34 = arith.constant 0 : index
    %45 = vector.load %arg14[%c0_33, %c0_34] : memref<16x128xf32, #tpu.memory_space<vmem>>, vector<16x128xf32>
    tpu.vector_store %arg14[%c0_33, %c0_34], %21 {strides = array<i32>} : memref<16x128xf32, #tpu.memory_space<vmem>>, vector<16x128xf32>,
    return
  }
  func.func @transform_0(%arg0: i32) -> (i32, i32) {
    %c0_i32 = arith.constant 0 : i32
    %c0_i32_0 = arith.constant 0 : i32
    return %arg0, %c0_i32 : i32, i32
  }
  func.func @transform_1(%arg0: i32) -> (i32, i32) {
    %c0_i32 = arith.constant 0 : i32
    %c0_i32_0 = arith.constant 0 : i32
    %c0_i32_1 = arith.constant 0 : i32
    return %c0_i32, %c0_i32_0 : i32, i32
  }
  func.func @transform_2(%arg0: i32) -> (i32, i32) {
    %c0_i32 = arith.constant 0 : i32
    %c0_i32_0 = arith.constant 0 : i32
    %c0_i32_1 = arith.constant 0 : i32
    return %c0_i32, %c0_i32_0 : i32, i32
  }
  func.func @transform_3(%arg0: i32) -> (i32, i32) {
    %c0_i32 = arith.constant 0 : i32
    %c0_i32_0 = arith.constant 0 : i32
    %c0_i32_1 = arith.constant 0 : i32
    return %c0_i32, %c0_i32_0 : i32, i32
  }
  func.func @transform_4(%arg0: i32) -> (i32, i32) {
    %c0_i32 = arith.constant 0 : i32
    %c0_i32_0 = arith.constant 0 : i32
    %c0_i32_1 = arith.constant 0 : i32
    return %c0_i32, %c0_i32_0 : i32, i32
  }
  func.func @transform_5(%arg0: i32) -> (i32, i32) {
    %c0_i32 = arith.constant 0 : i32
    %c0_i32_0 = arith.constant 0 : i32
    %c0_i32_1 = arith.constant 0 : i32
    return %c0_i32, %c0_i32_0 : i32, i32
  }
  func.func @transform_6(%arg0: i32) -> (i32, i32) {
    %c0_i32 = arith.constant 0 : i32
    %c0_i32_0 = arith.constant 0 : i32
    %c0_i32_1 = arith.constant 0 : i32
    return %c0_i32, %c0_i32_0 : i32, i32
  }
  func.func @transform_7(%arg0: i32) -> (i32, i32) {
    %c0_i32 = arith.constant 0 : i32
    %c0_i32_0 = arith.constant 0 : i32
    %c0_i32_1 = arith.constant 0 : i32
    return %c0_i32, %c0_i32_0 : i32, i32
  }
  func.func @transform_8(%arg0: i32) -> (i32, i32) {
    %c0_i32 = arith.constant 0 : i32
    %c0_i32_0 = arith.constant 0 : i32
    %c0_i32_1 = arith.constant 0 : i32
    return %c0_i32, %c0_i32_0 : i32, i32
  }
  func.func @transform_9(%arg0: i32) -> (i32, i32) {
    %c0_i32 = arith.constant 0 : i32
    %c0_i32_0 = arith.constant 0 : i32
    return %arg0, %c0_i32 : i32, i32
  }
  func.func @transform_10(%arg0: i32) -> (i32, i32) {
    %c0_i32 = arith.constant 0 : i32
    %c0_i32_0 = arith.constant 0 : i32
    return %arg0, %c0_i32 : i32, i32
  }
  func.func @transform_11(%arg0: i32) -> (i32, i32) {
    %c0_i32 = arith.constant 0 : i32
    %c0_i32_0 = arith.constant 0 : i32
    return %arg0, %c0_i32 : i32, i32
  }
  func.func @transform_12(%arg0: i32) -> (i32, i32) {
    %c0_i32 = arith.constant 0 : i32
    %c0_i32_0 = arith.constant 0 : i32
    return %arg0, %c0_i32 : i32, i32
  }
  func.func @transform_13(%arg0: i32) -> (i32, i32) {
    %c0_i32 = arith.constant 0 : i32
    %c0_i32_0 = arith.constant 0 : i32
    return %arg0, %c0_i32 : i32, i32
  }
}

</mosaic_0001>

<bundles_post_ra>
// kernel: vanilla_vae_forward.1
= control target key start
LH: loop header
LB: loop body
LE: loop exit
PB: predicated region body
PF: predicated region fallthrough
CT: control target
= control target key end

     0   :  { %19 = vsyncpa [#allocation3], 0  ;;  %s11593_s0 = inlined_call_operand.vmem [shape: bf16[16,896], index: 0, kind: input, shape index: {}]   ;;  %s11594_s1 = inlined_call_operand.hbm [shape: bf16[896,896], index: 1, kind: input, shape index: {}]   ;;  %s11595_s2 = inlined_call_operand.hbm [shape: f32[1,896], index: 2, kind: input, shape index: {}]   ;;  %s11596_s3 = inlined_call_operand.hbm [shape: bf16[896,256], index: 3, kind: input, shape index: {}]   ;;  %s11597_s4 = inlined_call_operand.hbm [shape: f32[1,256], index: 4, kind: input, shape index: {}]   ;;  %s11598_s5 = inlined_call_operand.hbm [shape: bf16[128,896], index: 5, kind: input, shape index: {}]   ;;  %s11599_s6 = inlined_call_operand.hbm [shape: f32[1,896], index: 6, kind: input, shape index: {}]   ;;  %s11600_s7 = inlined_call_operand.hbm [shape: bf16[896,896], index: 7, kind: input, shape index: {}]   ;;  %s11601_s8 = inlined_call_operand.hbm [shape: f32[1,896], index: 8, kind: input, shape index: {}]   ;;  %s11602_s9 = inlined_call_operand.vmem [shape: f32[16,128], index: 9, kind: input, shape index: {}]   ;;  %s11603_s10 = inlined_call_operand.vmem [shape: f32[16,896], index: 10, kind: output, shape index: {0}]   ;;  %s11604_s11 = inlined_call_operand.vmem [shape: f32[16,128], index: 11, kind: output, shape index: {1}]   ;;  %s11605_s12 = inlined_call_operand.vmem [shape: f32[16,128], index: 12, kind: output, shape index: {2}]   ;;  %s11606_s13 = inlined_call_operand.vmem [shape: f32[16,128], index: 13, kind: output, shape index: {3}]  }
   0x1   :  { %20 = vsyncpa [#allocation5], 0 }
   0x2   :  { %21 = vsyncpa [#allocation8], 0 }
   0x3   :  { %22 = vsyncpa [#allocation11], 0 }
   0x4   :  { %23 = vsyncpa [#allocation14], 0  ;;  %s11065_s25 = smov [#allocation4]   ;;  %s11066_s27 = smov [#allocation7]  }
   0x5   :  { %s44_s26 = sshll.u32 %s11065_s25, 4  ;;  %s66_s28 = sshll.u32 %s11066_s27, 4  ;;  %s45_s26 = int_to_ptr.vmem [resolvable:$true] %s44_s26  ;;  %s67_s28 = int_to_ptr.vmem [resolvable:$true] %s66_s28 }
   0x6   :  { %s10879_s14 = scalar_lea.hbm %s11595_s2, 112 }
   0x7   :  { %p10880_p0 = scmp.ne.s32.totalorder %s11595_s2, %s10879_s14  ;;  %p10883_p1 = scmp.lt.u32.totalorder %s10879_s14, %s11595_s2 }
   0x9   :  { %p10885_p2 = pnand %p10883_p1, %p10880_p0 }
   0xb   :  { %10888 = shalt.err (!%p10885_p2)
}
   0xc   :  { %s10889_s19 = scalar_lea.vmem %s45_s26, 112  ;;  %s10893_s20 = scalar_lea.vmem %s45_s26, 128 }
   0xd   :  { %p10890_p3 = scmp.ne.s32.totalorder %s45_s26, %s10889_s19  ;;  %p10894_p4 = scmp.lt.s32.totalorder %s45_s26, %s45_s26 }
   0xe   :  { %p10895_p5 = scmp.lt.s32.totalorder %s10893_s20, %s10889_s19 }
  0x10   :  { %p10896_p6 = por %p10895_p5, %p10894_p4 }
  0x12   :  { %p10897_p7 = pnand %p10896_p6, %p10890_p3 }
  0x14   :  { %10900 = shalt.err (!%p10897_p7)
}
  0x15   :  { %47 = dma.hbm_to_vmem [thread:$0]  %s11595_s2, 112, %s45_s26, [#allocation5]  }
  0x16   :  { %s10901_s25 = scalar_lea.hbm %s11597_s4, 32 }
  0x17   :  { %p10902_p8 = scmp.ne.s32.totalorder %s11597_s4, %s10901_s25  ;;  %p10905_p9 = scmp.lt.u32.totalorder %s10901_s25, %s11597_s4 }
  0x19   :  { %p10907_p10 = pnand %p10905_p9, %p10902_p8 }
  0x1b   :  { %10910 = shalt.err (!%p10907_p10)
}
  0x1c   :  { %s10911_s15 = scalar_lea.vmem %s67_s28, 32  ;;  %p10916_p12 = scmp.lt.s32.totalorder %s67_s28, %s67_s28 }
  0x1d   :  { %p10912_p11 = scmp.ne.s32.totalorder %s67_s28, %s10911_s15  ;;  %p10917_p13 = scmp.lt.s32.totalorder %s10911_s15, %s10911_s15 }
  0x1f   :  { %p10918_p0 = por %p10917_p13, %p10916_p12 }
  0x21   :  { %p10919_p1 = pnand %p10918_p0, %p10912_p11 }
  0x23   :  { %10922 = shalt.err (!%p10919_p1)
}
  0x24   :  { %69 = dma.hbm_to_vmem [thread:$0]  %s11597_s4, 32, %s67_s28, [#allocation8]  }
  0x25   :  { %s11067_s16 = smov [#allocation10]   ;;  %s11068_s18 = smov [#allocation2]  }
  0x26   :  { %s88_s17 = sshll.u32 %s11067_s16, 4  ;;  %s31_s19 = sshll.u32 %s11068_s18, 4  ;;  %s89_s17 = int_to_ptr.vmem [resolvable:$true] %s88_s17  ;;  %s11174_s19 = int_to_ptr.vmem [resolvable:$true] %s31_s19 }
  0x27   :  { %s10923_s22 = scalar_lea.hbm %s11599_s6, 112 }
  0x28   :  { %p10924_p2 = scmp.ne.s32.totalorder %s11599_s6, %s10923_s22  ;;  %p10927_p3 = scmp.lt.u32.totalorder %s10923_s22, %s11599_s6 }
  0x2a   :  { %p10929_p4 = pnand %p10927_p3, %p10924_p2 }
  0x2c   :  { %10932 = shalt.err (!%p10929_p4)
}
  0x2d   :  { %s10933_s4 = scalar_lea.vmem %s89_s17, 112  ;;  %s10937_s28 = scalar_lea.vmem %s89_s17, 128 }
  0x2e   :  { %p10934_p5 = scmp.ne.s32.totalorder %s89_s17, %s10933_s4  ;;  %p10938_p6 = scmp.lt.s32.totalorder %s89_s17, %s89_s17 }
  0x2f   :  { %p10939_p7 = scmp.lt.s32.totalorder %s10937_s28, %s10933_s4 }
  0x31   :  { %p10940_p8 = por %p10939_p7, %p10938_p6 }
  0x33   :  { %p10941_p9 = pnand %p10940_p8, %p10934_p5 }
  0x35   :  { %10944 = shalt.err (!%p10941_p9)
}
  0x36   :  { %91 = dma.hbm_to_vmem [thread:$0]  %s11599_s6, 112, %s89_s17, [#allocation11]  }
  0x37   :  { %s10945_s2 = scalar_lea.hbm %s11594_s1, 50176 }
  0x38   :  { %p10946_p10 = scmp.ne.s32.totalorder %s11594_s1, %s10945_s2  ;;  %p10949_p11 = scmp.lt.u32.totalorder %s10945_s2, %s11594_s1 }
  0x3a   :  { %p10951_p12 = pnand %p10949_p11, %p10946_p10 }
  0x3c   :  { %10954 = shalt.err (!%p10951_p12)
}
  0x3d   :  { %s10955_s21 = scalar_lea.vmem %s11174_s19, 50176  ;;  %p10960_p0 = scmp.lt.s32.totalorder %s11174_s19, %s11174_s19 }
  0x3e   :  { %p10956_p13 = scmp.ne.s32.totalorder %s11174_s19, %s10955_s21  ;;  %p10961_p1 = scmp.lt.s32.totalorder %s10955_s21, %s10955_s21 }
  0x40   :  { %p10962_p2 = por %p10961_p1, %p10960_p0 }
  0x42   :  { %p10963_p3 = pnand %p10962_p2, %p10956_p13 }
  0x44   :  { %10966 = shalt.err (!%p10963_p3)
}
  0x45   :  { %s11069_s6 = smov 448   ;;  %s11070_s17 = smov 28  }
  0x46   :  { %37 = dma.hbm_to_vmem [thread:$0]  %s11594_s1, 50176, %s11174_s19, [#allocation3], %s11069_s6, %s11069_s6, %s11070_s17  }
  0x47   :  { %s11071_s24 = smov [#allocation6]   ;;  %s10967_s28 = scalar_lea.hbm %s11596_s3, 14336 }
  0x48   :  { %s53_s25 = sshll.u32 %s11071_s24, 4  ;;  %p10968_p4 = scmp.ne.s32.totalorder %s11596_s3, %s10967_s28  ;;  %s54_s25 = int_to_ptr.vmem [resolvable:$true] %s53_s25 }
  0x49   :  { %p10971_p5 = scmp.lt.u32.totalorder %s10967_s28, %s11596_s3 }
  0x4b   :  { %p10973_p6 = pnand %p10971_p5, %p10968_p4 }
  0x4d   :  { %10976 = shalt.err (!%p10973_p6)
}
  0x4e   :  { %s10977_s2 = scalar_lea.vmem %s54_s25, 14336  ;;  %p10982_p8 = scmp.lt.s32.totalorder %s54_s25, %s54_s25 }
  0x4f   :  { %p10978_p7 = scmp.ne.s32.totalorder %s54_s25, %s10977_s2  ;;  %p10983_p9 = scmp.lt.s32.totalorder %s10977_s2, %s10977_s2 }
  0x51   :  { %p10984_p10 = por %p10983_p9, %p10982_p8 }
  0x53   :  { %p10985_p11 = pnand %p10984_p10, %p10978_p7 }
  0x55   :  { %10988 = shalt.err (!%p10985_p11)
}
  0x56   :  { %s11072_s1 = smov 128   ;;  %s11073_s19 = smov 8  }
  0x57   :  { %59 = dma.hbm_to_vmem [thread:$0]  %s11596_s3, 14336, %s54_s25, [#allocation5], %s11072_s1, %s11072_s1, %s11073_s19  }
  0x58   :  { %s11074_s18 = smov [#allocation9]   ;;  %s11075_s21 = smov [#allocation12]  }
  0x59   :  { %s75_s20 = sshll.u32 %s11074_s18, 4  ;;  %s97_s22 = sshll.u32 %s11075_s21, 4  ;;  %s76_s20 = int_to_ptr.vmem [resolvable:$true] %s75_s20  ;;  %s98_s22 = int_to_ptr.vmem [resolvable:$true] %s97_s22 }
  0x5a   :  { %s10989_s27 = scalar_lea.hbm %s11598_s5, 7168 }
  0x5b   :  { %p10990_p12 = scmp.ne.s32.totalorder %s11598_s5, %s10989_s27  ;;  %p10993_p13 = scmp.lt.u32.totalorder %s10989_s27, %s11598_s5 }
  0x5d   :  { %p10995_p0 = pnand %p10993_p13, %p10990_p12 }
  0x5f   :  { %10998 = shalt.err (!%p10995_p0)
}
  0x60   :  { %s10999_s3 = scalar_lea.vmem %s76_s20, 7168  ;;  %p11004_p2 = scmp.lt.s32.totalorder %s76_s20, %s76_s20 }
  0x61   :  { %p11000_p1 = scmp.ne.s32.totalorder %s76_s20, %s10999_s3  ;;  %p11005_p3 = scmp.lt.s32.totalorder %s10999_s3, %s10999_s3 }
  0x63   :  { %p11006_p4 = por %p11005_p3, %p11004_p2 }
  0x65   :  { %p11007_p5 = pnand %p11006_p4, %p11000_p1 }
  0x67   :  { %11010 = shalt.err (!%p11007_p5)
}
  0x68   :  { %81 = dma.hbm_to_vmem [thread:$0]  %s11598_s5, 7168, %s76_s20, [#allocation8], %s11069_s6, %s11069_s6, %s11070_s17  }
  0x69   :  { %s11011_s1 = scalar_lea.hbm %s11600_s7, 50176 }
  0x6a   :  { %p11012_p6 = scmp.ne.s32.totalorder %s11600_s7, %s11011_s1  ;;  %p11015_p7 = scmp.lt.u32.totalorder %s11011_s1, %s11600_s7 }
  0x6c   :  { %p11017_p8 = pnand %p11015_p7, %p11012_p6 }
  0x6e   :  { %11020 = shalt.err (!%p11017_p8)
}
  0x6f   :  { %s11021_s21 = scalar_lea.vmem %s98_s22, 50176  ;;  %p11026_p10 = scmp.lt.s32.totalorder %s98_s22, %s98_s22 }
  0x70   :  { %p11022_p9 = scmp.ne.s32.totalorder %s98_s22, %s11021_s21  ;;  %p11027_p11 = scmp.lt.s32.totalorder %s11021_s21, %s11021_s21 }
  0x72   :  { %p11028_p12 = por %p11027_p11, %p11026_p10 }
  0x74   :  { %p11029_p13 = pnand %p11028_p12, %p11022_p9 }
  0x76   :  { %11032 = shalt.err (!%p11029_p13)
}
  0x77   :  { %103 = dma.hbm_to_vmem [thread:$0]  %s11600_s7, 50176, %s98_s22, [#allocation11], %s11069_s6, %s11069_s6, %s11070_s17  }
  0x78   :  { %s11076_s23 = smov [#allocation13]   ;;  %s11033_s28 = scalar_lea.hbm %s11601_s8, 112 }
  0x79   :  { %s110_s24 = sshll.u32 %s11076_s23, 4  ;;  %p11034_p0 = scmp.ne.s32.totalorder %s11601_s8, %s11033_s28  ;;  %s111_s24 = int_to_ptr.vmem [resolvable:$true] %s110_s24 }
  0x7a   :  { %p11037_p1 = scmp.lt.u32.totalorder %s11033_s28, %s11601_s8 }
  0x7c   :  { %p11039_p2 = pnand %p11037_p1, %p11034_p0 }
  0x7e   :  { %11042 = shalt.err (!%p11039_p2)
}
  0x7f   :  { %s11043_s14 = scalar_lea.vmem %s111_s24, 112  ;;  %s11047_s7 = scalar_lea.vmem %s111_s24, 128 }
  0x80   :  { %p11044_p3 = scmp.ne.s32.totalorder %s111_s24, %s11043_s14  ;;  %p11048_p4 = scmp.lt.s32.totalorder %s111_s24, %s111_s24 }
  0x81   :  { %p11049_p5 = scmp.lt.s32.totalorder %s11047_s7, %s11043_s14 }
  0x83   :  { %p11050_p6 = por %p11049_p5, %p11048_p4 }
  0x85   :  { %p11051_p7 = pnand %p11050_p6, %p11044_p3 }
  0x87   :  { %11054 = shalt.err (!%p11051_p7)
}
  0x88   :  { %113 = dma.hbm_to_vmem [thread:$0]  %s11601_s8, 112, %s111_s24, [#allocation14]  }
  0x89   :  { %11055 = dma.done.wait [#allocation3], 50176  }
  0x8a   :  { %11056 = vsyncadd [#allocation3], 4294917120 }
  0x8b   :  { %11057 = dma.done.wait [#allocation5], 14448  }
  0x8c   :  { %11058 = vsyncadd [#allocation5], 4294952848 }
  0x8d   :  { %11059 = dma.done.wait [#allocation8], 7200  }
  0x8e   :  { %11060 = vsyncadd [#allocation8], 4294960096 }
  0x8f   :  { %11061 = dma.done.wait [#allocation11], 50288  }
  0x90   :  { %11062 = vsyncadd [#allocation11], 4294917008 }
  0x91   :  { %11063 = dma.done.wait [#allocation14], 112  }
  0x92   :  { %11064 = vsyncadd [#allocation14], 4294967184  ;;  %v9433_v0 = vld [vmem:[#allocation2 + $0x4] ss:$28 sps:$4 sm:$0xff]   ;;  %v9439_v4 = vld [vmem:[#allocation2 + $0x3c] ss:$28 sps:$4 sm:$0xff]  }
  0x93   :  { %v9435_v1 = vld [vmem:[#allocation2 + $0x384] ss:$28 sps:$4 sm:$0xff]   ;;  %2686 = vmatprep.subr.bf16.mxu1 %v9433_v0  ;;  %v9441_v5 = vld [vmem:[#allocation2 + $0x3bc] ss:$28 sps:$4 sm:$0xff]   ;;  %v9445_v8 = vld [vmem:[#allocation2 + $0x74] ss:$28 sps:$4 sm:$0xff]  }
  0x94   :  { %v9437_v2 = vld [vmem:[#allocation2] ss:$28 sps:$4 sm:$0xff]   ;;  %2729 = vmatprep.subr.bf16.mxu0 %v9435_v1  ;;  %v9443_v6 = vld [vmem:[#allocation2 + $0x38] ss:$28 sps:$4 sm:$0xff]   ;;  %v9449_v10 = vld [vmem:[#allocation2 + $0x70] ss:$28 sps:$4 sm:$0xff]  }
  0x95   :  { %v9438_v3 = vld [vmem:[#allocation2 + $0x380] ss:$28 sps:$4 sm:$0xff]   ;;  %2687 = vmatpush1.bf16.msra.mxu1 %v9437_v2  ;;  %v9444_v7 = vld [vmem:[#allocation2 + $0x3b8] ss:$28 sps:$4 sm:$0xff]   ;;  %v9450_v11 = vld [vmem:[#allocation2 + $0x3f0] ss:$28 sps:$4 sm:$0xff]  }
  0x96   :  { %2730 = vmatpush1.bf16.msra.mxu0 %v9438_v3  ;;  %2688 = vmatprep.subr.bf16.mxu1 %v9439_v4  ;;  %v9447_v9 = vld [vmem:[#allocation2 + $0x3f4] ss:$28 sps:$4 sm:$0xff]   ;;  %v9451_v12 = vld [vmem:[#allocation2 + $0xac] ss:$28 sps:$4 sm:$0xff]   ;;  %v9457_v16 = vld [vmem:[#allocation2 + $0xe4] ss:$28 sps:$4 sm:$0xff]  }
  0x97   :  { %2731 = vmatprep.subr.bf16.mxu0 %v9441_v5  ;;  %v9453_v13 = vld [vmem:[#allocation2 + $0x42c] ss:$28 sps:$4 sm:$0xff]   ;;  %v9459_v17 = vld [vmem:[#allocation2 + $0x464] ss:$28 sps:$4 sm:$0xff]   ;;  %v9463_v20 = vld [vmem:[#allocation2 + $0x11c] ss:$28 sps:$4 sm:$0xff]  }
  0x98   :  { %v9455_v14 = vld [vmem:[#allocation2 + $0xa8] ss:$28 sps:$4 sm:$0xff]   ;;  %v9461_v18 = vld [vmem:[#allocation2 + $0xe0] ss:$28 sps:$4 sm:$0xff]   ;;  %v9467_v22 = vld [vmem:[#allocation2 + $0x118] ss:$28 sps:$4 sm:$0xff]  }
  0x99   :  { %2689 = vmatpush1.bf16.msra.mxu1 %v9443_v6  ;;  %v9456_v15 = vld [vmem:[#allocation2 + $0x428] ss:$28 sps:$4 sm:$0xff]   ;;  %v9462_v19 = vld [vmem:[#allocation2 + $0x460] ss:$28 sps:$4 sm:$0xff]   ;;  %v9468_v23 = vld [vmem:[#allocation2 + $0x498] ss:$28 sps:$4 sm:$0xff]  }
  0x9a   :  { %2732 = vmatpush1.bf16.msra.mxu0 %v9444_v7  ;;  %2690 = vmatprep.subr.bf16.mxu1 %v9445_v8  ;;  %v9465_v21 = vld [vmem:[#allocation2 + $0x49c] ss:$28 sps:$4 sm:$0xff]   ;;  %v9469_v24 = vld [vmem:[#allocation2 + $0x154] ss:$28 sps:$4 sm:$0xff]   ;;  %v9475_v28 = vld [vmem:[#allocation2 + $0x18c] ss:$28 sps:$4 sm:$0xff]  }
  0x9b   :  { %2733 = vmatprep.subr.bf16.mxu0 %v9447_v9  ;;  %v9471_v25 = vld [vmem:[#allocation2 + $0x4d4] ss:$28 sps:$4 sm:$0xff]   ;;  %v9477_v29 = vld [vmem:[#allocation2 + $0x50c] ss:$28 sps:$4 sm:$0xff]   ;;  %v9481_v32 = vld [vmem:[#allocation2 + $0x1c4] ss:$28 sps:$4 sm:$0xff]  }
  0x9c   :  { %v9473_v26 = vld [vmem:[#allocation2 + $0x150] ss:$28 sps:$4 sm:$0xff]   ;;  %v9479_v30 = vld [vmem:[#allocation2 + $0x188] ss:$28 sps:$4 sm:$0xff]   ;;  %v9485_v34 = vld [vmem:[#allocation2 + $0x1c0] ss:$28 sps:$4 sm:$0xff]  }
  0x9d   :  { %2691 = vmatpush1.bf16.msra.mxu1 %v9449_v10  ;;  %v9474_v27 = vld [vmem:[#allocation2 + $0x4d0] ss:$28 sps:$4 sm:$0xff]   ;;  %v9480_v31 = vld [vmem:[#allocation2 + $0x508] ss:$28 sps:$4 sm:$0xff]   ;;  %v9486_v35 = vld [vmem:[#allocation2 + $0x540] ss:$28 sps:$4 sm:$0xff]  }
  0x9e   :  { %2734 = vmatpush1.bf16.msra.mxu0 %v9450_v11  ;;  %2692 = vmatprep.subr.bf16.mxu1 %v9451_v12  ;;  %v9483_v33 = vld [vmem:[#allocation2 + $0x544] ss:$28 sps:$4 sm:$0xff]   ;;  %v9487_v36 = vld [vmem:[#allocation2 + $0x1fc] ss:$28 sps:$4 sm:$0xff]   ;;  %v9493_v40 = vld [vmem:[#allocation2 + $0x234] ss:$28 sps:$4 sm:$0xff]  }
  0x9f   :  { %2735 = vmatprep.subr.bf16.mxu0 %v9453_v13  ;;  %v9489_v37 = vld [vmem:[#allocation2 + $0x57c] ss:$28 sps:$4 sm:$0xff]   ;;  %v9495_v41 = vld [vmem:[#allocation2 + $0x5b4] ss:$28 sps:$4 sm:$0xff]   ;;  %v9499_v44 = vld [vmem:[#allocation2 + $0x26c] ss:$28 sps:$4 sm:$0xff]  }
  0xa0   :  { %v9491_v38 = vld [vmem:[#allocation2 + $0x1f8] ss:$28 sps:$4 sm:$0xff]   ;;  %v9497_v42 = vld [vmem:[#allocation2 + $0x230] ss:$28 sps:$4 sm:$0xff]   ;;  %v9503_v46 = vld [vmem:[#allocation2 + $0x268] ss:$28 sps:$4 sm:$0xff]  }
  0xa1   :  { %2693 = vmatpush1.bf16.msra.mxu1 %v9455_v14  ;;  %v9492_v39 = vld [vmem:[#allocation2 + $0x578] ss:$28 sps:$4 sm:$0xff]   ;;  %v9498_v43 = vld [vmem:[#allocation2 + $0x5b0] ss:$28 sps:$4 sm:$0xff]   ;;  %v9504_v47 = vld [vmem:[#allocation2 + $0x5e8] ss:$28 sps:$4 sm:$0xff]  }
  0xa2   :  { %2736 = vmatpush1.bf16.msra.mxu0 %v9456_v15  ;;  %2694 = vmatprep.subr.bf16.mxu1 %v9457_v16  ;;  %v9501_v45 = vld [vmem:[#allocation2 + $0x5ec] ss:$28 sps:$4 sm:$0xff]   ;;  %v9505_v48 = vld [vmem:[#allocation2 + $0x2a4] ss:$28 sps:$4 sm:$0xff]   ;;  %v9511_v54 = vld [vmem:[#allocation2 + $0x2dc] ss:$28 sps:$4 sm:$0xff]  }
  0xa3   :  { %2737 = vmatprep.subr.bf16.mxu0 %v9459_v17  ;;  %v11265_v49 = vld [vmem:[%s11593_s0 + $0x4] ss:$28 sps:$4 sm:$0xff]   ;;  %v11270_v50 = vld [vmem:[%s11593_s0 + $0xc] ss:$28 sps:$4 sm:$0xff]   ;;  %v9513_v55 = vld [vmem:[#allocation2 + $0x65c] ss:$28 sps:$4 sm:$0xff]  }
  0xa4   :  { %v9507_v51 = vld [vmem:[#allocation2 + $0x624] ss:$28 sps:$4 sm:$0xff]   ;;  %2718 = vmatprep.mubr.bf16.mxu1 %v11265_v49  ;;  %2761 = vmatprep.mubr.bf16.mxu0 %v11270_v50  ;;  %v9515_v56 = vld [vmem:[#allocation2 + $0x2d8] ss:$28 sps:$4 sm:$0xff]   ;;  %v9521_v60 = vld [vmem:[#allocation2 + $0x310] ss:$28 sps:$4 sm:$0xff]  }
  0xa5   :  { %2695 = vmatpush1.bf16.msra.mxu1 %v9461_v18  ;;  %v9509_v52 = vld [vmem:[#allocation2 + $0x2a0] ss:$28 sps:$4 sm:$0xff]   ;;  %v9516_v57 = vld [vmem:[#allocation2 + $0x658] ss:$28 sps:$4 sm:$0xff]   ;;  %v9522_v61 = vld [vmem:[#allocation2 + $0x690] ss:$28 sps:$4 sm:$0xff]  }
  0xa6   :  { %2738 = vmatpush1.bf16.msra.mxu0 %v9462_v19  ;;  %2696 = vmatprep.subr.bf16.mxu1 %v9463_v20  ;;  %v9510_v53 = vld [vmem:[#allocation2 + $0x620] ss:$28 sps:$4 sm:$0xff]   ;;  %v9517_v58 = vld [vmem:[#allocation2 + $0x314] ss:$28 sps:$4 sm:$0xff]   ;;  %v9523_v62 = vld [vmem:[#allocation2 + $0x34c] ss:$28 sps:$4 sm:$0xff]  }
  0xa7   :  { %2739 = vmatprep.subr.bf16.mxu0 %v9465_v21  ;;  %v9519_v59 = vld [vmem:[#allocation2 + $0x694] ss:$28 sps:$4 sm:$0xff]   ;;  %v9525_v63 = vld [vmem:[#allocation2 + $0x6cc] ss:$28 sps:$4 sm:$0xff]   ;;  %v9536_v2 = vld [vmem:[#allocation2 + $0x704] ss:$28 sps:$4 sm:$0xff]  }
  0xa8   :  { %v9527_v0 = vld [vmem:[#allocation2 + $0x348] ss:$28 sps:$4 sm:$0xff]   ;;  %v11277_v4 = vld [vmem:[%s11593_s0] ss:$28 sps:$4 sm:$0xff]   ;;  %v9541_v10 = vld [vmem:[#allocation2 + $0x738] ss:$28 sps:$4 sm:$0xff]  }
  0xa9   :  { %2697 = vmatpush1.bf16.msra.mxu1 %v9467_v22  ;;  %v9528_v1 = vld [vmem:[#allocation2 + $0x6c8] ss:$28 sps:$4 sm:$0xff]   ;;  %v9534_v5 = vld [vmem:[#allocation2 + $0x700] ss:$28 sps:$4 sm:$0xff]   ;;  %v9549_v12 = vld [vmem:[#allocation2 + $0x774] ss:$28 sps:$4 sm:$0xff]  }
  0xaa   :  { %2740 = vmatpush1.bf16.msra.mxu0 %v9468_v23  ;;  %2698 = vmatprep.subr.bf16.mxu1 %v9469_v24  ;;  %v9539_v3 = vld [vmem:[#allocation2 + $0xc] ss:$28 sps:$4 sm:$0xff]   ;;  %v9543_v8 = vld [vmem:[#allocation2 + $0x73c] ss:$28 sps:$4 sm:$0xff]   ;;  %v9546_v9 = vld [vmem:[#allocation2 + $0x44] ss:$28 sps:$4 sm:$0xff]  }
  0xab   :  { %2741 = vmatprep.subr.bf16.mxu0 %v9471_v25  ;;  %v9537_v6 = vld [vmem:[#allocation2 + $0x8] ss:$28 sps:$4 sm:$0xff]   ;;  %v9544_v11 = vld [vmem:[#allocation2 + $0x40] ss:$28 sps:$4 sm:$0xff]   ;;  %v9547_v14 = vld [vmem:[#allocation2 + $0x770] ss:$28 sps:$4 sm:$0xff]  }
  0xac   :  { %v11282_v7 = vld [vmem:[%s11593_s0 + $0x8] ss:$28 sps:$4 sm:$0xff]   ;;  %v9552_v13 = vld [vmem:[#allocation2 + $0x7c] ss:$28 sps:$4 sm:$0xff]   ;;  %v9558_v17 = vld [vmem:[#allocation2 + $0xb4] ss:$28 sps:$4 sm:$0xff]  }
  0xad   :  { %2699 = vmatpush1.bf16.msra.mxu1 %v9473_v26  ;;  %v9550_v15 = vld [vmem:[#allocation2 + $0x78] ss:$28 sps:$4 sm:$0xff]   ;;  %v9555_v16 = vld [vmem:[#allocation2 + $0x7ac] ss:$28 sps:$4 sm:$0xff]   ;;  %v9561_v20 = vld [vmem:[#allocation2 + $0x7e4] ss:$28 sps:$4 sm:$0xff]  }
  0xae   :  { %2742 = vmatpush1.bf16.msra.mxu0 %v9474_v27  ;;  %2700 = vmatprep.subr.bf16.mxu1 %v9475_v28  ;;  %v9553_v18 = vld [vmem:[#allocation2 + $0x7a8] ss:$28 sps:$4 sm:$0xff]   ;;  %v9556_v19 = vld [vmem:[#allocation2 + $0xb0] ss:$28 sps:$4 sm:$0xff]   ;;  %v9559_v22 = vld [vmem:[#allocation2 + $0x7e0] ss:$28 sps:$4 sm:$0xff]  }
  0xaf   :  { %2743 = vmatprep.subr.bf16.mxu0 %v9477_v29  ;;  %v9564_v21 = vld [vmem:[#allocation2 + $0xec] ss:$28 sps:$4 sm:$0xff]   ;;  %v9567_v24 = vld [vmem:[#allocation2 + $0x81c] ss:$28 sps:$4 sm:$0xff]   ;;  %v9570_v25 = vld [vmem:[#allocation2 + $0x124] ss:$28 sps:$4 sm:$0xff]  }
  0xb0   :  { %v9562_v23 = vld [vmem:[#allocation2 + $0xe8] ss:$28 sps:$4 sm:$0xff]   ;;  %v9565_v26 = vld [vmem:[#allocation2 + $0x818] ss:$28 sps:$4 sm:$0xff]   ;;  %v9568_v27 = vld [vmem:[#allocation2 + $0x120] ss:$28 sps:$4 sm:$0xff]  }
  0xb1   :  { %2701 = vmatpush1.bf16.msra.mxu1 %v9479_v30  ;;  %v9573_v28 = vld [vmem:[#allocation2 + $0x854] ss:$28 sps:$4 sm:$0xff]   ;;  %v9576_v29 = vld [vmem:[#allocation2 + $0x15c] ss:$28 sps:$4 sm:$0xff]   ;;  %vm11079_vm0 = vmmov 0  }
  0xb2   :  { %2744 = vmatpush1.bf16.msra.mxu0 %v9480_v31  ;;  %2702 = vmatprep.subr.bf16.mxu1 %v9481_v32  ;;  %v9571_v30 = vld [vmem:[#allocation2 + $0x850] ss:$28 sps:$4 sm:$0xff]   ;;  %v9574_v31 = vld [vmem:[#allocation2 + $0x158] ss:$28 sps:$4 sm:$0xff]  }
  0xb3   :  { %2745 = vmatprep.subr.bf16.mxu0 %v9483_v33  ;;  %v9579_v32 = vld [vmem:[#allocation2 + $0x88c] ss:$28 sps:$4 sm:$0xff]   ;;  %v11290_v33 = vld [vmem:[%s11593_s0 + $0x14] ss:$28 sps:$4 sm:$0xff]  }
  0xb5   :  { %2703 = vmatpush1.bf16.msra.mxu1 %v9485_v34  ;;  %v9582_v34 = vld [vmem:[#allocation2 + $0x194] ss:$28 sps:$4 sm:$0xff]  }
  0xb6   :  { %2746 = vmatpush1.bf16.msra.mxu0 %v9486_v35  ;;  %2704 = vmatprep.subr.bf16.mxu1 %v9487_v36  ;;  %v9577_v35 = vld [vmem:[#allocation2 + $0x888] ss:$28 sps:$4 sm:$0xff]   ;;  %v9580_v36 = vld [vmem:[#allocation2 + $0x190] ss:$28 sps:$4 sm:$0xff]  }
  0xb7   :  { %2747 = vmatprep.subr.bf16.mxu0 %v9489_v37  ;;  %v9585_v37 = vld [vmem:[#allocation2 + $0x8c4] ss:$28 sps:$4 sm:$0xff]  }
  0xb9   :  { %2705 = vmatpush1.bf16.msra.mxu1 %v9491_v38  ;;  %v9588_v38 = vld [vmem:[#allocation2 + $0x1cc] ss:$28 sps:$4 sm:$0xff]  }
  0xba   :  { %2748 = vmatpush1.bf16.msra.mxu0 %v9492_v39  ;;  %2706 = vmatprep.subr.bf16.mxu1 %v9493_v40  ;;  %v9583_v39 = vld [vmem:[#allocation2 + $0x8c0] ss:$28 sps:$4 sm:$0xff]   ;;  %v9586_v40 = vld [vmem:[#allocation2 + $0x1c8] ss:$28 sps:$4 sm:$0xff]  }
  0xbb   :  { %2749 = vmatprep.subr.bf16.mxu0 %v9495_v41  ;;  %v9591_v41 = vld [vmem:[#allocation2 + $0x8fc] ss:$28 sps:$4 sm:$0xff]  }
  0xbd   :  { %2707 = vmatpush1.bf16.msra.mxu1 %v9497_v42  ;;  %v9594_v42 = vld [vmem:[#allocation2 + $0x204] ss:$28 sps:$4 sm:$0xff]  }
  0xbe   :  { %2750 = vmatpush1.bf16.msra.mxu0 %v9498_v43  ;;  %2708 = vmatprep.subr.bf16.mxu1 %v9499_v44  ;;  %v9589_v43 = vld [vmem:[#allocation2 + $0x8f8] ss:$28 sps:$4 sm:$0xff]   ;;  %v9592_v44 = vld [vmem:[#allocation2 + $0x200] ss:$28 sps:$4 sm:$0xff]  }
  0xbf   :  { %2751 = vmatprep.subr.bf16.mxu0 %v9501_v45  ;;  %v9597_v45 = vld [vmem:[#allocation2 + $0x934] ss:$28 sps:$4 sm:$0xff]  }
  0xc1   :  { %2709 = vmatpush1.bf16.msra.mxu1 %v9503_v46  ;;  %v9600_v46 = vld [vmem:[#allocation2 + $0x23c] ss:$28 sps:$4 sm:$0xff]  }
  0xc2   :  { %2752 = vmatpush1.bf16.msra.mxu0 %v9504_v47  ;;  %2710 = vmatprep.subr.bf16.mxu1 %v9505_v48  ;;  %v9595_v47 = vld [vmem:[#allocation2 + $0x930] ss:$28 sps:$4 sm:$0xff]   ;;  %v9598_v48 = vld [vmem:[#allocation2 + $0x238] ss:$28 sps:$4 sm:$0xff]  }
  0xc3   :  { %2753 = vmatprep.subr.bf16.mxu0 %v9507_v51  ;;  %v9603_v51 = vld [vmem:[#allocation2 + $0x96c] ss:$28 sps:$4 sm:$0xff]  }
  0xc5   :  { %2711 = vmatpush1.bf16.msra.mxu1 %v9509_v52  ;;  %v9606_v52 = vld [vmem:[#allocation2 + $0x274] ss:$28 sps:$4 sm:$0xff]  }
  0xc6   :  { %2754 = vmatpush1.bf16.msra.mxu0 %v9510_v53  ;;  %2712 = vmatprep.subr.bf16.mxu1 %v9511_v54  ;;  %v9601_v53 = vld [vmem:[#allocation2 + $0x968] ss:$28 sps:$4 sm:$0xff]   ;;  %v9604_v54 = vld [vmem:[#allocation2 + $0x270] ss:$28 sps:$4 sm:$0xff]  }
  0xc7   :  { %2755 = vmatprep.subr.bf16.mxu0 %v9513_v55  ;;  %v9609_v55 = vld [vmem:[#allocation2 + $0x9a4] ss:$28 sps:$4 sm:$0xff]  }
  0xc9   :  { %2713 = vmatpush1.bf16.msra.mxu1 %v9515_v56  ;;  %v9612_v56 = vld [vmem:[#allocation2 + $0x2ac] ss:$28 sps:$4 sm:$0xff]  }
  0xca   :  { %2756 = vmatpush1.bf16.msra.mxu0 %v9516_v57  ;;  %2714 = vmatprep.subr.bf16.mxu1 %v9517_v58  ;;  %v9607_v57 = vld [vmem:[#allocation2 + $0x9a0] ss:$28 sps:$4 sm:$0xff]   ;;  %v9610_v58 = vld [vmem:[#allocation2 + $0x2a8] ss:$28 sps:$4 sm:$0xff]  }
  0xcb   :  { %2757 = vmatprep.subr.bf16.mxu0 %v9519_v59  ;;  %v9615_v59 = vld [vmem:[#allocation2 + $0x9dc] ss:$28 sps:$4 sm:$0xff]  }
  0xcd   :  { %2715 = vmatpush1.bf16.msra.mxu1 %v9521_v60  ;;  %v9618_v60 = vld [vmem:[#allocation2 + $0x2e4] ss:$28 sps:$4 sm:$0xff]  }
  0xce   :  { %2758 = vmatpush1.bf16.msra.mxu0 %v9522_v61  ;;  %2716 = vmatprep.subr.bf16.mxu1 %v9523_v62  ;;  %v9613_v61 = vld [vmem:[#allocation2 + $0x9d8] ss:$28 sps:$4 sm:$0xff]   ;;  %v9616_v62 = vld [vmem:[#allocation2 + $0x2e0] ss:$28 sps:$4 sm:$0xff]  }
  0xcf   :  { %2759 = vmatprep.subr.bf16.mxu0 %v9525_v63  ;;  %v9621_v63 = vld [vmem:[#allocation2 + $0xa14] ss:$28 sps:$4 sm:$0xff]  }
  0xd1   :  { %2717 = vmatpush1.bf16.msra.mxu1 %v9527_v0  ;;  %v9624_v0 = vld [vmem:[#allocation2 + $0x31c] ss:$28 sps:$4 sm:$0xff]  }
  0xd2   :  { %2760 = vmatpush1.bf16.msra.mxu0 %v9528_v1  ;;  %2858 = vmatprep.subr.bf16.mxu1 %v9539_v3  ;;  %v9619_v1 = vld [vmem:[#allocation2 + $0xa10] ss:$28 sps:$4 sm:$0xff]  }
  0xd3   :  { %2772 = vmatprep.subr.bf16.mxu0 %v9536_v2  ;;  %v9622_v2 = vld [vmem:[#allocation2 + $0x318] ss:$28 sps:$4 sm:$0xff]   ;;  %v9627_v3 = vld [vmem:[#allocation2 + $0xa4c] ss:$28 sps:$4 sm:$0xff]  }
  0xd4   :  { %2719 = vmatmul.mubr.bf16.vlgmr.msra.gmra.mrb[0].mxu1 %v11277_v4 }
  0xd5   :  { %2762 = vmatmul.mubr.bf16.vlgmr.msra.gmra.mrb[0].mxu0 %v11282_v7  ;;  %2859 = vmatpush1.bf16.msra.mxu1 %v9537_v6  ;;  %v9625_v6 = vld [vmem:[#allocation2 + $0xa48] ss:$28 sps:$4 sm:$0xff]  }
  0xd6   :  { %2773 = vmatpush1.bf16.msra.mxu0 %v9534_v5  ;;  %2860 = vmatprep.subr.bf16.mxu1 %v9546_v9  ;;  %v9630_v5 = vld [vmem:[#allocation2 + $0x354] ss:$28 sps:$4 sm:$0xff]   ;;  %v9635_v9 = vld [vmem:[#allocation2 + $0xa84] ss:$28 sps:$4 sm:$0xff]  }
  0xd7   :  { %2774 = vmatprep.subr.bf16.mxu0 %v9543_v8  ;;  %2890 = vmatprep.mubr.bf16.mxu1 %v11265_v49  ;;  %v9628_v8 = vld [vmem:[#allocation2 + $0x350] ss:$28 sps:$4 sm:$0xff]  }
  0xd8   :  { %2804 = vmatprep.mubr.bf16.mxu0 %v11290_v33 }
  0xd9   :  { %2861 = vmatpush1.bf16.msra.mxu1 %v9544_v11  ;;  %v9633_v11 = vld [vmem:[#allocation2 + $0xa80] ss:$28 sps:$4 sm:$0xff]  }
  0xda   :  { %2775 = vmatpush1.bf16.msra.mxu0 %v9541_v10  ;;  %2862 = vmatprep.subr.bf16.mxu1 %v9552_v13  ;;  %v9638_v10 = vld [vmem:[#allocation2 + $0x38c] ss:$28 sps:$4 sm:$0xff]  }
  0xdb   :  { %2776 = vmatprep.subr.bf16.mxu0 %v9549_v12  ;;  %v11296_v12 = vld [vmem:[%s11593_s0 + $0x10] ss:$28 sps:$4 sm:$0xff]   ;;  %v9636_v13 = vld [vmem:[#allocation2 + $0x388] ss:$28 sps:$4 sm:$0xff]  }
  0xdd   :  { %2863 = vmatpush1.bf16.msra.mxu1 %v9550_v15  ;;  %v9645_v15 = vld [vmem:[#allocation2 + $0x3c4] ss:$28 sps:$4 sm:$0xff]  }
  0xde   :  { %2777 = vmatpush1.bf16.msra.mxu0 %v9547_v14  ;;  %2864 = vmatprep.subr.bf16.mxu1 %v9558_v17  ;;  %v9642_v14 = vld [vmem:[#allocation2 + $0xabc] ss:$28 sps:$4 sm:$0xff]  }
  0xdf   :  { %2778 = vmatprep.subr.bf16.mxu0 %v9555_v16  ;;  %v9640_v16 = vld [vmem:[#allocation2 + $0xab8] ss:$28 sps:$4 sm:$0xff]   ;;  %v9643_v17 = vld [vmem:[#allocation2 + $0x3c0] ss:$28 sps:$4 sm:$0xff]  }
  0xe1   :  { %2865 = vmatpush1.bf16.msra.mxu1 %v9556_v19  ;;  %v9651_v19 = vld [vmem:[#allocation2 + $0x3fc] ss:$28 sps:$4 sm:$0xff]  }
  0xe2   :  { %2779 = vmatpush1.bf16.msra.mxu0 %v9553_v18  ;;  %2866 = vmatprep.subr.bf16.mxu1 %v9564_v21  ;;  %v9648_v18 = vld [vmem:[#allocation2 + $0xaf4] ss:$28 sps:$4 sm:$0xff]  }
  0xe3   :  { %2780 = vmatprep.subr.bf16.mxu0 %v9561_v20  ;;  %v11077_v20 = vmov 0   ;;  %v9646_v21 = vld [vmem:[#allocation2 + $0xaf0] ss:$28 sps:$4 sm:$0xff]  }
  0xe5   :  { %2867 = vmatpush1.bf16.msra.mxu1 %v9562_v23  ;;  %v9654_v23 = vld [vmem:[#allocation2 + $0xb2c] ss:$28 sps:$4 sm:$0xff]  }
  0xe6   :  { %2781 = vmatpush1.bf16.msra.mxu0 %v9559_v22  ;;  %2868 = vmatprep.subr.bf16.mxu1 %v9570_v25  ;;  %v9649_v22 = vld [vmem:[#allocation2 + $0x3f8] ss:$28 sps:$4 sm:$0xff]   ;;  %v9655_v25 = vld [vmem:[#allocation2 + $0x430] ss:$28 sps:$4 sm:$0xff]  }
  0xe7   :  { %2782 = vmatprep.subr.bf16.mxu0 %v9567_v24  ;;  %v9652_v24 = vld [vmem:[#allocation2 + $0xb28] ss:$28 sps:$4 sm:$0xff]  }
  0xe9   :  { %2869 = vmatpush1.bf16.msra.mxu1 %v9568_v27  ;;  %v9663_v27 = vld [vmem:[#allocation2 + $0x46c] ss:$28 sps:$4 sm:$0xff]  }
  0xea   :  { %2783 = vmatpush1.bf16.msra.mxu0 %v9565_v26  ;;  %2870 = vmatprep.subr.bf16.mxu1 %v9576_v29  ;;  %v9660_v26 = vld [vmem:[#allocation2 + $0xb64] ss:$28 sps:$4 sm:$0xff]   ;;  %v9666_v29 = vld [vmem:[#allocation2 + $0xb9c] ss:$28 sps:$4 sm:$0xff]  }
  0xeb   :  { %2784 = vmatprep.subr.bf16.mxu0 %v9573_v28  ;;  %v9658_v28 = vld [vmem:[#allocation2 + $0xb60] ss:$28 sps:$4 sm:$0xff]  }
  0xed   :  { %2871 = vmatpush1.bf16.msra.mxu1 %v9574_v31  ;;  %v9664_v31 = vld [vmem:[#allocation2 + $0xb98] ss:$28 sps:$4 sm:$0xff]  }
  0xee   :  { %2785 = vmatpush1.bf16.msra.mxu0 %v9571_v30  ;;  %2872 = vmatprep.subr.bf16.mxu1 %v9582_v34  ;;  %v9669_v30 = vld [vmem:[#allocation2 + $0x4a4] ss:$28 sps:$4 sm:$0xff]   ;;  %v9672_v34 = vld [vmem:[#allocation2 + $0xbd4] ss:$28 sps:$4 sm:$0xff]  }
  0xef   :  { %2786 = vmatprep.subr.bf16.mxu0 %v9579_v32  ;;  %v9667_v32 = vld [vmem:[#allocation2 + $0x4a0] ss:$28 sps:$4 sm:$0xff]  }
  0xf1   :  { %2873 = vmatpush1.bf16.msra.mxu1 %v9580_v36  ;;  %v9670_v36 = vld [vmem:[#allocation2 + $0xbd0] ss:$28 sps:$4 sm:$0xff]  }
  0xf2   :  { %2787 = vmatpush1.bf16.msra.mxu0 %v9577_v35  ;;  %2874 = vmatprep.subr.bf16.mxu1 %v9588_v38  ;;  %v9675_v35 = vld [vmem:[#allocation2 + $0x4dc] ss:$28 sps:$4 sm:$0xff]   ;;  %v9678_v38 = vld [vmem:[#allocation2 + $0xc0c] ss:$28 sps:$4 sm:$0xff]  }
  0xf3   :  { %2788 = vmatprep.subr.bf16.mxu0 %v9585_v37  ;;  %v9673_v37 = vld [vmem:[#allocation2 + $0x4d8] ss:$28 sps:$4 sm:$0xff]  }
  0xf5   :  { %2875 = vmatpush1.bf16.msra.mxu1 %v9586_v40  ;;  %v9676_v40 = vld [vmem:[#allocation2 + $0xc08] ss:$28 sps:$4 sm:$0xff]  }
  0xf6   :  { %2789 = vmatpush1.bf16.msra.mxu0 %v9583_v39  ;;  %2876 = vmatprep.subr.bf16.mxu1 %v9594_v42  ;;  %v9681_v39 = vld [vmem:[#allocation2 + $0x514] ss:$28 sps:$4 sm:$0xff]   ;;  %v9685_v42 = vld [vmem:[#allocation2 + $0x54c] ss:$28 sps:$4 sm:$0xff]  }
  0xf7   :  { %2790 = vmatprep.subr.bf16.mxu0 %v9591_v41  ;;  %v9679_v41 = vld [vmem:[#allocation2 + $0x510] ss:$28 sps:$4 sm:$0xff]  }
  0xf9   :  { %2877 = vmatpush1.bf16.msra.mxu1 %v9592_v44  ;;  %v11305_v44 = vld [vmem:[%s11593_s0 + $0x18] ss:$28 sps:$4 sm:$0xff]  }
  0xfa   :  { %2791 = vmatpush1.bf16.msra.mxu0 %v9589_v43  ;;  %2878 = vmatprep.subr.bf16.mxu1 %v9600_v46  ;;  %v9688_v43 = vld [vmem:[#allocation2 + $0x14] ss:$28 sps:$4 sm:$0xff]  }
  0xfb   :  { %2792 = vmatprep.subr.bf16.mxu0 %v9597_v45  ;;  %v9683_v45 = vld [vmem:[#allocation2 + $0x548] ss:$28 sps:$4 sm:$0xff]   ;;  %v9686_v46 = vld [vmem:[#allocation2 + $0x10] ss:$28 sps:$4 sm:$0xff]  }
  0xfd   :  { %2879 = vmatpush1.bf16.msra.mxu1 %v9598_v48  ;;  %v9694_v48 = vld [vmem:[#allocation2 + $0x4c] ss:$28 sps:$4 sm:$0xff]  }
  0xfe   :  { %2793 = vmatpush1.bf16.msra.mxu0 %v9595_v47  ;;  %2880 = vmatprep.subr.bf16.mxu1 %v9606_v52  ;;  %v9691_v47 = vld [vmem:[#allocation2 + $0x584] ss:$28 sps:$4 sm:$0xff]  }
  0xff   :  { %2794 = vmatprep.subr.bf16.mxu0 %v9603_v51  ;;  %v9689_v51 = vld [vmem:[#allocation2 + $0x580] ss:$28 sps:$4 sm:$0xff]   ;;  %v9692_v52 = vld [vmem:[#allocation2 + $0x48] ss:$28 sps:$4 sm:$0xff]  }
 0x101   :  { %2881 = vmatpush1.bf16.msra.mxu1 %v9604_v54  ;;  %v9700_v54 = vld [vmem:[#allocation2 + $0x84] ss:$28 sps:$4 sm:$0xff]  }
 0x102   :  { %2795 = vmatpush1.bf16.msra.mxu0 %v9601_v53  ;;  %2882 = vmatprep.subr.bf16.mxu1 %v9612_v56  ;;  %v9697_v53 = vld [vmem:[#allocation2 + $0x5bc] ss:$28 sps:$4 sm:$0xff]  }
 0x103   :  { %2796 = vmatprep.subr.bf16.mxu0 %v9609_v55  ;;  %v9695_v55 = vld [vmem:[#allocation2 + $0x5b8] ss:$28 sps:$4 sm:$0xff]   ;;  %v9698_v56 = vld [vmem:[#allocation2 + $0x80] ss:$28 sps:$4 sm:$0xff]  }
 0x105   :  { %2883 = vmatpush1.bf16.msra.mxu1 %v9610_v58  ;;  %v9706_v58 = vld [vmem:[#allocation2 + $0xbc] ss:$28 sps:$4 sm:$0xff]  }
 0x106   :  { %2797 = vmatpush1.bf16.msra.mxu0 %v9607_v57  ;;  %2884 = vmatprep.subr.bf16.mxu1 %v9618_v60  ;;  %v9703_v57 = vld [vmem:[#allocation2 + $0x5f4] ss:$28 sps:$4 sm:$0xff]  }
 0x107   :  { %2798 = vmatprep.subr.bf16.mxu0 %v9615_v59  ;;  %v9701_v59 = vld [vmem:[#allocation2 + $0x5f0] ss:$28 sps:$4 sm:$0xff]   ;;  %v9704_v60 = vld [vmem:[#allocation2 + $0xb8] ss:$28 sps:$4 sm:$0xff]  }
 0x109   :  { %2885 = vmatpush1.bf16.msra.mxu1 %v9616_v62  ;;  %v9712_v62 = vld [vmem:[#allocation2 + $0xf4] ss:$28 sps:$4 sm:$0xff]  }
 0x10a   :  { %2799 = vmatpush1.bf16.msra.mxu0 %v9613_v61  ;;  %2886 = vmatprep.subr.bf16.mxu1 %v9624_v0  ;;  %v9709_v61 = vld [vmem:[#allocation2 + $0x62c] ss:$28 sps:$4 sm:$0xff]   ;;  %v9715_v0 = vld [vmem:[#allocation2 + $0x664] ss:$28 sps:$4 sm:$0xff]  }
 0x10b   :  { %2800 = vmatprep.subr.bf16.mxu0 %v9621_v63  ;;  %v9707_v63 = vld [vmem:[#allocation2 + $0x628] ss:$28 sps:$4 sm:$0xff]  }
 0x10d   :  { %2887 = vmatpush1.bf16.msra.mxu1 %v9622_v2  ;;  %v9713_v2 = vld [vmem:[#allocation2 + $0x660] ss:$28 sps:$4 sm:$0xff]  }
 0x10e   :  { %2801 = vmatpush1.bf16.msra.mxu0 %v9619_v1  ;;  %2888 = vmatprep.subr.bf16.mxu1 %v9630_v5  ;;  %v9718_v1 = vld [vmem:[#allocation2 + $0x12c] ss:$28 sps:$4 sm:$0xff]   ;;  %v9721_v5 = vld [vmem:[#allocation2 + $0x69c] ss:$28 sps:$4 sm:$0xff]  }
 0x10f   :  { %2802 = vmatprep.subr.bf16.mxu0 %v9627_v3  ;;  %v9716_v3 = vld [vmem:[#allocation2 + $0x128] ss:$28 sps:$4 sm:$0xff]  }
 0x111   :  { %2889 = vmatpush1.bf16.msra.mxu1 %v9628_v8  ;;  %v9719_v8 = vld [vmem:[#allocation2 + $0x698] ss:$28 sps:$4 sm:$0xff]  }
 0x112   :  { %2803 = vmatpush1.bf16.msra.mxu0 %v9625_v6  ;;  %2901 = vmatprep.subr.bf16.mxu1 %v9638_v10  ;;  %v9724_v6 = vld [vmem:[#allocation2 + $0x164] ss:$28 sps:$4 sm:$0xff]   ;;  %v9727_v10 = vld [vmem:[#allocation2 + $0x6d4] ss:$28 sps:$4 sm:$0xff]  }
 0x113   :  { %2815 = vmatprep.subr.bf16.mxu0 %v9635_v9  ;;  %v9722_v9 = vld [vmem:[#allocation2 + $0x160] ss:$28 sps:$4 sm:$0xff]  }
 0x114   :  { %2891 = vmatmul.mubr.bf16.vlgmr.msra.gmra.mrb[4].mxu1 %v11277_v4  ;;  %v9657_v4 = vld [vmem:[#allocation2 + $0x434] ss:$28 sps:$4 sm:$0xff]  }
 0x115   :  { %2805 = vmatmul.mubr.bf16.vlgmr.msra.gmra.mrb[0].mxu0 %v11296_v12  ;;  %2902 = vmatpush1.bf16.msra.mxu1 %v9636_v13  ;;  %v9725_v13 = vld [vmem:[#allocation2 + $0x6d0] ss:$28 sps:$4 sm:$0xff]  }
 0x116   :  { %2816 = vmatpush1.bf16.msra.mxu0 %v9633_v11  ;;  %2903 = vmatprep.subr.bf16.mxu1 %v9645_v15  ;;  %v9730_v11 = vld [vmem:[#allocation2 + $0x19c] ss:$28 sps:$4 sm:$0xff]   ;;  %v9733_v15 = vld [vmem:[#allocation2 + $0x70c] ss:$28 sps:$4 sm:$0xff]  }
 0x117   :  { %2817 = vmatprep.subr.bf16.mxu0 %v9642_v14  ;;  %2847 = vmatprep.mubr.bf16.mxu0 %v11077_v20  ;;  %v9728_v14 = vld [vmem:[#allocation2 + $0x198] ss:$28 sps:$4 sm:$0xff]  }
 0x118   :  { %2933 = vmatprep.mubr.bf16.mxu1 %v11270_v50  ;;  %v9661_v50 = vld [vmem:[#allocation2 + $0x468] ss:$28 sps:$4 sm:$0xff]  }
 0x119   :  { %2904 = vmatpush1.bf16.msra.mxu1 %v9643_v17  ;;  %v9731_v17 = vld [vmem:[#allocation2 + $0x708] ss:$28 sps:$4 sm:$0xff]  }
 0x11a   :  { %2818 = vmatpush1.bf16.msra.mxu0 %v9640_v16  ;;  %2905 = vmatprep.subr.bf16.mxu1 %v9651_v19  ;;  %v9736_v16 = vld [vmem:[#allocation2 + $0x1d4] ss:$28 sps:$4 sm:$0xff]   ;;  %v9739_v19 = vld [vmem:[#allocation2 + $0x744] ss:$28 sps:$4 sm:$0xff]  }
 0x11b   :  { %2819 = vmatprep.subr.bf16.mxu0 %v9648_v18  ;;  %v9734_v18 = vld [vmem:[#allocation2 + $0x1d0] ss:$28 sps:$4 sm:$0xff]  }
 0x11d   :  { %2906 = vmatpush1.bf16.msra.mxu1 %v9649_v22  ;;  %v9737_v22 = vld [vmem:[#allocation2 + $0x740] ss:$28 sps:$4 sm:$0xff]  }
 0x11e   :  { %2820 = vmatpush1.bf16.msra.mxu0 %v9646_v21  ;;  %2907 = vmatprep.subr.bf16.mxu1 %v9657_v4  ;;  %v9742_v21 = vld [vmem:[#allocation2 + $0x20c] ss:$28 sps:$4 sm:$0xff]   ;;  %v9745_v4 = vld [vmem:[#allocation2 + $0x77c] ss:$28 sps:$4 sm:$0xff]  }
 0x11f   :  { %2821 = vmatprep.subr.bf16.mxu0 %v9654_v23  ;;  %v9740_v23 = vld [vmem:[#allocation2 + $0x208] ss:$28 sps:$4 sm:$0xff]  }
 0x121   :  { %2908 = vmatpush1.bf16.msra.mxu1 %v9655_v25  ;;  %v9743_v25 = vld [vmem:[#allocation2 + $0x778] ss:$28 sps:$4 sm:$0xff]  }
 0x122   :  { %2822 = vmatpush1.bf16.msra.mxu0 %v9652_v24  ;;  %2909 = vmatprep.subr.bf16.mxu1 %v9663_v27  ;;  %v9748_v24 = vld [vmem:[#allocation2 + $0x244] ss:$28 sps:$4 sm:$0xff]   ;;  %v9751_v27 = vld [vmem:[#allocation2 + $0x7b4] ss:$28 sps:$4 sm:$0xff]  }
 0x123   :  { %2823 = vmatprep.subr.bf16.mxu0 %v9660_v26  ;;  %v9746_v26 = vld [vmem:[#allocation2 + $0x240] ss:$28 sps:$4 sm:$0xff]  }
 0x125   :  { %2910 = vmatpush1.bf16.msra.mxu1 %v9661_v50  ;;  %v9749_v50 = vld [vmem:[#allocation2 + $0x7b0] ss:$28 sps:$4 sm:$0xff]  }
 0x126   :  { %2824 = vmatpush1.bf16.msra.mxu0 %v9658_v28  ;;  %2911 = vmatprep.subr.bf16.mxu1 %v9669_v30  ;;  %v9754_v28 = vld [vmem:[#allocation2 + $0x27c] ss:$28 sps:$4 sm:$0xff]   ;;  %v9760_v30 = vld [vmem:[#allocation2 + $0x2b4] ss:$28 sps:$4 sm:$0xff]  }
 0x127   :  { %2825 = vmatprep.subr.bf16.mxu0 %v9666_v29  ;;  %v9757_v29 = vld [vmem:[#allocation2 + $0x7ec] ss:$28 sps:$4 sm:$0xff]  }
 0x129   :  { %2912 = vmatpush1.bf16.msra.mxu1 %v9667_v32  ;;  %v9763_v32 = vld [vmem:[#allocation2 + $0x824] ss:$28 sps:$4 sm:$0xff]  }
 0x12a   :  { %2826 = vmatpush1.bf16.msra.mxu0 %v9664_v31  ;;  %2913 = vmatprep.subr.bf16.mxu1 %v9675_v35  ;;  %v9755_v31 = vld [vmem:[#allocation2 + $0x7e8] ss:$28 sps:$4 sm:$0xff]   ;;  %v9761_v35 = vld [vmem:[#allocation2 + $0x820] ss:$28 sps:$4 sm:$0xff]  }
 0x12b   :  { %2827 = vmatprep.subr.bf16.mxu0 %v9672_v34  ;;  %v9766_v34 = vld [vmem:[#allocation2 + $0x2ec] ss:$28 sps:$4 sm:$0xff]  }
 0x12d   :  { %2914 = vmatpush1.bf16.msra.mxu1 %v9673_v37  ;;  %v9769_v37 = vld [vmem:[#allocation2 + $0x85c] ss:$28 sps:$4 sm:$0xff]  }
 0x12e   :  { %2828 = vmatpush1.bf16.msra.mxu0 %v9670_v36  ;;  %2915 = vmatprep.subr.bf16.mxu1 %v9681_v39  ;;  %v9764_v36 = vld [vmem:[#allocation2 + $0x2e8] ss:$28 sps:$4 sm:$0xff]   ;;  %v9767_v39 = vld [vmem:[#allocation2 + $0x858] ss:$28 sps:$4 sm:$0xff]  }
 0x12f   :  { %2829 = vmatprep.subr.bf16.mxu0 %v9678_v38  ;;  %v9772_v38 = vld [vmem:[#allocation2 + $0x324] ss:$28 sps:$4 sm:$0xff]  }
 0x131   :  { %2916 = vmatpush1.bf16.msra.mxu1 %v9679_v41  ;;  %v9775_v41 = vld [vmem:[#allocation2 + $0x894] ss:$28 sps:$4 sm:$0xff]  }
 0x132   :  { %2830 = vmatpush1.bf16.msra.mxu0 %v9676_v40  ;;  %2917 = vmatprep.subr.bf16.mxu1 %v9685_v42  ;;  %v9770_v40 = vld [vmem:[#allocation2 + $0x320] ss:$28 sps:$4 sm:$0xff]  }
 0x133   :  { %3030 = vmatprep.subr.bf16.mxu0 %v9688_v43  ;;  %v9778_v42 = vld [vmem:[#allocation2 + $0x35c] ss:$28 sps:$4 sm:$0xff]   ;;  %v9773_v43 = vld [vmem:[#allocation2 + $0x890] ss:$28 sps:$4 sm:$0xff]  }
 0x135   :  { %2848 = vmatmul.mubr.bf16.vlgmr.msra.gmra.mrb[0].mxu0 %v11305_v44  ;;  %2918 = vmatpush1.bf16.msra.mxu1 %v9683_v45  ;;  %v9776_v45 = vld [vmem:[#allocation2 + $0x358] ss:$28 sps:$4 sm:$0xff]  }
 0x136   :  { %3031 = vmatpush1.bf16.msra.mxu0 %v9686_v46  ;;  %2919 = vmatprep.subr.bf16.mxu1 %v9691_v47  ;;  %v9781_v46 = vld [vmem:[#allocation2 + $0x8cc] ss:$28 sps:$4 sm:$0xff]   ;;  %v9784_v47 = vld [vmem:[#allocation2 + $0x394] ss:$28 sps:$4 sm:$0xff]  }
 0x137   :  { %3032 = vmatprep.subr.bf16.mxu0 %v9694_v48  ;;  %3062 = vmatprep.mubr.bf16.mxu0 %v11265_v49  ;;  %v9710_v49 = vld [vmem:[#allocation2 + $0xf0] ss:$28 sps:$4 sm:$0xff]   ;;  %v9779_v48 = vld [vmem:[#allocation2 + $0x8c8] ss:$28 sps:$4 sm:$0xff]  }
 0x139   :  { %2920 = vmatpush1.bf16.msra.mxu1 %v9689_v51  ;;  %v9782_v51 = vld [vmem:[#allocation2 + $0x390] ss:$28 sps:$4 sm:$0xff]  }
 0x13a   :  { %3033 = vmatpush1.bf16.msra.mxu0 %v9692_v52  ;;  %2921 = vmatprep.subr.bf16.mxu1 %v9697_v53  ;;  %v9787_v52 = vld [vmem:[#allocation2 + $0x904] ss:$28 sps:$4 sm:$0xff]   ;;  %v9790_v53 = vld [vmem:[#allocation2 + $0x3cc] ss:$28 sps:$4 sm:$0xff]  }
 0x13b   :  { %3034 = vmatprep.subr.bf16.mxu0 %v9700_v54  ;;  %v11314_v54 = vld [vmem:[%s11593_s0] ss:$28 sps:$4 sm:$0xff]  }
 0x13d   :  { %2922 = vmatpush1.bf16.msra.mxu1 %v9695_v55  ;;  %v9785_v55 = vld [vmem:[#allocation2 + $0x900] ss:$28 sps:$4 sm:$0xff]  }
 0x13e   :  { %3035 = vmatpush1.bf16.msra.mxu0 %v9698_v56  ;;  %2923 = vmatprep.subr.bf16.mxu1 %v9703_v57  ;;  %v9788_v56 = vld [vmem:[#allocation2 + $0x3c8] ss:$28 sps:$4 sm:$0xff]   ;;  %v9793_v57 = vld [vmem:[#allocation2 + $0x93c] ss:$28 sps:$4 sm:$0xff]  }
 0x13f   :  { %3036 = vmatprep.subr.bf16.mxu0 %v9706_v58  ;;  %v9796_v58 = vld [vmem:[#allocation2 + $0x404] ss:$28 sps:$4 sm:$0xff]  }
 0x141   :  { %2924 = vmatpush1.bf16.msra.mxu1 %v9701_v59  ;;  %v11320_v59 = vld [vmem:[%s11593_s0 + $0xc] ss:$28 sps:$4 sm:$0xff]  }
 0x142   :  { %3037 = vmatpush1.bf16.msra.mxu0 %v9704_v60  ;;  %2925 = vmatprep.subr.bf16.mxu1 %v9709_v61  ;;  %v9791_v60 = vld [vmem:[#allocation2 + $0x938] ss:$28 sps:$4 sm:$0xff]   ;;  %v9794_v61 = vld [vmem:[#allocation2 + $0x400] ss:$28 sps:$4 sm:$0xff]  }
 0x143   :  { %3038 = vmatprep.subr.bf16.mxu0 %v9712_v62  ;;  %v9799_v62 = vld [vmem:[#allocation2 + $0x974] ss:$28 sps:$4 sm:$0xff]  }
 0x145   :  { %2926 = vmatpush1.bf16.msra.mxu1 %v9707_v63  ;;  %v9802_v63 = vld [vmem:[#allocation2 + $0x43c] ss:$28 sps:$4 sm:$0xff]  }
 0x146   :  { %3039 = vmatpush1.bf16.msra.mxu0 %v9710_v49  ;;  %2927 = vmatprep.subr.bf16.mxu1 %v9715_v0  ;;  %v9797_v49 = vld [vmem:[#allocation2 + $0x970] ss:$28 sps:$4 sm:$0xff]   ;;  %v9800_v0 = vld [vmem:[#allocation2 + $0x438] ss:$28 sps:$4 sm:$0xff]  }
 0x147   :  { %3040 = vmatprep.subr.bf16.mxu0 %v9718_v1  ;;  %v9805_v1 = vld [vmem:[#allocation2 + $0x9ac] ss:$28 sps:$4 sm:$0xff]  }
 0x149   :  { %2928 = vmatpush1.bf16.msra.mxu1 %v9713_v2  ;;  %v9808_v2 = vld [vmem:[#allocation2 + $0x474] ss:$28 sps:$4 sm:$0xff]  }
 0x14a   :  { %3041 = vmatpush1.bf16.msra.mxu0 %v9716_v3  ;;  %2929 = vmatprep.subr.bf16.mxu1 %v9721_v5  ;;  %v9803_v3 = vld [vmem:[#allocation2 + $0x9a8] ss:$28 sps:$4 sm:$0xff]   ;;  %v9806_v5 = vld [vmem:[#allocation2 + $0x470] ss:$28 sps:$4 sm:$0xff]  }
 0x14b   :  { %3042 = vmatprep.subr.bf16.mxu0 %v9724_v6  ;;  %v9811_v6 = vld [vmem:[#allocation2 + $0x9e4] ss:$28 sps:$4 sm:$0xff]  }
 0x14d   :  { %2930 = vmatpush1.bf16.msra.mxu1 %v9719_v8  ;;  %v9814_v8 = vld [vmem:[#allocation2 + $0x4ac] ss:$28 sps:$4 sm:$0xff]  }
 0x14e   :  { %3043 = vmatpush1.bf16.msra.mxu0 %v9722_v9  ;;  %2931 = vmatprep.subr.bf16.mxu1 %v9727_v10  ;;  %v9809_v9 = vld [vmem:[#allocation2 + $0x9e0] ss:$28 sps:$4 sm:$0xff]   ;;  %v9812_v10 = vld [vmem:[#allocation2 + $0x4a8] ss:$28 sps:$4 sm:$0xff]  }
 0x14f   :  { %3044 = vmatprep.subr.bf16.mxu0 %v9730_v11  ;;  %v9817_v11 = vld [vmem:[#allocation2 + $0xa1c] ss:$28 sps:$4 sm:$0xff]  }
 0x151   :  { %2932 = vmatpush1.bf16.msra.mxu1 %v9725_v13  ;;  %v9820_v13 = vld [vmem:[#allocation2 + $0x4e4] ss:$28 sps:$4 sm:$0xff]  }
 0x152   :  { %3045 = vmatpush1.bf16.msra.mxu0 %v9728_v14  ;;  %2944 = vmatprep.subr.bf16.mxu1 %v9733_v15  ;;  %v9815_v14 = vld [vmem:[#allocation2 + $0xa18] ss:$28 sps:$4 sm:$0xff]   ;;  %v9818_v15 = vld [vmem:[#allocation2 + $0x4e0] ss:$28 sps:$4 sm:$0xff]  }
 0x153   :  { %3046 = vmatprep.subr.bf16.mxu0 %v9736_v16  ;;  %v9823_v16 = vld [vmem:[#allocation2 + $0xa54] ss:$28 sps:$4 sm:$0xff]  }
 0x154   :  { %2934 = vmatmul.mubr.bf16.vlgmr.msra.gmra.mrb[4].mxu1 %v11282_v7  ;;  %v9752_v7 = vld [vmem:[#allocation2 + $0x278] ss:$28 sps:$4 sm:$0xff]  }
 0x155   :  { %2945 = vmatpush1.bf16.msra.mxu1 %v9731_v17  ;;  %2976 = vmatprep.mubr.bf16.mxu1 %v11290_v33  ;;  %v9758_v33 = vld [vmem:[#allocation2 + $0x2b0] ss:$28 sps:$4 sm:$0xff]   ;;  %v9826_v17 = vld [vmem:[#allocation2 + $0x51c] ss:$28 sps:$4 sm:$0xff]  }
 0x156   :  { %3047 = vmatpush1.bf16.msra.mxu0 %v9734_v18  ;;  %2946 = vmatprep.subr.bf16.mxu1 %v9739_v19  ;;  %v9821_v18 = vld [vmem:[#allocation2 + $0xa50] ss:$28 sps:$4 sm:$0xff]   ;;  %v9824_v19 = vld [vmem:[#allocation2 + $0x518] ss:$28 sps:$4 sm:$0xff]  }
 0x157   :  { %3048 = vmatprep.subr.bf16.mxu0 %v9742_v21  ;;  %v9829_v21 = vld [vmem:[#allocation2 + $0xa8c] ss:$28 sps:$4 sm:$0xff]  }
 0x159   :  { %2947 = vmatpush1.bf16.msra.mxu1 %v9737_v22  ;;  %v9832_v22 = vld [vmem:[#allocation2 + $0x554] ss:$28 sps:$4 sm:$0xff]  }
 0x15a   :  { %3049 = vmatpush1.bf16.msra.mxu0 %v9740_v23  ;;  %2948 = vmatprep.subr.bf16.mxu1 %v9745_v4  ;;  %v9827_v23 = vld [vmem:[#allocation2 + $0xa88] ss:$28 sps:$4 sm:$0xff]   ;;  %v9830_v4 = vld [vmem:[#allocation2 + $0x550] ss:$28 sps:$4 sm:$0xff]  }
 0x15b   :  { %3050 = vmatprep.subr.bf16.mxu0 %v9748_v24  ;;  %v9835_v24 = vld [vmem:[#allocation2 + $0xac4] ss:$28 sps:$4 sm:$0xff]  }
 0x15d   :  { %2949 = vmatpush1.bf16.msra.mxu1 %v9743_v25  ;;  %v9838_v25 = vld [vmem:[#allocation2 + $0x58c] ss:$28 sps:$4 sm:$0xff]  }
 0x15e   :  { %3051 = vmatpush1.bf16.msra.mxu0 %v9746_v26  ;;  %2950 = vmatprep.subr.bf16.mxu1 %v9751_v27  ;;  %v9833_v26 = vld [vmem:[#allocation2 + $0xac0] ss:$28 sps:$4 sm:$0xff]   ;;  %v9836_v27 = vld [vmem:[#allocation2 + $0x588] ss:$28 sps:$4 sm:$0xff]  }
 0x15f   :  { %3052 = vmatprep.subr.bf16.mxu0 %v9754_v28  ;;  %v9841_v28 = vld [vmem:[#allocation2 + $0xafc] ss:$28 sps:$4 sm:$0xff]  }
 0x161   :  { %2951 = vmatpush1.bf16.msra.mxu1 %v9749_v50  ;;  %v9844_v50 = vld [vmem:[#allocation2 + $0x5c4] ss:$28 sps:$4 sm:$0xff]  }
 0x162   :  { %3053 = vmatpush1.bf16.msra.mxu0 %v9752_v7  ;;  %2952 = vmatprep.subr.bf16.mxu1 %v9757_v29  ;;  %v9839_v7 = vld [vmem:[#allocation2 + $0xaf8] ss:$28 sps:$4 sm:$0xff]   ;;  %v9842_v29 = vld [vmem:[#allocation2 + $0x5c0] ss:$28 sps:$4 sm:$0xff]  }
 0x163   :  { %3054 = vmatprep.subr.bf16.mxu0 %v9760_v30  ;;  %v9847_v30 = vld [vmem:[#allocation2 + $0xb34] ss:$28 sps:$4 sm:$0xff]  }
 0x165   :  { %2953 = vmatpush1.bf16.msra.mxu1 %v9755_v31  ;;  %v9850_v31 = vld [vmem:[#allocation2 + $0x5fc] ss:$28 sps:$4 sm:$0xff]  }
 0x166   :  { %3055 = vmatpush1.bf16.msra.mxu0 %v9758_v33  ;;  %2954 = vmatprep.subr.bf16.mxu1 %v9763_v32  ;;  %v9845_v33 = vld [vmem:[#allocation2 + $0xb30] ss:$28 sps:$4 sm:$0xff]  }
 0x167   :  { %3056 = vmatprep.subr.bf16.mxu0 %v9766_v34  ;;  %v9853_v32 = vld [vmem:[#allocation2 + $0xb6c] ss:$28 sps:$4 sm:$0xff]   ;;  %v9856_v34 = vld [vmem:[#allocation2 + $0x634] ss:$28 sps:$4 sm:$0xff]  }
 0x169   :  { %2955 = vmatpush1.bf16.msra.mxu1 %v9761_v35  ;;  %v9851_v35 = vld [vmem:[#allocation2 + $0xb68] ss:$28 sps:$4 sm:$0xff]  }
 0x16a   :  { %3057 = vmatpush1.bf16.msra.mxu0 %v9764_v36  ;;  %2956 = vmatprep.subr.bf16.mxu1 %v9769_v37  ;;  %v9854_v36 = vld [vmem:[#allocation2 + $0x630] ss:$28 sps:$4 sm:$0xff]   ;;  %v9859_v37 = vld [vmem:[#allocation2 + $0xba4] ss:$28 sps:$4 sm:$0xff]  }
 0x16b   :  { %3058 = vmatprep.subr.bf16.mxu0 %v9772_v38  ;;  %v9862_v38 = vld [vmem:[#allocation2 + $0x66c] ss:$28 sps:$4 sm:$0xff]  }
 0x16d   :  { %2957 = vmatpush1.bf16.msra.mxu1 %v9767_v39  ;;  %v9857_v39 = vld [vmem:[#allocation2 + $0xba0] ss:$28 sps:$4 sm:$0xff]  }
 0x16e   :  { %3059 = vmatpush1.bf16.msra.mxu0 %v9770_v40  ;;  %2958 = vmatprep.subr.bf16.mxu1 %v9775_v41  ;;  %v9860_v40 = vld [vmem:[#allocation2 + $0x668] ss:$28 sps:$4 sm:$0xff]   ;;  %v9865_v41 = vld [vmem:[#allocation2 + $0xbdc] ss:$28 sps:$4 sm:$0xff]  }
 0x16f   :  { %3060 = vmatprep.subr.bf16.mxu0 %v9778_v42  ;;  %v9868_v42 = vld [vmem:[#allocation2 + $0x6a4] ss:$28 sps:$4 sm:$0xff]  }
 0x171   :  { %2959 = vmatpush1.bf16.msra.mxu1 %v9773_v43 }
 0x172   :  { %3061 = vmatpush1.bf16.msra.mxu0 %v9776_v45  ;;  %2960 = vmatprep.subr.bf16.mxu1 %v9781_v46  ;;  %v9863_v45 = vld [vmem:[#allocation2 + $0xbd8] ss:$28 sps:$4 sm:$0xff]   ;;  %v9866_v46 = vld [vmem:[#allocation2 + $0x6a0] ss:$28 sps:$4 sm:$0xff]  }
 0x173   :  { %3073 = vmatprep.subr.bf16.mxu0 %v9784_v47 }
 0x175   :  { %3063 = vmatmul.mubr.bf16.vlgmr.msra.gmra.mrb[4].mxu0 %v11314_v54  ;;  %2961 = vmatpush1.bf16.msra.mxu1 %v9779_v48  ;;  %v9871_v48 = vld [vmem:[#allocation2 + $0xc14] ss:$28 sps:$4 sm:$0xff]  }
 0x176   :  { %3074 = vmatpush1.bf16.msra.mxu0 %v9782_v51  ;;  %2962 = vmatprep.subr.bf16.mxu1 %v9787_v52 }
 0x177   :  { %3075 = vmatprep.subr.bf16.mxu0 %v9790_v53  ;;  %3105 = vmatprep.mubr.bf16.mxu0 %v11320_v59  ;;  %v9874_v53 = vld [vmem:[#allocation2 + $0x6dc] ss:$28 sps:$4 sm:$0xff]  }
 0x179   :  { %2963 = vmatpush1.bf16.msra.mxu1 %v9785_v55  ;;  %v9869_v55 = vld [vmem:[#allocation2 + $0xc10] ss:$28 sps:$4 sm:$0xff]  }
 0x17a   :  { %3076 = vmatpush1.bf16.msra.mxu0 %v9788_v56  ;;  %2964 = vmatprep.subr.bf16.mxu1 %v9793_v57  ;;  %v9872_v56 = vld [vmem:[#allocation2 + $0x6d8] ss:$28 sps:$4 sm:$0xff]  }
 0x17b   :  { %3077 = vmatprep.subr.bf16.mxu0 %v9796_v58  ;;  %v9877_v57 = vld [vmem:[#allocation2 + $0x714] ss:$28 sps:$4 sm:$0xff]  }
 0x17c   :  { %v9878_v58 = vld [vmem:[#allocation2 + $0x1d8] ss:$28 sps:$4 sm:$0xff]  }
 0x17d   :  { %2965 = vmatpush1.bf16.msra.mxu1 %v9791_v60  ;;  %v9875_v60 = vld [vmem:[#allocation2 + $0x710] ss:$28 sps:$4 sm:$0xff]  }
 0x17e   :  { %3078 = vmatpush1.bf16.msra.mxu0 %v9794_v61  ;;  %2966 = vmatprep.subr.bf16.mxu1 %v9799_v62  ;;  %v9879_v61 = vld [vmem:[#allocation2 + $0x18] ss:$28 sps:$4 sm:$0xff]   ;;  %v9882_v62 = vld [vmem:[#allocation2 + $0x74c] ss:$28 sps:$4 sm:$0xff]  }
 0x17f   :  { %3079 = vmatprep.subr.bf16.mxu0 %v9802_v63  ;;  %v9883_v63 = vld [vmem:[#allocation2 + $0x210] ss:$28 sps:$4 sm:$0xff]  }
 0x181   :  { %2967 = vmatpush1.bf16.msra.mxu1 %v9797_v49  ;;  %v9880_v49 = vld [vmem:[#allocation2 + $0x748] ss:$28 sps:$4 sm:$0xff]  }
 0x182   :  { %3080 = vmatpush1.bf16.msra.mxu0 %v9800_v0  ;;  %2968 = vmatprep.subr.bf16.mxu1 %v9805_v1  ;;  %v9884_v0 = vld [vmem:[#allocation2 + $0x50] ss:$28 sps:$4 sm:$0xff]   ;;  %v11337_v1 = vld [vmem:[%s11593_s0 + $0x8] ss:$28 sps:$4 sm:$0xff]  }
 0x183   :  { %3081 = vmatprep.subr.bf16.mxu0 %v9808_v2  ;;  %v9887_v2 = vld [vmem:[#allocation2 + $0x784] ss:$28 sps:$4 sm:$0xff]  }
 0x185   :  { %2969 = vmatpush1.bf16.msra.mxu1 %v9803_v3  ;;  %v9888_v3 = vld [vmem:[#allocation2 + $0x248] ss:$28 sps:$4 sm:$0xff]  }
 0x186   :  { %3082 = vmatpush1.bf16.msra.mxu0 %v9806_v5  ;;  %2970 = vmatprep.subr.bf16.mxu1 %v9811_v6  ;;  %v9885_v5 = vld [vmem:[#allocation2 + $0x780] ss:$28 sps:$4 sm:$0xff]   ;;  %v9889_v6 = vld [vmem:[#allocation2 + $0x88] ss:$28 sps:$4 sm:$0xff]  }
 0x187   :  { %3083 = vmatprep.subr.bf16.mxu0 %v9814_v8  ;;  %v10874_v8 = vld [vmem:[%s11593_s0 + $0x4] ss:$28 sps:$4 sm:$0xff]  }
 0x189   :  { %2971 = vmatpush1.bf16.msra.mxu1 %v9809_v9  ;;  %v9892_v9 = vld [vmem:[#allocation2 + $0x7bc] ss:$28 sps:$4 sm:$0xff]  }
 0x18a   :  { %3084 = vmatpush1.bf16.msra.mxu0 %v9812_v10  ;;  %2972 = vmatprep.subr.bf16.mxu1 %v9817_v11  ;;  %v9893_v10 = vld [vmem:[#allocation2 + $0x280] ss:$28 sps:$4 sm:$0xff]   ;;  %v9890_v11 = vld [vmem:[#allocation2 + $0x7b8] ss:$28 sps:$4 sm:$0xff]  }
 0x18b   :  { %3085 = vmatprep.subr.bf16.mxu0 %v9820_v13  ;;  %v9894_v13 = vld [vmem:[#allocation2 + $0xc0] ss:$28 sps:$4 sm:$0xff]  }
 0x18d   :  { %2973 = vmatpush1.bf16.msra.mxu1 %v9815_v14  ;;  %v9897_v14 = vld [vmem:[#allocation2 + $0x7f4] ss:$28 sps:$4 sm:$0xff]  }
 0x18e   :  { %3086 = vmatpush1.bf16.msra.mxu0 %v9818_v15  ;;  %2974 = vmatprep.subr.bf16.mxu1 %v9823_v16  ;;  %v9898_v15 = vld [vmem:[#allocation2 + $0x2b8] ss:$28 sps:$4 sm:$0xff]   ;;  %v9895_v16 = vld [vmem:[#allocation2 + $0x7f0] ss:$28 sps:$4 sm:$0xff]  }
 0x18f   :  { %3087 = vmatprep.subr.bf16.mxu0 %v9826_v17  ;;  %v9899_v17 = vld [vmem:[#allocation2 + $0xf8] ss:$28 sps:$4 sm:$0xff]  }
 0x191   :  { %2975 = vmatpush1.bf16.msra.mxu1 %v9821_v18  ;;  %v9902_v18 = vld [vmem:[#allocation2 + $0x82c] ss:$28 sps:$4 sm:$0xff]  }
 0x192   :  { %3088 = vmatpush1.bf16.msra.mxu0 %v9824_v19  ;;  %2987 = vmatprep.subr.bf16.mxu1 %v9829_v21  ;;  %v9903_v19 = vld [vmem:[#allocation2 + $0x2f0] ss:$28 sps:$4 sm:$0xff]   ;;  %v9900_v21 = vld [vmem:[#allocation2 + $0x828] ss:$28 sps:$4 sm:$0xff]  }
 0x193   :  { %3089 = vmatprep.subr.bf16.mxu0 %v9832_v22  ;;  %v9904_v22 = vld [vmem:[#allocation2 + $0x130] ss:$28 sps:$4 sm:$0xff]  }
 0x194   :  { %2977 = vmatmul.mubr.bf16.vlgmr.msra.gmra.mrb[4].mxu1 %v11296_v12  ;;  %v9848_v12 = vld [vmem:[#allocation2 + $0x5f8] ss:$28 sps:$4 sm:$0xff]  }
 0x195   :  { %2988 = vmatpush1.bf16.msra.mxu1 %v9827_v23  ;;  %3019 = vmatprep.mubr.bf16.mxu1 %v11077_v20  ;;  %v9907_v23 = vld [vmem:[#allocation2 + $0x864] ss:$28 sps:$4 sm:$0xff]  }
 0x196   :  { %3090 = vmatpush1.bf16.msra.mxu0 %v9830_v4  ;;  %2989 = vmatprep.subr.bf16.mxu1 %v9835_v24  ;;  %v9908_v4 = vld [vmem:[#allocation2 + $0x328] ss:$28 sps:$4 sm:$0xff]   ;;  %v9905_v24 = vld [vmem:[#allocation2 + $0x860] ss:$28 sps:$4 sm:$0xff]  }
 0x197   :  { %3091 = vmatprep.subr.bf16.mxu0 %v9838_v25  ;;  %v9909_v25 = vld [vmem:[#allocation2 + $0x168] ss:$28 sps:$4 sm:$0xff]  }
 0x199   :  { %2990 = vmatpush1.bf16.msra.mxu1 %v9833_v26  ;;  %v9912_v26 = vld [vmem:[#allocation2 + $0x89c] ss:$28 sps:$4 sm:$0xff]  }
 0x19a   :  { %3092 = vmatpush1.bf16.msra.mxu0 %v9836_v27  ;;  %2991 = vmatprep.subr.bf16.mxu1 %v9841_v28  ;;  %v9913_v27 = vld [vmem:[#allocation2 + $0x360] ss:$28 sps:$4 sm:$0xff]   ;;  %v9910_v28 = vld [vmem:[#allocation2 + $0x898] ss:$28 sps:$4 sm:$0xff]  }
 0x19b   :  { %3093 = vmatprep.subr.bf16.mxu0 %v9844_v50  ;;  %v9914_v50 = vld [vmem:[#allocation2 + $0x1a0] ss:$28 sps:$4 sm:$0xff]  }
 0x19d   :  { %2992 = vmatpush1.bf16.msra.mxu1 %v9839_v7  ;;  %v9917_v7 = vld [vmem:[#allocation2 + $0x8d4] ss:$28 sps:$4 sm:$0xff]  }
 0x19e   :  { %3094 = vmatpush1.bf16.msra.mxu0 %v9842_v29  ;;  %2993 = vmatprep.subr.bf16.mxu1 %v9847_v30  ;;  %v9918_v29 = vld [vmem:[#allocation2 + $0x558] ss:$28 sps:$4 sm:$0xff]   ;;  %v9915_v30 = vld [vmem:[#allocation2 + $0x8d0] ss:$28 sps:$4 sm:$0xff]  }
 0x19f   :  { %3095 = vmatprep.subr.bf16.mxu0 %v9850_v31  ;;  %v9919_v31 = vld [vmem:[#allocation2 + $0x398] ss:$28 sps:$4 sm:$0xff]  }
 0x1a1   :  { %2994 = vmatpush1.bf16.msra.mxu1 %v9845_v33  ;;  %v9922_v33 = vld [vmem:[#allocation2 + $0x90c] ss:$28 sps:$4 sm:$0xff]  }
 0x1a2   :  { %3096 = vmatpush1.bf16.msra.mxu0 %v9848_v12  ;;  %2995 = vmatprep.subr.bf16.mxu1 %v9853_v32  ;;  %v9923_v12 = vld [vmem:[#allocation2 + $0x590] ss:$28 sps:$4 sm:$0xff]   ;;  %v9920_v32 = vld [vmem:[#allocation2 + $0x908] ss:$28 sps:$4 sm:$0xff]  }
 0x1a3   :  { %3097 = vmatprep.subr.bf16.mxu0 %v9856_v34  ;;  %v9924_v34 = vld [vmem:[#allocation2 + $0x3d0] ss:$28 sps:$4 sm:$0xff]  }
 0x1a5   :  { %2996 = vmatpush1.bf16.msra.mxu1 %v9851_v35  ;;  %v9927_v35 = vld [vmem:[#allocation2 + $0x944] ss:$28 sps:$4 sm:$0xff]  }
 0x1a6   :  { %3098 = vmatpush1.bf16.msra.mxu0 %v9854_v36  ;;  %2997 = vmatprep.subr.bf16.mxu1 %v9859_v37  ;;  %v9928_v36 = vld [vmem:[#allocation2 + $0x5c8] ss:$28 sps:$4 sm:$0xff]   ;;  %v9925_v37 = vld [vmem:[#allocation2 + $0x940] ss:$28 sps:$4 sm:$0xff]  }
 0x1a7   :  { %3099 = vmatprep.subr.bf16.mxu0 %v9862_v38  ;;  %v11325_v43 = vpop.f32.mrb[0].mxu1  ;;  %v9929_v38 = vld [vmem:[#allocation2 + $0x408] ss:$28 sps:$4 sm:$0xff]  }
 0x1a8   :  { %v11327_v47 = vpop.f32.mrb[1].mxu1 }
 0x1a9   :  { %v11329_v51 = vpop.f32.mrb[2].mxu1  ;;  %2998 = vmatpush1.bf16.msra.mxu1 %v9857_v39  ;;  %v9932_v39 = vld [vmem:[#allocation2 + $0x97c] ss:$28 sps:$4 sm:$0xff]  }
 0x1aa   :  { %3100 = vmatpush1.bf16.msra.mxu0 %v9860_v40  ;;  %v11331_v52 = vpop.f32.mrb[3].mxu1  ;;  %2999 = vmatprep.subr.bf16.mxu1 %v9865_v41  ;;  %v9933_v40 = vld [vmem:[#allocation2 + $0x600] ss:$28 sps:$4 sm:$0xff]   ;;  %v9930_v41 = vld [vmem:[#allocation2 + $0x978] ss:$28 sps:$4 sm:$0xff]  }
 0x1ab   :  { %3101 = vmatprep.subr.bf16.mxu0 %v9868_v42  ;;  %v9934_v42 = vld [vmem:[#allocation2 + $0x440] ss:$28 sps:$4 sm:$0xff]  }
 0x1ad   :  { %3000 = vmatpush1.bf16.msra.mxu1 %v9863_v45  ;;  %v9938_v45 = vld [vmem:[#allocation2 + $0x638] ss:$28 sps:$4 sm:$0xff]  }
 0x1ae   :  { %3102 = vmatpush1.bf16.msra.mxu0 %v9866_v46  ;;  %3001 = vmatprep.subr.bf16.mxu1 %v9871_v48  ;;  %v9935_v46 = vld [vmem:[#allocation2 + $0x9b0] ss:$28 sps:$4 sm:$0xff]   ;;  %v9939_v48 = vld [vmem:[#allocation2 + $0x478] ss:$28 sps:$4 sm:$0xff]  }
 0x1af   :  { %3103 = vmatprep.subr.bf16.mxu0 %v9874_v53  ;;  %v9942_v53 = vld [vmem:[#allocation2 + $0x9ec] ss:$28 sps:$4 sm:$0xff]  }
 0x1b1   :  { %3002 = vmatpush1.bf16.msra.mxu1 %v9869_v55  ;;  %v9940_v55 = vld [vmem:[#allocation2 + $0x9e8] ss:$28 sps:$4 sm:$0xff]  }
 0x1b2   :  { %3104 = vmatpush1.bf16.msra.mxu0 %v9872_v56  ;;  %9087 = vmatprep.subr.bf16.mxu1 %v9878_v58  ;;  %v9944_v56 = vld [vmem:[#allocation2 + $0x4b0] ss:$28 sps:$4 sm:$0xff]   ;;  %v9948_v58 = vld [vmem:[#allocation2 + $0x6a8] ss:$28 sps:$4 sm:$0xff]  }
 0x1b3   :  { %3116 = vmatprep.subr.bf16.mxu0 %v9877_v57  ;;  %v9947_v57 = vld [vmem:[#allocation2 + $0xa24] ss:$28 sps:$4 sm:$0xff]  }
 0x1b4   :  { %3020 = vmatmul.mubr.bf16.vlgmr.msra.gmra.mrb[4].mxu1 %v11305_v44  ;;  %v11346_v44 = vld [vmem:[%s11593_s0 + $0x14] ss:$28 sps:$4 sm:$0xff]  }
 0x1b5   :  { %3106 = vmatmul.mubr.bf16.vlgmr.msra.gmra.mrb[4].mxu0 %v11337_v1  ;;  %9088 = vmatpush3.bf16.msra.mxu1 %v9879_v61  ;;  %v9949_v61 = vld [vmem:[#allocation2 + $0x4e8] ss:$28 sps:$4 sm:$0xff]  }
 0x1b6   :  { %3117 = vmatpush1.bf16.msra.mxu0 %v9875_v60  ;;  %9089 = vmatprep.subr.bf16.mxu1 %v9883_v63  ;;  %v9945_v60 = vld [vmem:[#allocation2 + $0xa20] ss:$28 sps:$4 sm:$0xff]  }
 0x1b7   :  { %3118 = vmatprep.subr.bf16.mxu0 %v9882_v62  ;;  %3234 = vmatprep.mubr.bf16.mxu1 %v10874_v8  ;;  %v9952_v62 = vld [vmem:[#allocation2 + $0xa5c] ss:$28 sps:$4 sm:$0xff]   ;;  %v9962_v8 = vld [vmem:[#allocation2 + $0xacc] ss:$28 sps:$4 sm:$0xff]  }
 0x1b8   :  { %3148 = vmatprep.mubr.bf16.mxu0 %v11346_v44  ;;  %v9953_v63 = vld [vmem:[#allocation2 + $0x6e0] ss:$28 sps:$4 sm:$0xff]  }
 0x1b9   :  { %9090 = vmatpush3.bf16.msra.mxu1 %v9884_v0  ;;  %v9954_v0 = vld [vmem:[#allocation2 + $0x520] ss:$28 sps:$4 sm:$0xff]  }
 0x1ba   :  { %3119 = vmatpush1.bf16.msra.mxu0 %v9880_v49  ;;  %9091 = vmatprep.subr.bf16.mxu1 %v9888_v3  ;;  %v9950_v49 = vld [vmem:[#allocation2 + $0xa58] ss:$28 sps:$4 sm:$0xff]  }
 0x1bb   :  { %3120 = vmatprep.subr.bf16.mxu0 %v9887_v2  ;;  %v9957_v2 = vld [vmem:[#allocation2 + $0xa94] ss:$28 sps:$4 sm:$0xff]  }
 0x1bc   :  { %v9958_v3 = vld [vmem:[#allocation2 + $0x8d8] ss:$28 sps:$4 sm:$0xff]  }
 0x1bd   :  { %9092 = vmatpush3.bf16.msra.mxu1 %v9889_v6  ;;  %v9959_v6 = vld [vmem:[#allocation2 + $0x718] ss:$28 sps:$4 sm:$0xff]  }
 0x1be   :  { %3121 = vmatpush1.bf16.msra.mxu0 %v9885_v5  ;;  %9093 = vmatprep.subr.bf16.mxu1 %v9893_v10  ;;  %v9955_v5 = vld [vmem:[#allocation2 + $0xa90] ss:$28 sps:$4 sm:$0xff]   ;;  %v9960_v10 = vld [vmem:[#allocation2 + $0xac8] ss:$28 sps:$4 sm:$0xff]  }
 0x1bf   :  { %3122 = vmatprep.subr.bf16.mxu0 %v9892_v9  ;;  %v9963_v9 = vld [vmem:[#allocation2 + $0x910] ss:$28 sps:$4 sm:$0xff]  }
 0x1c1   :  { %9094 = vmatpush3.bf16.msra.mxu1 %v9894_v13  ;;  %v11355_v13 = vld [vmem:[%s11593_s0 + $0x10] ss:$28 sps:$4 sm:$0xff]  }
 0x1c2   :  { %3123 = vmatpush1.bf16.msra.mxu0 %v9890_v11  ;;  %9095 = vmatprep.subr.bf16.mxu1 %v9898_v15  ;;  %v9964_v11 = vld [vmem:[#allocation2 + $0x750] ss:$28 sps:$4 sm:$0xff]   ;;  %v9968_v15 = vld [vmem:[#allocation2 + $0x948] ss:$28 sps:$4 sm:$0xff]  }
 0x1c3   :  { %3124 = vmatprep.subr.bf16.mxu0 %v9897_v14  ;;  %v9967_v14 = vld [vmem:[#allocation2 + $0xb04] ss:$28 sps:$4 sm:$0xff]  }
 0x1c5   :  { %9096 = vmatpush3.bf16.msra.mxu1 %v9899_v17  ;;  %v9965_v17 = vld [vmem:[#allocation2 + $0xb00] ss:$28 sps:$4 sm:$0xff]  }
 0x1c6   :  { %3125 = vmatpush1.bf16.msra.mxu0 %v9895_v16  ;;  %9097 = vmatprep.subr.bf16.mxu1 %v9903_v19  ;;  %v599_v16 = vlaneseq  ;;  %v9973_v19 = vld [vmem:[#allocation2 + $0x980] ss:$28 sps:$4 sm:$0xff]  }
 0x1c7   :  { %3126 = vmatprep.subr.bf16.mxu0 %v9902_v18  ;;  %v9969_v18 = vld [vmem:[#allocation2 + $0x788] ss:$28 sps:$4 sm:$0xff]  }
 0x1c9   :  { %9098 = vmatpush3.bf16.msra.mxu1 %v9904_v22  ;;  %v9970_v22 = vld [vmem:[#allocation2 + $0xb38] ss:$28 sps:$4 sm:$0xff]  }
 0x1ca   :  { %3127 = vmatpush1.bf16.msra.mxu0 %v9900_v21  ;;  %9099 = vmatprep.subr.bf16.mxu1 %v9908_v4  ;;  %v11360_v21 = vshrl.u32 %v599_v16, 7  ;;  %v597_v4 = vld [vmem:[#allocation4] sm:$0xff] }
 0x1cb   :  { %3128 = vmatprep.subr.bf16.mxu0 %v9907_v23  ;;  %v9974_v23 = vld [vmem:[#allocation2 + $0x7c0] ss:$28 sps:$4 sm:$0xff]  }
 0x1cc   :  { %v10014_v16 = vld [vmem:[#allocation6 + $0x34] ss:$8 sps:$4 sm:$0xff]  }
 0x1cd   :  { %9100 = vmatpush3.bf16.msra.mxu1 %v9909_v25  ;;  %v9978_v25 = vld [vmem:[#allocation2 + $0x9b8] ss:$28 sps:$4 sm:$0xff]  }
 0x1ce   :  { %3129 = vmatpush1.bf16.msra.mxu0 %v9905_v24  ;;  %9101 = vmatprep.subr.bf16.mxu1 %v9913_v27  ;;  %v9977_v24 = vld [vmem:[#allocation2 + $0xb74] ss:$28 sps:$4 sm:$0xff]  }
 0x1cf   :  { %3130 = vmatprep.subr.bf16.mxu0 %v9912_v26  ;;  %v11363_v26 = vsub.s32 0, %v11360_v21  ;;  %v9975_v27 = vld [vmem:[#allocation2 + $0xb70] ss:$28 sps:$4 sm:$0xff]  }
 0x1d1   :  { %9102 = vmatpush3.bf16.msra.mxu1 %v9914_v50  ;;  %v9982_v50 = vld [vmem:[#allocation2 + $0xbac] ss:$28 sps:$4 sm:$0xff]  }
 0x1d2   :  { %3131 = vmatpush1.bf16.msra.mxu0 %v9910_v28  ;;  %9109 = vmatprep.subr.bf16.mxu1 %v9918_v29  ;;  %v9979_v28 = vld [vmem:[#allocation2 + $0x7f8] ss:$28 sps:$4 sm:$0xff]   ;;  %v602_v29 = vrot.slane %v597_v4, %v11363_v26 }
 0x1d3   :  { %3132 = vmatprep.subr.bf16.mxu0 %v9917_v7  ;;  %v9983_v7 = vld [vmem:[#allocation2 + $0x9f0] ss:$28 sps:$4 sm:$0xff]  }
 0x1d4   :  { %3235 = vmatmul.mubr.bf16.vlgmr.msra.gmra.mrb[8].mxu1 %v11314_v54  ;;  %v9937_v54 = vld [vmem:[#allocation2 + $0x9b4] ss:$28 sps:$4 sm:$0xff]  }
 0x1d5   :  { %9110 = vmatpush3.bf16.msra.mxu1 %v9919_v31  ;;  %3275 = vmatprep.mubr.bf16.mxu1 %v11320_v59  ;;  %v9943_v59 = vld [vmem:[#allocation2 + $0x670] ss:$28 sps:$4 sm:$0xff]   ;;  %v9980_v31 = vld [vmem:[#allocation2 + $0xba8] ss:$28 sps:$4 sm:$0xff]  }
 0x1d6   :  { %3133 = vmatpush1.bf16.msra.mxu0 %v9915_v30  ;;  %9111 = vmatprep.subr.bf16.mxu1 %v9923_v12  ;;  %v9987_v12 = vld [vmem:[#allocation2 + $0xbe4] ss:$28 sps:$4 sm:$0xff]  }
 0x1d7   :  { %3134 = vmatprep.subr.bf16.mxu0 %v9922_v33  ;;  %v9984_v33 = vld [vmem:[#allocation2 + $0x830] ss:$28 sps:$4 sm:$0xff]  }
 0x1d9   :  { %9112 = vmatpush3.bf16.msra.mxu1 %v9924_v34  ;;  %v9988_v34 = vld [vmem:[#allocation2 + $0xa28] ss:$28 sps:$4 sm:$0xff]  }
 0x1da   :  { %3135 = vmatpush1.bf16.msra.mxu0 %v9920_v32  ;;  %9113 = vmatprep.subr.bf16.mxu1 %v9928_v36  ;;  %v2721_v32 = vadd.f32 %v11325_v43, %v602_v29 }
 0x1db   :  { %3136 = vmatprep.subr.bf16.mxu0 %v9927_v35 }
 0x1dd   :  { %9114 = vmatpush3.bf16.msra.mxu1 %v9929_v38  ;;  %v9989_v38 = vld [vmem:[#allocation2 + $0x868] ss:$28 sps:$4 sm:$0xff]  }
 0x1de   :  { %3137 = vmatpush1.bf16.msra.mxu0 %v9925_v37  ;;  %9115 = vmatprep.subr.bf16.mxu1 %v9933_v40  ;;  %v9985_v37 = vld [vmem:[#allocation2 + $0xbe0] ss:$28 sps:$4 sm:$0xff]  }
 0x1df   :  { %3138 = vmatprep.subr.bf16.mxu0 %v9932_v39  ;;  %v2725_v39 = vadd.f32 %v11329_v51, %v602_v29  ;;  %v10035_v29 = vld [vmem:[#allocation6 + $0xa4] ss:$8 sps:$4 sm:$0xff]  }
 0x1e1   :  { %9116 = vmatpush3.bf16.msra.mxu1 %v9934_v42  ;;  %v9992_v42 = vld [vmem:[#allocation2 + $0xc1c] ss:$28 sps:$4 sm:$0xff]  }
 0x1e2   :  { %3139 = vmatpush1.bf16.msra.mxu0 %v9930_v41  ;;  %9117 = vmatprep.subr.bf16.mxu1 %v9938_v45 }
 0x1e3   :  { %3140 = vmatprep.subr.bf16.mxu0 %v9937_v54 }
 0x1e5   :  { %9118 = vmatpush3.bf16.msra.mxu1 %v9939_v48 }
 0x1e6   :  { %3141 = vmatpush1.bf16.msra.mxu0 %v9935_v46  ;;  %9119 = vmatprep.subr.bf16.mxu1 %v9943_v59  ;;  %v9990_v59 = vld [vmem:[#allocation2 + $0xc18] ss:$28 sps:$4 sm:$0xff]  }
 0x1e7   :  { %3142 = vmatprep.subr.bf16.mxu0 %v9942_v53  ;;  %v9993_v53 = vld [vmem:[#allocation2 + $0xa60] ss:$28 sps:$4 sm:$0xff]  }
 0x1e9   :  { %9120 = vmatpush3.bf16.msra.mxu1 %v9944_v56 }
 0x1ea   :  { %3143 = vmatpush1.bf16.msra.mxu0 %v9940_v55  ;;  %9121 = vmatprep.subr.bf16.mxu1 %v9948_v58  ;;  %v9994_v55 = vld [vmem:[#allocation2 + $0x8a0] ss:$28 sps:$4 sm:$0xff]  }
 0x1eb   :  { %3144 = vmatprep.subr.bf16.mxu0 %v9947_v57 }
 0x1ed   :  { %9122 = vmatpush3.bf16.msra.mxu1 %v9949_v61  ;;  %v9995_v61 = vld [vmem:[#allocation2 + $0xa98] ss:$28 sps:$4 sm:$0xff]  }
 0x1ee   :  { %3145 = vmatpush1.bf16.msra.mxu0 %v9945_v60  ;;  %9123 = vmatprep.subr.bf16.mxu1 %v9953_v63  ;;  %v10877_v63 = vld [vmem:[%s11593_s0 + $0x18] ss:$28 sps:$4 sm:$0xff]  }
 0x1ef   :  { %3146 = vmatprep.subr.bf16.mxu0 %v9952_v62  ;;  %v11078_v62 = vmov 0.0  }
 0x1f1   :  { %9124 = vmatpush3.bf16.msra.mxu1 %v9954_v0  ;;  %v9997_v0 = vld [vmem:[#allocation2 + $0xb08] ss:$28 sps:$4 sm:$0xff]  }
 0x1f2   :  { %3147 = vmatpush1.bf16.msra.mxu0 %v9950_v49  ;;  %9131 = vmatprep.subr.bf16.mxu1 %v9958_v3  ;;  %v9996_v49 = vld [vmem:[#allocation2 + $0xad0] ss:$28 sps:$4 sm:$0xff]   ;;  %v9999_v3 = vld [vmem:[#allocation2 + $0xb78] ss:$28 sps:$4 sm:$0xff]  }
 0x1f3   :  { %3159 = vmatprep.subr.bf16.mxu0 %v9957_v2  ;;  %v9998_v2 = vld [vmem:[#allocation2 + $0xb40] ss:$28 sps:$4 sm:$0xff]  }
 0x1f4   :  { %3276 = vmatmul.mubr.bf16.vlgmr.msra.gmra.mrb[12].mxu1 %v11337_v1  ;;  %v9972_v1 = vld [vmem:[#allocation2 + $0xb3c] ss:$28 sps:$4 sm:$0xff]  }
 0x1f5   :  { %3149 = vmatmul.mubr.bf16.vlgmr.msra.gmra.mrb[4].mxu0 %v11355_v13  ;;  %9132 = vmatpush3.bf16.msra.mxu1 %v9959_v6  ;;  %v10001_v6 = vld [vmem:[#allocation2 + $0xbe8] ss:$28 sps:$4 sm:$0xff]  }
 0x1f6   :  { %3160 = vmatpush1.bf16.msra.mxu0 %v9955_v5  ;;  %9133 = vmatprep.subr.bf16.mxu1 %v9963_v9  ;;  %v10000_v5 = vld [vmem:[#allocation2 + $0xbb0] ss:$28 sps:$4 sm:$0xff]  }
 0x1f7   :  { %3161 = vmatprep.subr.bf16.mxu0 %v9962_v8  ;;  %3191 = vmatprep.mubr.bf16.mxu0 %v11077_v20  ;;  %v10002_v8 = vld [vmem:[#allocation2 + $0xc20] ss:$28 sps:$4 sm:$0xff]   ;;  %v10005_v9 = vld [vmem:[#allocation6 + $0x4] ss:$8 sps:$4 sm:$0xff]  }
 0x1f8   :  { %3316 = vmatprep.mubr.bf16.mxu1 %v11346_v44  ;;  %v11366_v44 = vsub.s32 1, %v11360_v21 }
 0x1f9   :  { %9134 = vmatpush3.bf16.msra.mxu1 %v9964_v11  ;;  %v10008_v11 = vld [vmem:[#allocation6 + $0x14] ss:$8 sps:$4 sm:$0xff]  }
 0x1fa   :  { %3162 = vmatpush1.bf16.msra.mxu0 %v9960_v10  ;;  %9135 = vmatprep.subr.bf16.mxu1 %v9968_v15  ;;  %v606_v30 = vrot.slane %v597_v4, %v11366_v44  ;;  %v10003_v10 = vld [vmem:[#allocation6] ss:$8 sps:$4 sm:$0xff]  }
 0x1fb   :  { %3163 = vmatprep.subr.bf16.mxu0 %v9967_v14  ;;  %v10011_v14 = vld [vmem:[#allocation6 + $0x24] ss:$8 sps:$4 sm:$0xff]   ;;  %v10009_v15 = vld [vmem:[#allocation6 + $0x20] ss:$8 sps:$4 sm:$0xff]  }
 0x1fc   :  { %v2723_v35 = vadd.f32 %v11327_v47, %v606_v30  ;;  %v2727_v54 = vadd.f32 %v11331_v52, %v606_v30  ;;  %v10021_v4 = vld [vmem:[#allocation6 + $0x60] ss:$8 sps:$4 sm:$0xff]  }
 0x1fd   :  { %9136 = vmatpush3.bf16.msra.mxu1 %v9969_v18  ;;  %v10017_v18 = vld [vmem:[#allocation6 + $0x44] ss:$8 sps:$4 sm:$0xff]   ;;  %v10033_v30 = vld [vmem:[#allocation6 + $0xa0] ss:$8 sps:$4 sm:$0xff]  }
 0x1fe   :  { %3164 = vmatpush1.bf16.msra.mxu0 %v9965_v17  ;;  %9137 = vmatprep.subr.bf16.mxu1 %v9973_v19  ;;  %v10012_v17 = vld [vmem:[#allocation6 + $0x30] ss:$8 sps:$4 sm:$0xff]   ;;  %v10020_v19 = vld [vmem:[#allocation6 + $0x54] ss:$8 sps:$4 sm:$0xff]  }
 0x1ff   :  { %3165 = vmatprep.subr.bf16.mxu0 %v9972_v1  ;;  %v10015_v1 = vld [vmem:[#allocation6 + $0x40] ss:$8 sps:$4 sm:$0xff]  }
 0x201   :  { %9138 = vmatpush3.bf16.msra.mxu1 %v9974_v23  ;;  %v10023_v23 = vld [vmem:[#allocation6 + $0x64] ss:$8 sps:$4 sm:$0xff]  }
 0x202   :  { %3166 = vmatpush1.bf16.msra.mxu0 %v9970_v22  ;;  %9139 = vmatprep.subr.bf16.mxu1 %v9978_v25  ;;  %v10018_v22 = vld [vmem:[#allocation6 + $0x50] ss:$8 sps:$4 sm:$0xff]  }
 0x203   :  { %3167 = vmatprep.subr.bf16.mxu0 %v9977_v24  ;;  %v10026_v24 = vld [vmem:[#allocation6 + $0x74] ss:$8 sps:$4 sm:$0xff]   ;;  %v10024_v25 = vld [vmem:[#allocation6 + $0x70] ss:$8 sps:$4 sm:$0xff]  }
 0x205   :  { %9140 = vmatpush3.bf16.msra.mxu1 %v9979_v28  ;;  %v10027_v28 = vld [vmem:[#allocation6 + $0x80] ss:$8 sps:$4 sm:$0xff]  }
 0x206   :  { %3168 = vmatpush1.bf16.msra.mxu0 %v9975_v27  ;;  %9141 = vmatprep.subr.bf16.mxu1 %v9983_v7  ;;  %v10029_v27 = vld [vmem:[#allocation6 + $0x84] ss:$8 sps:$4 sm:$0xff]   ;;  %v10030_v7 = vld [vmem:[#allocation6 + $0x90] ss:$8 sps:$4 sm:$0xff]  }
 0x207   :  { %3169 = vmatprep.subr.bf16.mxu0 %v9982_v50  ;;  %v10032_v50 = vld [vmem:[#allocation6 + $0x94] ss:$8 sps:$4 sm:$0xff]  }
 0x208   :  { %v2849_v36 = vpop.f32.mrb[0].mxu0 }
 0x209   :  { %v9307_v40 = vadd.f32 %v2849_v36, %v2721_v32  ;;  %v2851_v41 = vpop.f32.mrb[1].mxu0  ;;  %9142 = vmatpush3.bf16.msra.mxu1 %v9984_v33  ;;  %v10036_v33 = vld [vmem:[#allocation6 + $0xb0] ss:$8 sps:$4 sm:$0xff]   ;;  %v10039_v32 = vld [vmem:[#allocation6 + $0xc0] ss:$8 sps:$4 sm:$0xff]  }
 0x20a   :  { %v9309_v45 = vadd.f32 %v2851_v41, %v2723_v35  ;;  %v2853_v46 = vpop.f32.mrb[2].mxu0  ;;  %3170 = vmatpush1.bf16.msra.mxu0 %v9980_v31  ;;  %9143 = vmatprep.subr.bf16.mxu1 %v9988_v34  ;;  %v10038_v31 = vld [vmem:[#allocation6 + $0xb4] ss:$8 sps:$4 sm:$0xff]   ;;  %v10042_v35 = vld [vmem:[#allocation6 + $0xd0] ss:$8 sps:$4 sm:$0xff]  }
 0x20b   :  { %v9311_v43 = vadd.f32 %v2853_v46, %v2725_v39  ;;  %v2855_v48 = vpop.f32.mrb[3].mxu0  ;;  %3171 = vmatprep.subr.bf16.mxu0 %v9987_v12  ;;  %v3366_v56 = vmax.f32 %v9307_v40, 0.0  ;;  %v10041_v12 = vld [vmem:[#allocation6 + $0xc4] ss:$8 sps:$4 sm:$0xff]   ;;  %v10044_v34 = vld [vmem:[#allocation6 + $0xd4] ss:$8 sps:$4 sm:$0xff]  }
 0x20c   :  { %v9313_v47 = vadd.f32 %v2855_v48, %v2727_v54  ;;  %v3367_v51 = vmax.f32 %v9309_v45, 0.0  ;;  %v10047_v36 = vld [vmem:[#allocation6 + $0xe4] ss:$8 sps:$4 sm:$0xff]   ;;  %v10048_v39 = vld [vmem:[#allocation6 + $0xf0] ss:$8 sps:$4 sm:$0xff]  }
 0x20d   :  { %v3373_v57 = vmax.f32 %v9311_v43, 0.0  ;;  %9144 = vmatpush3.bf16.msra.mxu1 %v9989_v38  ;;  %v10050_v38 = vld [vmem:[#allocation6 + $0xf4] ss:$8 sps:$4 sm:$0xff]   ;;  %v10053_v40 = vld [vmem:[#allocation6 + $0x104] ss:$8 sps:$4 sm:$0xff]  }
 0x20e   :  { %v3374_v58 = vmax.f32 %v9313_v47, 0.0  ;;  %3172 = vmatpush1.bf16.msra.mxu0 %v9985_v37  ;;  %9145 = vmatprep.subr.bf16.mxu1 %v9993_v53  ;;  %v10045_v37 = vld [vmem:[#allocation6 + $0xe0] ss:$8 sps:$4 sm:$0xff]   ;;  %v10054_v54 = vld [vmem:[#allocation6 + $0x110] ss:$8 sps:$4 sm:$0xff]  }
 0x20f   :  { %v11374_v60 = vpack.c.bf16 %v3373_v57, %v3366_v56  ;;  %3173 = vmatprep.subr.bf16.mxu0 %v9992_v42  ;;  %v10051_v41 = vld [vmem:[#allocation6 + $0x100] ss:$8 sps:$4 sm:$0xff]   ;;  %v10056_v42 = vld [vmem:[#allocation6 + $0x114] ss:$8 sps:$4 sm:$0xff]   ;;  %v10059_v45 = vld [vmem:[#allocation6 + $0x124] ss:$8 sps:$4 sm:$0xff]  }
 0x210   :  { %v3381_v52 = vpack.c.bf16 %v3374_v58, %v3367_v51  ;;  %v10057_v46 = vld [vmem:[#allocation6 + $0x120] ss:$8 sps:$4 sm:$0xff]   ;;  %v10062_v43 = vld [vmem:[#allocation6 + $0x134] ss:$8 sps:$4 sm:$0xff]   ;;  %v10060_v48 = vld [vmem:[#allocation6 + $0x130] ss:$8 sps:$4 sm:$0xff]  }
 0x211   :  { %9146 = vmatpush3.bf16.msra.mxu1 %v9994_v55  ;;  %v10065_v53 = vld [vmem:[#allocation6 + $0x144] ss:$8 sps:$4 sm:$0xff]   ;;  %v10063_v47 = vld [vmem:[#allocation6 + $0x140] ss:$8 sps:$4 sm:$0xff]   ;;  %v11396_v55 = vsub.s32 3, %v11360_v21  ;;  %v11398_v51 = vld [vmem:[#allocation4] sm:$0xff] }
 0x212   :  { %3174 = vmatpush1.bf16.msra.mxu0 %v9990_v59  ;;  %9246 = vmatprep.subr.bf16.mxu1 %v11078_v62  ;;  %v11393_v59 = vsub.s32 2, %v11360_v21  ;;  %v10068_v56 = vld [vmem:[#allocation6 + $0x154] ss:$8 sps:$4 sm:$0xff]   ;;  %v10066_v57 = vld [vmem:[#allocation6 + $0x150] ss:$8 sps:$4 sm:$0xff]  }
 0x214   :  { %3317 = vmatmul.mubr.bf16.vlgmr.msra.gmra.mrb[16].mxu1 %v11355_v13  ;;  %v10006_v13 = vld [vmem:[#allocation6 + $0x10] ss:$8 sps:$4 sm:$0xff]   ;;  %v610_v58 = vrot.slane %v11398_v51, %v11393_v59 }
 0x215   :  { %3192 = vmatmul.mubr.bf16.vlgmr.msra.gmra.mrb[4].mxu0 %v10877_v63  ;;  %9247 = vmatpush3.bf16.msra.mxu1 %v9995_v61 }
 0x216   :  { %9262 = vmatprep.mubr.msk.bf16.mxu1 %vm11079_vm0, %v11078_v62  ;;  %9248 = vmatprep.subr.bf16.mxu1 %v11078_v62 }
 0x217   :  { %4677 = vmatprep.mubr.bf16.mxu0 %v11077_v20 }
 0x219   :  { %9249 = vmatpush3.bf16.msra.mxu1 %v9996_v49 }
 0x21a   :  { %9250 = vmatprep.subr.bf16.mxu1 %v11078_v62 }
 0x21d   :  { %9251 = vmatpush3.bf16.msra.mxu1 %v9997_v0 }
 0x21e   :  { %9252 = vmatprep.subr.bf16.mxu1 %v11078_v62 }
 0x221   :  { %9253 = vmatpush3.bf16.msra.mxu1 %v9998_v2 }
 0x222   :  { %9254 = vmatprep.subr.bf16.mxu1 %v11078_v62 }
 0x225   :  { %9255 = vmatpush3.bf16.msra.mxu1 %v9999_v3 }
 0x226   :  { %9256 = vmatprep.subr.bf16.mxu1 %v11078_v62 }
 0x229   :  { %9257 = vmatpush3.bf16.msra.mxu1 %v10000_v5 }
 0x22a   :  { %9258 = vmatprep.subr.bf16.mxu1 %v11078_v62 }
 0x22d   :  { %9259 = vmatpush3.bf16.msra.mxu1 %v10001_v6 }
 0x22e   :  { %9260 = vmatprep.subr.bf16.mxu1 %v11078_v62 }
 0x231   :  { %9261 = vmatpush3.bf16.msra.mxu1 %v10002_v8  ;;  %v10074_v8 = vld [vmem:[#allocation6 + $0x174] ss:$8 sps:$4 sm:$0xff]  }
 0x232   :  { %4071 = vmatprep.subr.bf16.mxu1 %v10005_v9 }
 0x234   :  { %9263 = vmatmul.mubr.bf16.vlgmr.msra.gmra.mrb[20].mxu1 %v10877_v63  ;;  %v10069_v63 = vld [vmem:[#allocation6 + $0x160] ss:$8 sps:$4 sm:$0xff]  }
 0x235   :  { %4072 = vmatpush1.bf16.msra.mxu1 %v10003_v10  ;;  %4103 = vmatprep.mubr.bf16.mxu1 %v3381_v52  ;;  %v10071_v52 = vld [vmem:[#allocation6 + $0x164] ss:$8 sps:$4 sm:$0xff]  }
 0x236   :  { %4073 = vmatprep.subr.bf16.mxu1 %v10008_v11 }
 0x239   :  { %4074 = vmatpush1.bf16.msra.mxu1 %v10006_v13  ;;  %v10072_v13 = vld [vmem:[#allocation6 + $0x170] ss:$8 sps:$4 sm:$0xff]  }
 0x23a   :  { %4075 = vmatprep.subr.bf16.mxu1 %v10011_v14 }
 0x23d   :  { %4076 = vmatpush1.bf16.msra.mxu1 %v10009_v15 }
 0x23e   :  { %4077 = vmatprep.subr.bf16.mxu1 %v10014_v16 }
 0x241   :  { %4078 = vmatpush1.bf16.msra.mxu1 %v10012_v17  ;;  %v10077_v17 = vld [vmem:[#allocation6 + $0x184] ss:$8 sps:$4 sm:$0xff]  }
 0x242   :  { %4079 = vmatprep.subr.bf16.mxu1 %v10017_v18 }
 0x245   :  { %4080 = vmatpush1.bf16.msra.mxu1 %v10015_v1  ;;  %v10075_v1 = vld [vmem:[#allocation6 + $0x180] ss:$8 sps:$4 sm:$0xff]  }
 0x246   :  { %4081 = vmatprep.subr.bf16.mxu1 %v10020_v19  ;;  %v10080_v19 = vld [vmem:[#allocation6 + $0x194] ss:$8 sps:$4 sm:$0xff]  }
 0x249   :  { %4082 = vmatpush1.bf16.msra.mxu1 %v10018_v22  ;;  %v10078_v22 = vld [vmem:[#allocation6 + $0x190] ss:$8 sps:$4 sm:$0xff]  }
 0x24a   :  { %4083 = vmatprep.subr.bf16.mxu1 %v10023_v23  ;;  %v10083_v23 = vld [vmem:[#allocation6 + $0x1a4] ss:$8 sps:$4 sm:$0xff]  }
 0x24d   :  { %4084 = vmatpush1.bf16.msra.mxu1 %v10021_v4  ;;  %v10171_v4 = vld [vmem:[#allocation9] ss:$28 sps:$4 sm:$0xff]  }
 0x24e   :  { %4085 = vmatprep.subr.bf16.mxu1 %v10026_v24  ;;  %v10173_v24 = vld [vmem:[#allocation9 + $0x4] ss:$28 sps:$4 sm:$0xff]  }
 0x24f   :  { %4645 = vmatprep.subr.bf16.mxu0 %v10173_v24  ;;  %v10137_v24 = vld [vmem:[#allocation6 + $0x2c4] ss:$8 sps:$4 sm:$0xff]  }
 0x250   :  { %4646 = vmatpush1.bf16.msra.mxu0 %v10171_v4  ;;  %v10132_v4 = vld [vmem:[#allocation6 + $0x2b0] ss:$8 sps:$4 sm:$0xff]  }
 0x251   :  { %4086 = vmatpush1.bf16.msra.mxu1 %v10024_v25  ;;  %v10174_v25 = vld [vmem:[#allocation9 + $0x38] ss:$28 sps:$4 sm:$0xff]  }
 0x252   :  { %4087 = vmatprep.subr.bf16.mxu1 %v10029_v27  ;;  %v10176_v27 = vld [vmem:[#allocation9 + $0x3c] ss:$28 sps:$4 sm:$0xff]  }
 0x253   :  { %4647 = vmatprep.subr.bf16.mxu0 %v10176_v27  ;;  %v10135_v27 = vld [vmem:[#allocation6 + $0x2c0] ss:$8 sps:$4 sm:$0xff]  }
 0x254   :  { %4648 = vmatpush1.bf16.msra.mxu0 %v10174_v25  ;;  %v11410_v25 = vsub.s32 4, %v11360_v21 }
 0x255   :  { %4088 = vmatpush1.bf16.msra.mxu1 %v10027_v28  ;;  %v10081_v28 = vld [vmem:[#allocation6 + $0x1a0] ss:$8 sps:$4 sm:$0xff]  }
 0x256   :  { %4089 = vmatprep.subr.bf16.mxu1 %v10032_v50  ;;  %v10086_v50 = vld [vmem:[#allocation6 + $0x1b4] ss:$8 sps:$4 sm:$0xff]  }
 0x259   :  { %4090 = vmatpush1.bf16.msra.mxu1 %v10030_v7  ;;  %v10084_v7 = vld [vmem:[#allocation6 + $0x1b0] ss:$8 sps:$4 sm:$0xff]  }
 0x25a   :  { %4091 = vmatprep.subr.bf16.mxu1 %v10035_v29  ;;  %v10089_v29 = vld [vmem:[#allocation6 + $0x1c4] ss:$8 sps:$4 sm:$0xff]  }
 0x25d   :  { %4092 = vmatpush1.bf16.msra.mxu1 %v10033_v30  ;;  %v10087_v30 = vld [vmem:[#allocation6 + $0x1c0] ss:$8 sps:$4 sm:$0xff]  }
 0x25e   :  { %4093 = vmatprep.subr.bf16.mxu1 %v10038_v31  ;;  %v10092_v31 = vld [vmem:[#allocation6 + $0x1d4] ss:$8 sps:$4 sm:$0xff]  }
 0x261   :  { %4094 = vmatpush1.bf16.msra.mxu1 %v10036_v33  ;;  %v10090_v33 = vld [vmem:[#allocation6 + $0x1d0] ss:$8 sps:$4 sm:$0xff]  }
 0x262   :  { %4095 = vmatprep.subr.bf16.mxu1 %v10041_v12  ;;  %v10095_v12 = vld [vmem:[#allocation6 + $0x1e4] ss:$8 sps:$4 sm:$0xff]  }
 0x265   :  { %4096 = vmatpush1.bf16.msra.mxu1 %v10039_v32 }
 0x266   :  { %4097 = vmatprep.subr.bf16.mxu1 %v10044_v34 }
 0x269   :  { %4098 = vmatpush1.bf16.msra.mxu1 %v10042_v35 }
 0x26a   :  { %4099 = vmatprep.subr.bf16.mxu1 %v10047_v36 }
 0x26d   :  { %4100 = vmatpush1.bf16.msra.mxu1 %v10045_v37  ;;  %v10093_v37 = vld [vmem:[#allocation6 + $0x1e0] ss:$8 sps:$4 sm:$0xff]  }
 0x26e   :  { %4101 = vmatprep.subr.bf16.mxu1 %v10050_v38 }
 0x271   :  { %4102 = vmatpush1.bf16.msra.mxu1 %v10048_v39  ;;  %v10098_v39 = vld [vmem:[#allocation6 + $0x1f4] ss:$8 sps:$4 sm:$0xff]  }
 0x272   :  { %4114 = vmatprep.subr.bf16.mxu1 %v10053_v40 }
 0x274   :  { %4104 = vmatmul.mubr.bf16.vlgmr.msra.gmra.mrb[24].mxu1 %v11374_v60  ;;  %v614_v60 = vrot.slane %v11398_v51, %v11396_v55 }
 0x275   :  { %4115 = vmatpush1.bf16.msra.mxu1 %v10051_v41  ;;  %v10096_v41 = vld [vmem:[#allocation6 + $0x1f0] ss:$8 sps:$4 sm:$0xff]  }
 0x276   :  { %4116 = vmatprep.subr.bf16.mxu1 %v10056_v42  ;;  %v10101_v42 = vld [vmem:[#allocation6 + $0x204] ss:$8 sps:$4 sm:$0xff]  }
 0x279   :  { %4117 = vmatpush1.bf16.msra.mxu1 %v10054_v54  ;;  %v10099_v54 = vld [vmem:[#allocation6 + $0x200] ss:$8 sps:$4 sm:$0xff]  }
 0x27a   :  { %4118 = vmatprep.subr.bf16.mxu1 %v10059_v45  ;;  %v10104_v45 = vld [vmem:[#allocation6 + $0x214] ss:$8 sps:$4 sm:$0xff]  }
 0x27d   :  { %4119 = vmatpush1.bf16.msra.mxu1 %v10057_v46  ;;  %v10102_v46 = vld [vmem:[#allocation6 + $0x210] ss:$8 sps:$4 sm:$0xff]  }
 0x27e   :  { %4120 = vmatprep.subr.bf16.mxu1 %v10062_v43  ;;  %v10107_v43 = vld [vmem:[#allocation6 + $0x224] ss:$8 sps:$4 sm:$0xff]  }
 0x281   :  { %4121 = vmatpush1.bf16.msra.mxu1 %v10060_v48  ;;  %v10105_v48 = vld [vmem:[#allocation6 + $0x220] ss:$8 sps:$4 sm:$0xff]  }
 0x282   :  { %4122 = vmatprep.subr.bf16.mxu1 %v10065_v53  ;;  %v10110_v53 = vld [vmem:[#allocation6 + $0x234] ss:$8 sps:$4 sm:$0xff]  }
 0x285   :  { %4123 = vmatpush1.bf16.msra.mxu1 %v10063_v47  ;;  %v10108_v47 = vld [vmem:[#allocation6 + $0x230] ss:$8 sps:$4 sm:$0xff]  }
 0x286   :  { %4124 = vmatprep.subr.bf16.mxu1 %v10068_v56  ;;  %v10113_v56 = vld [vmem:[#allocation6 + $0x244] ss:$8 sps:$4 sm:$0xff]  }
 0x287   :  { %v3021_v61 = vpop.f32.mrb[4].mxu1 }
 0x288   :  { %v9314_v49 = vadd.f32 %v3021_v61, %v610_v58  ;;  %v3023_v0 = vpop.f32.mrb[5].mxu1  ;;  %v10114_v61 = vld [vmem:[#allocation6 + $0x250] ss:$8 sps:$4 sm:$0xff]  }
 0x289   :  { %v9315_v2 = vadd.f32 %v3023_v0, %v614_v60  ;;  %v3025_v3 = vpop.f32.mrb[6].mxu1  ;;  %4125 = vmatpush1.bf16.msra.mxu1 %v10066_v57  ;;  %v11405_v57 = vsub.s32 6, %v11360_v21 }
 0x28a   :  { %v9316_v5 = vadd.f32 %v3025_v3, %v610_v58  ;;  %v3027_v6 = vpop.f32.mrb[7].mxu1  ;;  %4126 = vmatprep.subr.bf16.mxu1 %v10071_v52  ;;  %v3368_v9 = vmax.f32 %v9314_v49, 0.0  ;;  %v10111_v58 = vld [vmem:[#allocation6 + $0x240] ss:$8 sps:$4 sm:$0xff]  }
 0x28b   :  { %v3369_v10 = vmax.f32 %v9315_v2, 0.0  ;;  %v9317_v11 = vadd.f32 %v3027_v6, %v614_v60  ;;  %v10116_v60 = vld [vmem:[#allocation6 + $0x254] ss:$8 sps:$4 sm:$0xff]   ;;  %v626_v52 = vrot.slane %v11398_v51, %v11405_v57  ;;  %v10117_v6 = vld [vmem:[#allocation6 + $0x260] ss:$8 sps:$4 sm:$0xff]  }
 0x28c   :  { %v3375_v14 = vmax.f32 %v9316_v5, 0.0 }
 0x28d   :  { %v3376_v15 = vmax.f32 %v9317_v11, 0.0  ;;  %4127 = vmatpush1.bf16.msra.mxu1 %v10069_v63  ;;  %v10119_v63 = vld [vmem:[#allocation6 + $0x264] ss:$8 sps:$4 sm:$0xff]  }
 0x28e   :  { %v3382_v16 = vpack.c.bf16 %v3375_v14, %v3368_v9  ;;  %4128 = vmatprep.subr.bf16.mxu1 %v10074_v8  ;;  %v10122_v9 = vld [vmem:[#allocation6 + $0x274] ss:$8 sps:$4 sm:$0xff]  }
 0x28f   :  { %v3383_v18 = vpack.c.bf16 %v3376_v15, %v3369_v10  ;;  %v10120_v15 = vld [vmem:[#allocation6 + $0x270] ss:$8 sps:$4 sm:$0xff]  }
 0x291   :  { %4129 = vmatpush1.bf16.msra.mxu1 %v10072_v13  ;;  %4146 = vmatprep.mubr.bf16.mxu1 %v3383_v18  ;;  %v10128_v18 = vld [vmem:[#allocation6 + $0x294] ss:$8 sps:$4 sm:$0xff]  }
 0x292   :  { %4130 = vmatprep.subr.bf16.mxu1 %v10077_v17  ;;  %v10123_v17 = vld [vmem:[#allocation6 + $0x280] ss:$8 sps:$4 sm:$0xff]  }
 0x295   :  { %4131 = vmatpush1.bf16.msra.mxu1 %v10075_v1  ;;  %v10126_v1 = vld [vmem:[#allocation6 + $0x290] ss:$8 sps:$4 sm:$0xff]  }
 0x296   :  { %4132 = vmatprep.subr.bf16.mxu1 %v10080_v19  ;;  %v10131_v19 = vld [vmem:[#allocation6 + $0x2a4] ss:$8 sps:$4 sm:$0xff]  }
 0x299   :  { %4133 = vmatpush1.bf16.msra.mxu1 %v10078_v22  ;;  %v10129_v22 = vld [vmem:[#allocation6 + $0x2a0] ss:$8 sps:$4 sm:$0xff]  }
 0x29a   :  { %4134 = vmatprep.subr.bf16.mxu1 %v10083_v23  ;;  %v10134_v23 = vld [vmem:[#allocation6 + $0x2b4] ss:$8 sps:$4 sm:$0xff]  }
 0x29d   :  { %4135 = vmatpush1.bf16.msra.mxu1 %v10081_v28  ;;  %v11413_v28 = vsub.s32 5, %v11360_v21 }
 0x29e   :  { %4136 = vmatprep.subr.bf16.mxu1 %v10086_v50  ;;  %v10140_v50 = vld [vmem:[#allocation6 + $0x2d4] ss:$8 sps:$4 sm:$0xff]  }
 0x2a1   :  { %4137 = vmatpush1.bf16.msra.mxu1 %v10084_v7  ;;  %v618_v7 = vrot.slane %v11398_v51, %v11410_v25 }
 0x2a2   :  { %4138 = vmatprep.subr.bf16.mxu1 %v10089_v29  ;;  %v622_v29 = vrot.slane %v11398_v51, %v11413_v28 }
 0x2a5   :  { %4139 = vmatpush1.bf16.msra.mxu1 %v10087_v30  ;;  %v10138_v30 = vld [vmem:[#allocation6 + $0x2d0] ss:$8 sps:$4 sm:$0xff]  }
 0x2a6   :  { %4140 = vmatprep.subr.bf16.mxu1 %v10092_v31  ;;  %v10143_v31 = vld [vmem:[#allocation6 + $0x2e4] ss:$8 sps:$4 sm:$0xff]  }
 0x2a7   :  { %v9103_v32 = vpop.f32.mrb[8].mxu1 }
 0x2a8   :  { %v9104_v34 = vpop.f32.mrb[9].mxu1 }
 0x2a9   :  { %v9105_v35 = vadd.f32 %v9104_v34, %v9103_v32  ;;  %v9106_v36 = vpop.f32.mrb[10].mxu1  ;;  %4141 = vmatpush1.bf16.msra.mxu1 %v10090_v33 }
 0x2aa   :  { %v9107_v38 = vpop.f32.mrb[11].mxu1  ;;  %4142 = vmatprep.subr.bf16.mxu1 %v10095_v12 }
 0x2ab   :  { %v9108_v40 = vadd.f32 %v9107_v38, %v9106_v36  ;;  %v3237_v2 = vadd.f32 %v9105_v35, %v626_v52 }
 0x2ad   :  { %4143 = vmatpush1.bf16.msra.mxu1 %v10093_v37  ;;  %v3240_v10 = vadd.f32 %v9108_v40, %v626_v52  ;;  %v10149_v52 = vld [vmem:[#allocation6 + $0x304] ss:$8 sps:$4 sm:$0xff]  }
 0x2ae   :  { %4144 = vmatprep.subr.bf16.mxu1 %v10098_v39  ;;  %v10141_v39 = vld [vmem:[#allocation6 + $0x2e0] ss:$8 sps:$4 sm:$0xff]  }
 0x2b1   :  { %4145 = vmatpush1.bf16.msra.mxu1 %v10096_v41 }
 0x2b2   :  { %4157 = vmatprep.subr.bf16.mxu1 %v10101_v42 }
 0x2b4   :  { %4147 = vmatmul.mubr.bf16.vlgmr.msra.gmra.mrb[24].mxu1 %v3382_v16  ;;  %v10125_v16 = vld [vmem:[#allocation6 + $0x284] ss:$8 sps:$4 sm:$0xff]  }
 0x2b5   :  { %4158 = vmatpush1.bf16.msra.mxu1 %v10099_v54  ;;  %v10146_v54 = vld [vmem:[#allocation6 + $0x2f4] ss:$8 sps:$4 sm:$0xff]  }
 0x2b6   :  { %4159 = vmatprep.subr.bf16.mxu1 %v10104_v45 }
 0x2b9   :  { %4160 = vmatpush1.bf16.msra.mxu1 %v10102_v46 }
 0x2ba   :  { %4161 = vmatprep.subr.bf16.mxu1 %v10107_v43 }
 0x2bd   :  { %4162 = vmatpush1.bf16.msra.mxu1 %v10105_v48 }
 0x2be   :  { %4163 = vmatprep.subr.bf16.mxu1 %v10110_v53 }
 0x2c1   :  { %4164 = vmatpush1.bf16.msra.mxu1 %v10108_v47 }
 0x2c2   :  { %4165 = vmatprep.subr.bf16.mxu1 %v10113_v56  ;;  %v10144_v56 = vld [vmem:[#allocation6 + $0x2f0] ss:$8 sps:$4 sm:$0xff]  }
 0x2c5   :  { %4166 = vmatpush1.bf16.msra.mxu1 %v10111_v58 }
 0x2c6   :  { %4167 = vmatprep.subr.bf16.mxu1 %v10116_v60 }
 0x2c7   :  { %v9125_v49 = vpop.f32.mrb[12].mxu1 }
 0x2c8   :  { %v9126_v0 = vpop.f32.mrb[13].mxu1 }
 0x2c9   :  { %v9127_v3 = vadd.f32 %v9126_v0, %v9125_v49  ;;  %v9128_v5 = vpop.f32.mrb[14].mxu1  ;;  %4168 = vmatpush1.bf16.msra.mxu1 %v10114_v61  ;;  %v10152_v49 = vld [vmem:[#allocation6 + $0x314] ss:$8 sps:$4 sm:$0xff]   ;;  %v10150_v0 = vld [vmem:[#allocation6 + $0x310] ss:$8 sps:$4 sm:$0xff]  }
 0x2ca   :  { %v9129_v8 = vpop.f32.mrb[15].mxu1  ;;  %4169 = vmatprep.subr.bf16.mxu1 %v10119_v63  ;;  %v10147_v63 = vld [vmem:[#allocation6 + $0x300] ss:$8 sps:$4 sm:$0xff]  }
 0x2cb   :  { %v3278_v11 = vadd.f32 %v9127_v3, %v3237_v2  ;;  %v9130_v13 = vadd.f32 %v9129_v8, %v9128_v5  ;;  %v10155_v2 = vld [vmem:[#allocation6 + $0x324] ss:$8 sps:$4 sm:$0xff]   ;;  %v10153_v3 = vld [vmem:[#allocation6 + $0x320] ss:$8 sps:$4 sm:$0xff]   ;;  %v10158_v5 = vld [vmem:[#allocation6 + $0x334] ss:$8 sps:$4 sm:$0xff]  }
 0x2cc   :  { %v10161_v8 = vld [vmem:[#allocation6 + $0x344] ss:$8 sps:$4 sm:$0xff]  }
 0x2cd   :  { %v3281_v14 = vadd.f32 %v9130_v13, %v3240_v10  ;;  %4170 = vmatpush1.bf16.msra.mxu1 %v10117_v6  ;;  %v10156_v6 = vld [vmem:[#allocation6 + $0x330] ss:$8 sps:$4 sm:$0xff]   ;;  %v10164_v10 = vld [vmem:[#allocation6 + $0x354] ss:$8 sps:$4 sm:$0xff]   ;;  %v10167_v13 = vld [vmem:[#allocation6 + $0x364] ss:$8 sps:$4 sm:$0xff]  }
 0x2ce   :  { %4171 = vmatprep.subr.bf16.mxu1 %v10122_v9  ;;  %v10159_v9 = vld [vmem:[#allocation6 + $0x340] ss:$8 sps:$4 sm:$0xff]  }
 0x2d1   :  { %4172 = vmatpush1.bf16.msra.mxu1 %v10120_v15 }
 0x2d2   :  { %4173 = vmatprep.subr.bf16.mxu1 %v10125_v16 }
 0x2d5   :  { %4174 = vmatpush1.bf16.msra.mxu1 %v10123_v17 }
 0x2d6   :  { %4175 = vmatprep.subr.bf16.mxu1 %v10128_v18  ;;  %v10165_v18 = vld [vmem:[#allocation6 + $0x360] ss:$8 sps:$4 sm:$0xff]  }
 0x2d9   :  { %4176 = vmatpush1.bf16.msra.mxu1 %v10126_v1 }
 0x2da   :  { %4177 = vmatprep.subr.bf16.mxu1 %v10131_v19 }
 0x2dd   :  { %4178 = vmatpush1.bf16.msra.mxu1 %v10129_v22  ;;  %v10170_v22 = vld [vmem:[#allocation6 + $0x374] ss:$8 sps:$4 sm:$0xff]  }
 0x2de   :  { %4179 = vmatprep.subr.bf16.mxu1 %v10134_v23 }
 0x2e1   :  { %4180 = vmatpush1.bf16.msra.mxu1 %v10132_v4 }
 0x2e2   :  { %4181 = vmatprep.subr.bf16.mxu1 %v10137_v24  ;;  %v10168_v24 = vld [vmem:[#allocation6 + $0x370] ss:$8 sps:$4 sm:$0xff]  }
 0x2e5   :  { %4182 = vmatpush1.bf16.msra.mxu1 %v10135_v27 }
 0x2e6   :  { %4183 = vmatprep.subr.bf16.mxu1 %v10140_v50  ;;  %v10179_v50 = vld [vmem:[#allocation9 + $0x74] ss:$28 sps:$4 sm:$0xff]  }
 0x2e7   :  { %v9147_v12 = vpop.f32.mrb[16].mxu1  ;;  %4649 = vmatprep.subr.bf16.mxu0 %v10179_v50  ;;  %v10304_v50 = vld [vmem:[#allocation12 + $0x1cc] ss:$28 sps:$4 sm:$0xff]  }
 0x2e8   :  { %v3193_v33 = vpop.f32.mrb[4].mxu0  ;;  %v9148_v35 = vpop.f32.mrb[17].mxu1 }
 0x2e9   :  { %v9318_v32 = vadd.f32 %v3193_v33, %v618_v7  ;;  %v3195_v34 = vpop.f32.mrb[5].mxu0  ;;  %v9149_v21 = vadd.f32 %v9148_v35, %v9147_v12  ;;  %v9150_v38 = vpop.f32.mrb[18].mxu1  ;;  %4184 = vmatpush1.bf16.msra.mxu1 %v10138_v30  ;;  %v10180_v30 = vld [vmem:[#allocation9 + $0xa8] ss:$28 sps:$4 sm:$0xff]   ;;  %v10183_v33 = vld [vmem:[#allocation9 + $0xe0] ss:$28 sps:$4 sm:$0xff]  }
 0x2ea   :  { %v9319_v36 = vadd.f32 %v3195_v34, %v622_v29  ;;  %v3197_v37 = vpop.f32.mrb[6].mxu0  ;;  %v9151_v42 = vpop.f32.mrb[19].mxu1  ;;  %4185 = vmatprep.subr.bf16.mxu1 %v10143_v31  ;;  %v10185_v31 = vld [vmem:[#allocation9 + $0xe4] ss:$28 sps:$4 sm:$0xff]   ;;  %v10188_v12 = vld [vmem:[#allocation9 + $0x11c] ss:$28 sps:$4 sm:$0xff]  }
 0x2eb   :  { %v9320_v40 = vadd.f32 %v3197_v37, %v618_v7  ;;  %v3199_v41 = vpop.f32.mrb[7].mxu0  ;;  %v9152_v45 = vadd.f32 %v9151_v42, %v9150_v38  ;;  %v3319_v46 = vadd.f32 %v9149_v21, %v3278_v11  ;;  %v3370_v43 = vmax.f32 %v9318_v32, 0.0  ;;  %v10162_v11 = vld [vmem:[#allocation6 + $0x350] ss:$8 sps:$4 sm:$0xff]   ;;  %v10192_v21 = vld [vmem:[#allocation9 + $0x188] ss:$28 sps:$4 sm:$0xff]  }
 0x2ec   :  { %v9321_v51 = vadd.f32 %v3199_v41, %v622_v29  ;;  %v3371_v53 = vmax.f32 %v9319_v36, 0.0  ;;  %v10177_v7 = vld [vmem:[#allocation9 + $0x70] ss:$28 sps:$4 sm:$0xff]   ;;  %v10186_v32 = vld [vmem:[#allocation9 + $0x118] ss:$28 sps:$4 sm:$0xff]  }
 0x2ed   :  { %v3377_v48 = vmax.f32 %v9320_v40, 0.0  ;;  %4186 = vmatpush1.bf16.msra.mxu1 %v10141_v39  ;;  %v3322_v58 = vadd.f32 %v9152_v45, %v3281_v14  ;;  %4650 = vmatpush1.bf16.msra.mxu0 %v10177_v7  ;;  %v10182_v29 = vld [vmem:[#allocation9 + $0xac] ss:$28 sps:$4 sm:$0xff]   ;;  %v10191_v34 = vld [vmem:[#allocation9 + $0x154] ss:$28 sps:$4 sm:$0xff]  }
 0x2ee   :  { %v3378_v47 = vmax.f32 %v9321_v51, 0.0  ;;  %4187 = vmatprep.subr.bf16.mxu1 %v10146_v54  ;;  %4651 = vmatprep.subr.bf16.mxu0 %v10182_v29  ;;  %v10189_v35 = vld [vmem:[#allocation9 + $0x150] ss:$28 sps:$4 sm:$0xff]   ;;  %v3499_v38 = vld [vmem:[#allocation7] sm:$0x3] }
 0x2ef   :  { %v3384_v60 = vpack.c.bf16 %v3377_v48, %v3370_v43  ;;  %v10194_v36 = vld [vmem:[#allocation9 + $0x18c] ss:$28 sps:$4 sm:$0xff]   ;;  %v10256_v40 = vld [vmem:[#allocation12 + $0xc] ss:$28 sps:$4 sm:$0xff]   ;;  %v3504_v41 = vrot.slane %v3499_v38, %v11363_v26  ;;  %v3508_v54 = vrot.slane %v3499_v38, %v11366_v44  ;;  %v10268_v48 = vld [vmem:[#allocation12 + $0x7c] ss:$28 sps:$4 sm:$0xff]  }
 0x2f0   :  { %v3385_v61 = vpack.c.bf16 %v3378_v47, %v3371_v53  ;;  %v10197_v37 = vld [vmem:[#allocation9 + $0xc] ss:$28 sps:$4 sm:$0xff]   ;;  %v10198_v29 = vld [vmem:[#allocation9 + $0x40] ss:$28 sps:$4 sm:$0xff]   ;;  %v10320_v38 = vld [vmem:[#allocation12 + $0x270] ss:$28 sps:$4 sm:$0xff]  }
 0x2f1   :  { %4188 = vmatpush1.bf16.msra.mxu1 %v10144_v56  ;;  %4652 = vmatpush1.bf16.msra.mxu0 %v10180_v30  ;;  %v10254_v39 = vld [vmem:[#allocation12 + $0x8] ss:$28 sps:$4 sm:$0xff]   ;;  %v10260_v51 = vld [vmem:[#allocation12 + $0x40] ss:$28 sps:$4 sm:$0xff]   ;;  %v10203_v30 = vld [vmem:[#allocation9 + $0x7c] ss:$28 sps:$4 sm:$0xff]  }
 0x2f2   :  { %4189 = vmatprep.mubr.bf16.mxu1 %v3385_v61  ;;  %4200 = vmatprep.subr.bf16.mxu1 %v10149_v52  ;;  %v10262_v42 = vld [vmem:[#allocation12 + $0x44] ss:$28 sps:$4 sm:$0xff]  }
 0x2f3   :  { %4653 = vmatprep.subr.bf16.mxu0 %v10185_v31  ;;  %v10302_v7 = vld [vmem:[#allocation12 + $0x1c8] ss:$28 sps:$4 sm:$0xff]  }
 0x2f4   :  { %4190 = vmatmul.mubr.bf16.vlgmr.msra.gmra.mrb[24].mxu1 %v3384_v60  ;;  %v10266_v60 = vld [vmem:[#allocation12 + $0x78] ss:$28 sps:$4 sm:$0xff]   ;;  %v10310_v31 = vld [vmem:[#allocation12 + $0x204] ss:$28 sps:$4 sm:$0xff]  }
 0x2f5   :  { %4201 = vmatpush1.bf16.msra.mxu1 %v10147_v63  ;;  %4232 = vmatprep.mubr.bf16.mxu1 %v11077_v20  ;;  %v10274_v63 = vld [vmem:[#allocation12 + $0xb4] ss:$28 sps:$4 sm:$0xff]  }
 0x2f6   :  { %4202 = vmatprep.subr.bf16.mxu1 %v10152_v49  ;;  %4654 = vmatpush1.bf16.msra.mxu0 %v10183_v33  ;;  %v10308_v33 = vld [vmem:[#allocation12 + $0x200] ss:$28 sps:$4 sm:$0xff]  }
 0x2f7   :  { %4655 = vmatprep.subr.bf16.mxu0 %v10188_v12  ;;  %v10201_v12 = vld [vmem:[#allocation9 + $0x78] ss:$28 sps:$4 sm:$0xff]  }
 0x2f9   :  { %4203 = vmatpush1.bf16.msra.mxu1 %v10150_v0 }
 0x2fa   :  { %4204 = vmatprep.subr.bf16.mxu1 %v10155_v2  ;;  %4656 = vmatpush1.bf16.msra.mxu0 %v10186_v32  ;;  %v10272_v2 = vld [vmem:[#allocation12 + $0xb0] ss:$28 sps:$4 sm:$0xff]  }
 0x2fb   :  { %4657 = vmatprep.subr.bf16.mxu0 %v10191_v34  ;;  %v10206_v32 = vld [vmem:[#allocation9 + $0xb4] ss:$28 sps:$4 sm:$0xff]   ;;  %v10316_v34 = vld [vmem:[#allocation12 + $0x23c] ss:$28 sps:$4 sm:$0xff]  }
 0x2fd   :  { %4205 = vmatpush1.bf16.msra.mxu1 %v10153_v3 }
 0x2fe   :  { %4206 = vmatprep.subr.bf16.mxu1 %v10158_v5  ;;  %4658 = vmatpush1.bf16.msra.mxu0 %v10189_v35  ;;  %v10280_v5 = vld [vmem:[#allocation12 + $0xec] ss:$28 sps:$4 sm:$0xff]   ;;  %v10314_v35 = vld [vmem:[#allocation12 + $0x238] ss:$28 sps:$4 sm:$0xff]  }
 0x2ff   :  { %4659 = vmatprep.subr.bf16.mxu0 %v10194_v36  ;;  %v10204_v36 = vld [vmem:[#allocation9 + $0xb0] ss:$28 sps:$4 sm:$0xff]  }
 0x301   :  { %4207 = vmatpush1.bf16.msra.mxu1 %v10156_v6  ;;  %v10278_v6 = vld [vmem:[#allocation12 + $0xe8] ss:$28 sps:$4 sm:$0xff]  }
 0x302   :  { %4208 = vmatprep.subr.bf16.mxu1 %v10161_v8  ;;  %4660 = vmatpush1.bf16.msra.mxu0 %v10192_v21  ;;  %v10286_v8 = vld [vmem:[#allocation12 + $0x124] ss:$28 sps:$4 sm:$0xff]  }
 0x303   :  { %4688 = vmatprep.subr.bf16.mxu0 %v10197_v37  ;;  %v10209_v21 = vld [vmem:[#allocation9 + $0xec] ss:$28 sps:$4 sm:$0xff]   ;;  %v10322_v37 = vld [vmem:[#allocation12 + $0x274] ss:$28 sps:$4 sm:$0xff]  }
 0x305   :  { %4209 = vmatpush1.bf16.msra.mxu1 %v10159_v9  ;;  %v10284_v9 = vld [vmem:[#allocation12 + $0x120] ss:$28 sps:$4 sm:$0xff]  }
 0x306   :  { %4210 = vmatprep.subr.bf16.mxu1 %v10164_v10  ;;  %v4243_v10 = vld [vmem:[%s11602_s9] sm:$0xff] }
 0x307   :  { %v3359_v14 = vpop.f32.mrb[20].mxu1 }
 0x308   :  { %v3360_v15 = vadd.f32 %v3359_v14, %v3319_v46  ;;  %v9264_v16 = vpop.f32.mrb[21].mxu1  ;;  %v4244_v14 = vld [vmem:[%s11602_s9 + $0x8] sm:$0xff] }
 0x309   :  { %v3362_v17 = vpop.f32.mrb[22].mxu1  ;;  %4211 = vmatpush1.bf16.msra.mxu1 %v10162_v11  ;;  %v10292_v11 = vld [vmem:[#allocation12 + $0x15c] ss:$28 sps:$4 sm:$0xff]  }
 0x30a   :  { %v3363_v1 = vadd.f32 %v3362_v17, %v3322_v58  ;;  %v9265_v19 = vpop.f32.mrb[23].mxu1  ;;  %4212 = vmatprep.subr.bf16.mxu1 %v10167_v13  ;;  %v3372_v23 = vmax.f32 %v3360_v15, 0.0  ;;  %v10290_v16 = vld [vmem:[#allocation12 + $0x158] ss:$28 sps:$4 sm:$0xff]  }
 0x30b   :  { %v10298_v19 = vld [vmem:[#allocation12 + $0x194] ss:$28 sps:$4 sm:$0xff]  }
 0x30c   :  { %v3379_v4 = vmax.f32 %v3363_v1, 0.0 }
 0x30d   :  { %4213 = vmatpush1.bf16.msra.mxu1 %v10165_v18 }
 0x30e   :  { %v3386_v27 = vpack.c.bf16 %v3379_v4, %v3372_v23  ;;  %4214 = vmatprep.subr.bf16.mxu1 %v10170_v22  ;;  %v10296_v23 = vld [vmem:[#allocation12 + $0x190] ss:$28 sps:$4 sm:$0xff]   ;;  %v10195_v4 = vld [vmem:[#allocation9 + $0x8] ss:$28 sps:$4 sm:$0xff]  }
 0x311   :  { %4215 = vmatpush1.bf16.msra.mxu1 %v10168_v24 }
 0x312   :  { %7509 = vmatprep.subr.bf16.mxu1 %v10256_v40  ;;  %v10212_v40 = vld [vmem:[#allocation9 + $0x124] ss:$28 sps:$4 sm:$0xff]  }
 0x314   :  { %4233 = vmatmul.mubr.bf16.vlgmr.msra.gmra.mrb[24].mxu1 %v3386_v27  ;;  %v10200_v27 = vld [vmem:[#allocation9 + $0x44] ss:$28 sps:$4 sm:$0xff]  }
 0x315   :  { %7510 = vmatpush1.bf16.msra.mxu1 %v10254_v39  ;;  %v10207_v39 = vld [vmem:[#allocation9 + $0xe8] ss:$28 sps:$4 sm:$0xff]  }
 0x316   :  { %7511 = vmatprep.subr.bf16.mxu1 %v10262_v42  ;;  %v10326_v42 = vld [vmem:[#allocation12 + $0x2a8] ss:$28 sps:$4 sm:$0xff]  }
 0x319   :  { %7512 = vmatpush1.bf16.msra.mxu1 %v10260_v51  ;;  %v10215_v51 = vld [vmem:[#allocation9 + $0x15c] ss:$28 sps:$4 sm:$0xff]  }
 0x31a   :  { %7513 = vmatprep.subr.bf16.mxu1 %v10268_v48  ;;  %v10218_v48 = vld [vmem:[#allocation9 + $0x194] ss:$28 sps:$4 sm:$0xff]  }
 0x31d   :  { %7514 = vmatpush1.bf16.msra.mxu1 %v10266_v60  ;;  %v10222_v60 = vld [vmem:[#allocation9 + $0x48] ss:$28 sps:$4 sm:$0xff]  }
 0x31e   :  { %7515 = vmatprep.subr.bf16.mxu1 %v10274_v63  ;;  %v10230_v63 = vld [vmem:[#allocation9 + $0xbc] ss:$28 sps:$4 sm:$0xff]  }
 0x321   :  { %7516 = vmatpush1.bf16.msra.mxu1 %v10272_v2  ;;  %v10231_v2 = vld [vmem:[#allocation9 + $0xf0] ss:$28 sps:$4 sm:$0xff]  }
 0x322   :  { %7517 = vmatprep.subr.bf16.mxu1 %v10280_v5  ;;  %v10234_v5 = vld [vmem:[#allocation9 + $0x128] ss:$28 sps:$4 sm:$0xff]  }
 0x325   :  { %7518 = vmatpush1.bf16.msra.mxu1 %v10278_v6  ;;  %v10239_v6 = vld [vmem:[#allocation9 + $0x164] ss:$28 sps:$4 sm:$0xff]  }
 0x326   :  { %7519 = vmatprep.subr.bf16.mxu1 %v10286_v8  ;;  %v10237_v8 = vld [vmem:[#allocation9 + $0x160] ss:$28 sps:$4 sm:$0xff]  }
 0x329   :  { %7520 = vmatpush1.bf16.msra.mxu1 %v10284_v9  ;;  %v10242_v9 = vld [vmem:[#allocation9 + $0x19c] ss:$28 sps:$4 sm:$0xff]  }
 0x32a   :  { %7521 = vmatprep.subr.bf16.mxu1 %v10292_v11  ;;  %v10243_v11 = vld [vmem:[#allocation9 + $0x18] ss:$28 sps:$4 sm:$0xff]  }
 0x32d   :  { %7522 = vmatpush1.bf16.msra.mxu1 %v10290_v16  ;;  %v10247_v16 = vld [vmem:[#allocation9 + $0xf8] ss:$28 sps:$4 sm:$0xff]  }
 0x32e   :  { %7523 = vmatprep.subr.bf16.mxu1 %v10298_v19  ;;  %v10338_v19 = vld [vmem:[#allocation12 + $0x318] ss:$28 sps:$4 sm:$0xff]  }
 0x331   :  { %7524 = vmatpush1.bf16.msra.mxu1 %v10296_v23  ;;  %v10250_v23 = vld [vmem:[#allocation9 + $0x1a0] ss:$28 sps:$4 sm:$0xff]  }
 0x332   :  { %7525 = vmatprep.subr.bf16.mxu1 %v10304_v50  ;;  %v10352_v50 = vld [vmem:[#allocation12 + $0x38c] ss:$28 sps:$4 sm:$0xff]  }
 0x335   :  { %7526 = vmatpush1.bf16.msra.mxu1 %v10302_v7  ;;  %v10251_v7 = vld [vmem:[#allocation12] ss:$28 sps:$4 sm:$0xff]  }
 0x336   :  { %7527 = vmatprep.subr.bf16.mxu1 %v10310_v31  ;;  %v10265_v31 = vld [vmem:[#allocation12 + $0x74] ss:$28 sps:$4 sm:$0xff]  }
 0x339   :  { %7528 = vmatpush1.bf16.msra.mxu1 %v10308_v33  ;;  %v10263_v33 = vld [vmem:[#allocation12 + $0x70] ss:$28 sps:$4 sm:$0xff]  }
 0x33a   :  { %7529 = vmatprep.subr.bf16.mxu1 %v10316_v34  ;;  %v10277_v34 = vld [vmem:[#allocation12 + $0xe4] ss:$28 sps:$4 sm:$0xff]  }
 0x33d   :  { %7530 = vmatpush1.bf16.msra.mxu1 %v10314_v35  ;;  %v10275_v35 = vld [vmem:[#allocation12 + $0xe0] ss:$28 sps:$4 sm:$0xff]  }
 0x33e   :  { %7531 = vmatprep.subr.bf16.mxu1 %v10322_v37  ;;  %v10287_v37 = vld [vmem:[#allocation12 + $0x150] ss:$28 sps:$4 sm:$0xff]  }
 0x341   :  { %7532 = vmatpush1.bf16.msra.mxu1 %v10320_v38  ;;  %v10295_v38 = vld [vmem:[#allocation12 + $0x18c] ss:$28 sps:$4 sm:$0xff]  }
 0x3e7   :  { %v4234_v45 = vpop.f32.mrb[24].mxu1 }
 0x3e8   :  { %v9322_v46 = vadd.f32 %v4234_v45, %v3504_v41  ;;  %v4236_v43 = vpop.f32.mrb[25].mxu1  ;;  %v10334_v45 = vld [vmem:[#allocation12 + $0x2e4] ss:$28 sps:$4 sm:$0xff]  }
 0x3e9   :  { %v9323_v53 = vadd.f32 %v4236_v43, %v3508_v54  ;;  %v4238_v47 = vpop.f32.mrb[26].mxu1  ;;  %v10213_v43 = vld [vmem:[#allocation9 + $0x158] ss:$28 sps:$4 sm:$0xff]  }
 0x3ea   :  { %8101 = vst [vmem:[%s11604_s11] sm:$0xff] %v9322_v46  ;;  %v9324_v56 = vadd.f32 %v4238_v47, %v3504_v41  ;;  %v4240_v58 = vpop.f32.mrb[27].mxu1  ;;  %v10328_v41 = vld [vmem:[#allocation12 + $0x2ac] ss:$28 sps:$4 sm:$0xff]  }
 0x3eb   :  { %v4245_v52 = vmul.f32 0.5, %v9323_v53  ;;  %8103 = vst [vmem:[%s11605_s12] sm:$0xff] %v9323_v53  ;;  %v9325_v61 = vadd.f32 %v4240_v58, %v3508_v54  ;;  %v10210_v54 = vld [vmem:[#allocation9 + $0x120] ss:$28 sps:$4 sm:$0xff]   ;;  %7533 = vmatprep.subr.bf16.mxu1 %v10328_v41  ;;  %v10216_v53 = vld [vmem:[#allocation9 + $0x190] ss:$28 sps:$4 sm:$0xff]  }
 0x3ec   :  { %8102 = vst [vmem:[%s11604_s11 + $0x8] sm:$0xff] %v9324_v56  ;;  %7534 = vmatpush1.bf16.msra.mxu1 %v10326_v42  ;;  %v10221_v47 = vld [vmem:[#allocation9 + $0x14] ss:$28 sps:$4 sm:$0xff]   ;;  %v10224_v58 = vld [vmem:[#allocation9 + $0x4c] ss:$28 sps:$4 sm:$0xff]  }
 0x3ed   :  { %v4247_v49 = vmul.f32 1.442695, %v4245_v52  ;;  %v4246_v0 = vmul.f32 0.5, %v9325_v61  ;;  %8104 = vst [vmem:[%s11605_s12 + $0x8] sm:$0xff] %v9325_v61  ;;  %7535 = vmatprep.subr.bf16.mxu1 %v10334_v45  ;;  %v10227_v52 = vld [vmem:[#allocation9 + $0x84] ss:$28 sps:$4 sm:$0xff]  }
 0x3ee   :  { %v10225_v61 = vld [vmem:[#allocation9 + $0x80] ss:$28 sps:$4 sm:$0xff]   ;;  %v10299_v41 = vld [vmem:[#allocation12 + $0x1c0] ss:$28 sps:$4 sm:$0xff]   ;;  %v10311_v45 = vld [vmem:[#allocation12 + $0x230] ss:$28 sps:$4 sm:$0xff]  }
 0x3ef   :  { %10811 = vpow2.f32 %v4247_v49  ;;  %v4249_v3 = vmul.f32 1.442695, %v4246_v0  ;;  %v10228_v49 = vld [vmem:[#allocation9 + $0xb8] ss:$28 sps:$4 sm:$0xff]   ;;  %v10307_v42 = vld [vmem:[#allocation12 + $0x1fc] ss:$28 sps:$4 sm:$0xff]  }
 0x3f0   :  { %v10233_v0 = vld [vmem:[#allocation9 + $0xf4] ss:$28 sps:$4 sm:$0xff]  }
 0x3f1   :  { %10813 = vpow2.f32 %v4249_v3  ;;  %v10236_v3 = vld [vmem:[#allocation9 + $0x12c] ss:$28 sps:$4 sm:$0xff]  }
 0x3f9   :  { %v10812_v13 = vpop.eup %10811 }
 0x3fa   :  { %v4251_v15 = vmul.f32 %v10812_v13, %v4243_v10  ;;  %v10240_v10 = vld [vmem:[#allocation9 + $0x198] ss:$28 sps:$4 sm:$0xff]   ;;  %v10244_v13 = vld [vmem:[#allocation9 + $0x50] ss:$28 sps:$4 sm:$0xff]  }
 0x3fb   :  { %v10814_v17 = vpop.eup %10813 }
 0x3fc   :  { %v4252_v18 = vmul.f32 %v10814_v17, %v4244_v14  ;;  %v4253_v1 = vadd.f32 %v9322_v46, %v4251_v15  ;;  %v10332_v46 = vld [vmem:[#allocation12 + $0x2e0] ss:$28 sps:$4 sm:$0xff]   ;;  %v10246_v15 = vld [vmem:[#allocation9 + $0xc0] ss:$28 sps:$4 sm:$0xff]   ;;  %v10248_v17 = vld [vmem:[#allocation9 + $0x130] ss:$28 sps:$4 sm:$0xff]  }
 0x3fd   :  { %7536 = vmatpush1.bf16.msra.mxu1 %v10332_v46  ;;  %v10245_v14 = vld [vmem:[#allocation9 + $0x88] ss:$28 sps:$4 sm:$0xff]   ;;  %v10319_v46 = vld [vmem:[#allocation12 + $0x26c] ss:$28 sps:$4 sm:$0xff]  }
 0x3fe   :  { %v4254_v22 = vadd.f32 %v9324_v56, %v4252_v18  ;;  %8105 = vst [vmem:[%s11606_s13] sm:$0xff] %v4253_v1  ;;  %v10219_v56 = vld [vmem:[#allocation9 + $0x10] ss:$28 sps:$4 sm:$0xff]   ;;  %v10340_v18 = vld [vmem:[#allocation12 + $0x31c] ss:$28 sps:$4 sm:$0xff]  }
 0x3ff   :  { %7537 = vmatprep.subr.bf16.mxu1 %v10340_v18 }
 0x400   :  { %v11443_v24 = vpack.c.bf16 %v4254_v22, %v4253_v1  ;;  %8106 = vst [vmem:[%s11606_s13 + $0x8] sm:$0xff] %v4254_v22  ;;  %v10249_v1 = vld [vmem:[#allocation9 + $0x168] ss:$28 sps:$4 sm:$0xff]   ;;  %v10346_v22 = vld [vmem:[#allocation12 + $0x354] ss:$28 sps:$4 sm:$0xff]  }
 0x401   :  { %7538 = vmatpush1.bf16.msra.mxu1 %v10338_v19  ;;  %v10347_v19 = vld [vmem:[#allocation12 + $0x380] ss:$28 sps:$4 sm:$0xff]  }
 0x402   :  { %4678 = vmatmul.mubr.bf16.vlgmr.msra.gmra.mrb[8].mxu0 %v11443_v24  ;;  %7539 = vmatprep.subr.bf16.mxu1 %v10346_v22  ;;  %v10350_v22 = vld [vmem:[#allocation12 + $0x388] ss:$28 sps:$4 sm:$0xff]  }
 0x403   :  { %4689 = vmatpush1.bf16.msra.mxu0 %v10195_v4  ;;  %4720 = vmatprep.mubr.bf16.mxu0 %v11077_v20  ;;  %v10344_v4 = vld [vmem:[#allocation12 + $0x350] ss:$28 sps:$4 sm:$0xff]  }
 0x404   :  { %4690 = vmatprep.subr.bf16.mxu0 %v10200_v27  ;;  %v10253_v27 = vld [vmem:[#allocation12 + $0x4] ss:$28 sps:$4 sm:$0xff]  }
 0x405   :  { %7540 = vmatpush1.bf16.msra.mxu1 %v10344_v4  ;;  %v10358_v4 = vld [vmem:[#allocation12 + $0x3c4] ss:$28 sps:$4 sm:$0xff]  }
 0x406   :  { %7552 = vmatprep.subr.bf16.mxu1 %v10352_v50  ;;  %v10356_v50 = vld [vmem:[#allocation12 + $0x3c0] ss:$28 sps:$4 sm:$0xff]  }
 0x407   :  { %4691 = vmatpush1.bf16.msra.mxu0 %v10198_v29  ;;  %v10259_v29 = vld [vmem:[#allocation12 + $0x3c] ss:$28 sps:$4 sm:$0xff]  }
 0x408   :  { %4692 = vmatprep.subr.bf16.mxu0 %v10203_v30  ;;  %v10257_v30 = vld [vmem:[#allocation12 + $0x38] ss:$28 sps:$4 sm:$0xff]  }
 0x40b   :  { %4693 = vmatpush1.bf16.msra.mxu0 %v10201_v12  ;;  %v10271_v12 = vld [vmem:[#allocation12 + $0xac] ss:$28 sps:$4 sm:$0xff]  }
 0x40c   :  { %4694 = vmatprep.subr.bf16.mxu0 %v10206_v32  ;;  %v10269_v32 = vld [vmem:[#allocation12 + $0xa8] ss:$28 sps:$4 sm:$0xff]  }
 0x40f   :  { %4695 = vmatpush1.bf16.msra.mxu0 %v10204_v36  ;;  %v10283_v36 = vld [vmem:[#allocation12 + $0x11c] ss:$28 sps:$4 sm:$0xff]  }
 0x410   :  { %4696 = vmatprep.subr.bf16.mxu0 %v10209_v21  ;;  %v10281_v21 = vld [vmem:[#allocation12 + $0x118] ss:$28 sps:$4 sm:$0xff]  }
 0x413   :  { %4697 = vmatpush1.bf16.msra.mxu0 %v10207_v39  ;;  %v10293_v39 = vld [vmem:[#allocation12 + $0x188] ss:$28 sps:$4 sm:$0xff]  }
 0x414   :  { %4698 = vmatprep.subr.bf16.mxu0 %v10212_v40  ;;  %v10301_v40 = vld [vmem:[#allocation12 + $0x1c4] ss:$28 sps:$4 sm:$0xff]  }
 0x417   :  { %4699 = vmatpush1.bf16.msra.mxu0 %v10210_v54  ;;  %v10305_v54 = vld [vmem:[#allocation12 + $0x1f8] ss:$28 sps:$4 sm:$0xff]  }
 0x418   :  { %4700 = vmatprep.subr.bf16.mxu0 %v10215_v51  ;;  %v10313_v51 = vld [vmem:[#allocation12 + $0x234] ss:$28 sps:$4 sm:$0xff]  }
 0x41b   :  { %4701 = vmatpush1.bf16.msra.mxu0 %v10213_v43  ;;  %v10317_v43 = vld [vmem:[#allocation12 + $0x268] ss:$28 sps:$4 sm:$0xff]  }
 0x41c   :  { %4702 = vmatprep.subr.bf16.mxu0 %v10218_v48  ;;  %v10325_v48 = vld [vmem:[#allocation12 + $0x2a4] ss:$28 sps:$4 sm:$0xff]  }
 0x41f   :  { %4703 = vmatpush1.bf16.msra.mxu0 %v10216_v53  ;;  %v10323_v53 = vld [vmem:[#allocation12 + $0x2a0] ss:$28 sps:$4 sm:$0xff]  }
 0x420   :  { %4731 = vmatprep.subr.bf16.mxu0 %v10221_v47  ;;  %v10331_v47 = vld [vmem:[#allocation12 + $0x2dc] ss:$28 sps:$4 sm:$0xff]  }
 0x422   :  { %4721 = vmatmul.mubr.bf16.vlgmr.msra.gmra.mrb[12].mxu0 %v11443_v24 }
 0x423   :  { %4732 = vmatpush1.bf16.msra.mxu0 %v10219_v56  ;;  %4763 = vmatprep.mubr.bf16.mxu0 %v11077_v20  ;;  %v10329_v56 = vld [vmem:[#allocation12 + $0x2d8] ss:$28 sps:$4 sm:$0xff]  }
 0x424   :  { %4733 = vmatprep.subr.bf16.mxu0 %v10224_v58  ;;  %v10337_v58 = vld [vmem:[#allocation12 + $0x314] ss:$28 sps:$4 sm:$0xff]  }
 0x427   :  { %4734 = vmatpush1.bf16.msra.mxu0 %v10222_v60  ;;  %v10335_v60 = vld [vmem:[#allocation12 + $0x310] ss:$28 sps:$4 sm:$0xff]  }
 0x428   :  { %4735 = vmatprep.subr.bf16.mxu0 %v10227_v52  ;;  %v10343_v52 = vld [vmem:[#allocation12 + $0x34c] ss:$28 sps:$4 sm:$0xff]  }
 0x42b   :  { %4736 = vmatpush1.bf16.msra.mxu0 %v10225_v61  ;;  %v10341_v61 = vld [vmem:[#allocation12 + $0x348] ss:$28 sps:$4 sm:$0xff]  }
 0x42c   :  { %4737 = vmatprep.subr.bf16.mxu0 %v10230_v63  ;;  %v10349_v63 = vld [vmem:[#allocation12 + $0x384] ss:$28 sps:$4 sm:$0xff]  }
 0x42f   :  { %4738 = vmatpush1.bf16.msra.mxu0 %v10228_v49  ;;  %v11464_v49 = vld [vmem:[#allocation10] sm:$0xff] }
 0x430   :  { %4739 = vmatprep.subr.bf16.mxu0 %v10233_v0  ;;  %v4325_v0 = vrot.slane %v11464_v49, %v11363_v26 }
 0x433   :  { %4740 = vmatpush1.bf16.msra.mxu0 %v10231_v2  ;;  %v4329_v2 = vrot.slane %v11464_v49, %v11366_v44 }
 0x434   :  { %4741 = vmatprep.subr.bf16.mxu0 %v10236_v3 }
 0x437   :  { %4742 = vmatpush1.bf16.msra.mxu0 %v10234_v5 }
 0x438   :  { %4743 = vmatprep.subr.bf16.mxu0 %v10239_v6 }
 0x43b   :  { %4744 = vmatpush1.bf16.msra.mxu0 %v10237_v8 }
 0x43c   :  { %4745 = vmatprep.subr.bf16.mxu0 %v10242_v9 }
 0x43f   :  { %4746 = vmatpush1.bf16.msra.mxu0 %v10240_v10 }
 0x440   :  { %9266 = vmatprep.subr.bf16.mxu0 %v11078_v62 }
 0x442   :  { %4764 = vmatmul.mubr.bf16.vlgmr.msra.gmra.mrb[16].mxu0 %v11443_v24 }
 0x443   :  { %9267 = vmatpush3.bf16.msra.mxu0 %v10243_v11  ;;  %9282 = vmatprep.mubr.msk.bf16.mxu0 %vm11079_vm0, %v11078_v62 }
 0x444   :  { %9268 = vmatprep.subr.bf16.mxu0 %v11078_v62 }
 0x447   :  { %9269 = vmatpush3.bf16.msra.mxu0 %v10244_v13 }
 0x448   :  { %9270 = vmatprep.subr.bf16.mxu0 %v11078_v62 }
 0x44b   :  { %9271 = vmatpush3.bf16.msra.mxu0 %v10245_v14 }
 0x44c   :  { %9272 = vmatprep.subr.bf16.mxu0 %v11078_v62 }
 0x44f   :  { %9273 = vmatpush3.bf16.msra.mxu0 %v10246_v15 }
 0x450   :  { %9274 = vmatprep.subr.bf16.mxu0 %v11078_v62 }
 0x453   :  { %9275 = vmatpush3.bf16.msra.mxu0 %v10247_v16 }
 0x454   :  { %9276 = vmatprep.subr.bf16.mxu0 %v11078_v62 }
 0x457   :  { %9277 = vmatpush3.bf16.msra.mxu0 %v10248_v17 }
 0x458   :  { %9278 = vmatprep.subr.bf16.mxu0 %v11078_v62 }
 0x45b   :  { %9279 = vmatpush3.bf16.msra.mxu0 %v10249_v1 }
 0x45c   :  { %9280 = vmatprep.subr.bf16.mxu0 %v11078_v62 }
 0x45f   :  { %9281 = vmatpush3.bf16.msra.mxu0 %v10250_v23  ;;  %v10355_v23 = vld [vmem:[#allocation12 + $0x3bc] ss:$28 sps:$4 sm:$0xff]  }
 0x460   :  { %7337 = vmatprep.subr.bf16.mxu0 %v10253_v27  ;;  %v10353_v27 = vld [vmem:[#allocation12 + $0x3b8] ss:$28 sps:$4 sm:$0xff]  }
 0x462   :  { %9283 = vmatmul.mubr.bf16.vlgmr.msra.gmra.mrb[20].mxu0 %v11443_v24  ;;  %v10289_v24 = vld [vmem:[#allocation12 + $0x154] ss:$28 sps:$4 sm:$0xff]  }
 0x463   :  { %7338 = vmatpush1.bf16.msra.mxu0 %v10251_v7  ;;  %v10361_v7 = vld [vmem:[#allocation12 + $0x3f4] ss:$28 sps:$4 sm:$0xff]  }
 0x464   :  { %7339 = vmatprep.subr.bf16.mxu0 %v10259_v29  ;;  %v10364_v29 = vld [vmem:[#allocation12 + $0x3fc] ss:$28 sps:$4 sm:$0xff]  }
 0x467   :  { %7340 = vmatpush1.bf16.msra.mxu0 %v10257_v30  ;;  %v10359_v30 = vld [vmem:[#allocation12 + $0x3f0] ss:$28 sps:$4 sm:$0xff]  }
 0x468   :  { %7341 = vmatprep.subr.bf16.mxu0 %v10265_v31  ;;  %v10362_v31 = vld [vmem:[#allocation12 + $0x3f8] ss:$28 sps:$4 sm:$0xff]  }
 0x46b   :  { %7342 = vmatpush1.bf16.msra.mxu0 %v10263_v33  ;;  %v10367_v33 = vld [vmem:[#allocation12 + $0x42c] ss:$28 sps:$4 sm:$0xff]  }
 0x46c   :  { %7343 = vmatprep.subr.bf16.mxu0 %v10271_v12  ;;  %v10370_v12 = vld [vmem:[#allocation12 + $0x434] ss:$28 sps:$4 sm:$0xff]  }
 0x46f   :  { %7344 = vmatpush1.bf16.msra.mxu0 %v10269_v32  ;;  %v10365_v32 = vld [vmem:[#allocation12 + $0x428] ss:$28 sps:$4 sm:$0xff]  }
 0x470   :  { %7345 = vmatprep.subr.bf16.mxu0 %v10277_v34  ;;  %v10368_v34 = vld [vmem:[#allocation12 + $0x430] ss:$28 sps:$4 sm:$0xff]  }
 0x473   :  { %7346 = vmatpush1.bf16.msra.mxu0 %v10275_v35  ;;  %v10373_v35 = vld [vmem:[#allocation12 + $0x464] ss:$28 sps:$4 sm:$0xff]  }
 0x474   :  { %7347 = vmatprep.subr.bf16.mxu0 %v10283_v36  ;;  %v10376_v36 = vld [vmem:[#allocation12 + $0x46c] ss:$28 sps:$4 sm:$0xff]  }
 0x477   :  { %7348 = vmatpush1.bf16.msra.mxu0 %v10281_v21  ;;  %v10371_v21 = vld [vmem:[#allocation12 + $0x460] ss:$28 sps:$4 sm:$0xff]  }
 0x478   :  { %7349 = vmatprep.subr.bf16.mxu0 %v10289_v24  ;;  %v10374_v24 = vld [vmem:[#allocation12 + $0x468] ss:$28 sps:$4 sm:$0xff]  }
 0x47b   :  { %7350 = vmatpush1.bf16.msra.mxu0 %v10287_v37  ;;  %v10379_v37 = vld [vmem:[#allocation12 + $0x49c] ss:$28 sps:$4 sm:$0xff]  }
 0x47c   :  { %7351 = vmatprep.subr.bf16.mxu0 %v10295_v38  ;;  %v10382_v38 = vld [vmem:[#allocation12 + $0x4a4] ss:$28 sps:$4 sm:$0xff]  }
 0x47f   :  { %7352 = vmatpush1.bf16.msra.mxu0 %v10293_v39  ;;  %v10377_v39 = vld [vmem:[#allocation12 + $0x498] ss:$28 sps:$4 sm:$0xff]  }
 0x480   :  { %7353 = vmatprep.subr.bf16.mxu0 %v10301_v40  ;;  %v10380_v40 = vld [vmem:[#allocation12 + $0x4a0] ss:$28 sps:$4 sm:$0xff]  }
 0x483   :  { %7354 = vmatpush1.bf16.msra.mxu0 %v10299_v41  ;;  %v4333_v41 = vrot.slane %v11464_v49, %v11393_v59 }
 0x484   :  { %7355 = vmatprep.subr.bf16.mxu0 %v10307_v42  ;;  %v10385_v42 = vld [vmem:[#allocation12 + $0x4d4] ss:$28 sps:$4 sm:$0xff]  }
 0x487   :  { %7356 = vmatpush1.bf16.msra.mxu0 %v10305_v54  ;;  %v10388_v54 = vld [vmem:[#allocation12 + $0x4dc] ss:$28 sps:$4 sm:$0xff]  }
 0x488   :  { %7357 = vmatprep.subr.bf16.mxu0 %v10313_v51  ;;  %v4337_v51 = vrot.slane %v11464_v49, %v11396_v55 }
 0x48b   :  { %7358 = vmatpush1.bf16.msra.mxu0 %v10311_v45 }
 0x48c   :  { %7359 = vmatprep.subr.bf16.mxu0 %v10319_v46  ;;  %v10383_v46 = vld [vmem:[#allocation12 + $0x4d0] ss:$28 sps:$4 sm:$0xff]  }
 0x48f   :  { %7360 = vmatpush1.bf16.msra.mxu0 %v10317_v43  ;;  %v10386_v43 = vld [vmem:[#allocation12 + $0x4d8] ss:$28 sps:$4 sm:$0xff]  }
 0x490   :  { %7361 = vmatprep.subr.bf16.mxu0 %v10325_v48 }
 0x493   :  { %7362 = vmatpush1.bf16.msra.mxu0 %v10323_v53 }
 0x494   :  { %7363 = vmatprep.subr.bf16.mxu0 %v10331_v47  ;;  %v10391_v47 = vld [vmem:[#allocation12 + $0x50c] ss:$28 sps:$4 sm:$0xff]  }
 0x497   :  { %7364 = vmatpush1.bf16.msra.mxu0 %v10329_v56  ;;  %v10394_v56 = vld [vmem:[#allocation12 + $0x514] ss:$28 sps:$4 sm:$0xff]  }
 0x498   :  { %7365 = vmatprep.subr.bf16.mxu0 %v10337_v58 }
 0x49b   :  { %7366 = vmatpush1.bf16.msra.mxu0 %v10335_v60 }
 0x49c   :  { %7367 = vmatprep.subr.bf16.mxu0 %v10343_v52 }
 0x49f   :  { %7368 = vmatpush1.bf16.msra.mxu0 %v10341_v61 }
 0x4a0   :  { %7380 = vmatprep.subr.bf16.mxu0 %v10349_v63 }
 0x4d5   :  { %v4679_v3 = vpop.f32.mrb[8].mxu0 }
 0x4d6   :  { %v4680_v5 = vadd.f32 %v4679_v3, %v4325_v0  ;;  %v4681_v6 = vpop.f32.mrb[9].mxu0 }
 0x4d7   :  { %v4682_v8 = vadd.f32 %v4681_v6, %v4329_v2  ;;  %v4683_v9 = vpop.f32.mrb[10].mxu0  ;;  %v10397_v6 = vld [vmem:[#allocation12 + $0x544] ss:$28 sps:$4 sm:$0xff]  }
 0x4d8   :  { %v4684_v10 = vadd.f32 %v4683_v9, %v4325_v0  ;;  %v4685_v11 = vpop.f32.mrb[11].mxu0  ;;  %v4815_v14 = vmax.f32 %v4680_v5, 0.0  ;;  %v10389_v0 = vld [vmem:[#allocation12 + $0x508] ss:$28 sps:$4 sm:$0xff]  }
 0x4d9   :  { %v4686_v13 = vadd.f32 %v4685_v11, %v4329_v2  ;;  %v4816_v16 = vmax.f32 %v4682_v8, 0.0  ;;  %v10392_v2 = vld [vmem:[#allocation12 + $0x510] ss:$28 sps:$4 sm:$0xff]  }
 0x4da   :  { %v4822_v15 = vmax.f32 %v4684_v10, 0.0  ;;  %v10400_v8 = vld [vmem:[#allocation12 + $0x54c] ss:$28 sps:$4 sm:$0xff]  }
 0x4db   :  { %v4823_v17 = vmax.f32 %v4686_v13, 0.0 }
 0x4dc   :  { %v11470_v18 = vpack.c.bf16 %v4822_v15, %v4815_v14  ;;  %v10395_v14 = vld [vmem:[#allocation12 + $0x540] ss:$28 sps:$4 sm:$0xff]   ;;  %v10398_v15 = vld [vmem:[#allocation12 + $0x548] ss:$28 sps:$4 sm:$0xff]  }
 0x4dd   :  { %v11472_v1 = vpack.c.bf16 %v4823_v17, %v4816_v16  ;;  %v10403_v16 = vld [vmem:[#allocation12 + $0x57c] ss:$28 sps:$4 sm:$0xff]   ;;  %v10406_v17 = vld [vmem:[#allocation12 + $0x584] ss:$28 sps:$4 sm:$0xff]  }
 0x4df   :  { %7369 = vmatprep.mubr.bf16.mxu0 %v11472_v1  ;;  %7541 = vmatprep.mubr.bf16.mxu1 %v11472_v1 }
 0x4e0   :  { %7370 = vmatmul.mubr.bf16.vlgmr.msra.gmra.mrb[24].mxu0 %v11470_v18  ;;  %7542 = vmatmul.mubr.bf16.vlgmr.msra.gmra.mrb[28].mxu1 %v11470_v18 }
 0x4e1   :  { %7381 = vmatpush1.bf16.msra.mxu0 %v10347_v19  ;;  %7553 = vmatpush1.bf16.msra.mxu1 %v10350_v22  ;;  %v10401_v19 = vld [vmem:[#allocation12 + $0x578] ss:$28 sps:$4 sm:$0xff]   ;;  %v10404_v22 = vld [vmem:[#allocation12 + $0x580] ss:$28 sps:$4 sm:$0xff]  }
 0x4e2   :  { %7382 = vmatprep.subr.bf16.mxu0 %v10355_v23  ;;  %7554 = vmatprep.subr.bf16.mxu1 %v10358_v4  ;;  %v10409_v23 = vld [vmem:[#allocation12 + $0x5b4] ss:$28 sps:$4 sm:$0xff]   ;;  %v10412_v4 = vld [vmem:[#allocation12 + $0x5bc] ss:$28 sps:$4 sm:$0xff]  }
 0x4e5   :  { %7383 = vmatpush1.bf16.msra.mxu0 %v10353_v27  ;;  %7555 = vmatpush1.bf16.msra.mxu1 %v10356_v50  ;;  %v10407_v27 = vld [vmem:[#allocation12 + $0x5b0] ss:$28 sps:$4 sm:$0xff]   ;;  %v10410_v50 = vld [vmem:[#allocation12 + $0x5b8] ss:$28 sps:$4 sm:$0xff]  }
 0x4e6   :  { %7384 = vmatprep.subr.bf16.mxu0 %v10361_v7  ;;  %7556 = vmatprep.subr.bf16.mxu1 %v10364_v29  ;;  %v10415_v7 = vld [vmem:[#allocation12 + $0x5ec] ss:$28 sps:$4 sm:$0xff]   ;;  %v10418_v29 = vld [vmem:[#allocation12 + $0x5f4] ss:$28 sps:$4 sm:$0xff]  }
 0x4e9   :  { %7385 = vmatpush1.bf16.msra.mxu0 %v10359_v30  ;;  %7557 = vmatpush1.bf16.msra.mxu1 %v10362_v31  ;;  %v10413_v30 = vld [vmem:[#allocation12 + $0x5e8] ss:$28 sps:$4 sm:$0xff]   ;;  %v10416_v31 = vld [vmem:[#allocation12 + $0x5f0] ss:$28 sps:$4 sm:$0xff]  }
 0x4ea   :  { %7386 = vmatprep.subr.bf16.mxu0 %v10367_v33  ;;  %7558 = vmatprep.subr.bf16.mxu1 %v10370_v12  ;;  %v10421_v33 = vld [vmem:[#allocation12 + $0x624] ss:$28 sps:$4 sm:$0xff]   ;;  %v10424_v12 = vld [vmem:[#allocation12 + $0x62c] ss:$28 sps:$4 sm:$0xff]  }
 0x4ed   :  { %7387 = vmatpush1.bf16.msra.mxu0 %v10365_v32  ;;  %7559 = vmatpush1.bf16.msra.mxu1 %v10368_v34  ;;  %v10419_v32 = vld [vmem:[#allocation12 + $0x620] ss:$28 sps:$4 sm:$0xff]   ;;  %v10422_v34 = vld [vmem:[#allocation12 + $0x628] ss:$28 sps:$4 sm:$0xff]  }
 0x4ee   :  { %7388 = vmatprep.subr.bf16.mxu0 %v10373_v35  ;;  %7560 = vmatprep.subr.bf16.mxu1 %v10376_v36  ;;  %v10427_v35 = vld [vmem:[#allocation12 + $0x65c] ss:$28 sps:$4 sm:$0xff]   ;;  %v10430_v36 = vld [vmem:[#allocation12 + $0x664] ss:$28 sps:$4 sm:$0xff]  }
 0x4f1   :  { %7389 = vmatpush1.bf16.msra.mxu0 %v10371_v21  ;;  %7561 = vmatpush1.bf16.msra.mxu1 %v10374_v24  ;;  %v10425_v21 = vld [vmem:[#allocation12 + $0x658] ss:$28 sps:$4 sm:$0xff]   ;;  %v10428_v24 = vld [vmem:[#allocation12 + $0x660] ss:$28 sps:$4 sm:$0xff]  }
 0x4f2   :  { %7390 = vmatprep.subr.bf16.mxu0 %v10379_v37  ;;  %7562 = vmatprep.subr.bf16.mxu1 %v10382_v38  ;;  %v4341_v37 = vrot.slane %v11464_v49, %v11410_v25  ;;  %v10433_v38 = vld [vmem:[#allocation12 + $0x694] ss:$28 sps:$4 sm:$0xff]  }
 0x4f5   :  { %v4722_v45 = vpop.f32.mrb[12].mxu0  ;;  %7391 = vmatpush1.bf16.msra.mxu0 %v10377_v39  ;;  %7563 = vmatpush1.bf16.msra.mxu1 %v10380_v40  ;;  %v10436_v39 = vld [vmem:[#allocation12 + $0x69c] ss:$28 sps:$4 sm:$0xff]   ;;  %v4345_v40 = vrot.slane %v11464_v49, %v11413_v28 }
 0x4f6   :  { %v4723_v48 = vadd.f32 %v4722_v45, %v4333_v41  ;;  %v4724_v53 = vpop.f32.mrb[13].mxu0  ;;  %7392 = vmatprep.subr.bf16.mxu0 %v10385_v42  ;;  %7564 = vmatprep.subr.bf16.mxu1 %v10388_v54  ;;  %v10431_v42 = vld [vmem:[#allocation12 + $0x690] ss:$28 sps:$4 sm:$0xff]   ;;  %v10434_v54 = vld [vmem:[#allocation12 + $0x698] ss:$28 sps:$4 sm:$0xff]  }
 0x4f7   :  { %v4725_v58 = vadd.f32 %v4724_v53, %v4337_v51  ;;  %v4726_v60 = vpop.f32.mrb[14].mxu0 }
 0x4f8   :  { %v4727_v52 = vadd.f32 %v4726_v60, %v4333_v41  ;;  %v4728_v61 = vpop.f32.mrb[15].mxu0  ;;  %v4817_v3 = vmax.f32 %v4723_v48, 0.0  ;;  %v10437_v60 = vld [vmem:[#allocation12 + $0x6c8] ss:$28 sps:$4 sm:$0xff]  }
 0x4f9   :  { %v4729_v63 = vadd.f32 %v4728_v61, %v4337_v51  ;;  %7393 = vmatpush1.bf16.msra.mxu0 %v10383_v46  ;;  %7565 = vmatpush1.bf16.msra.mxu1 %v10386_v43  ;;  %v4818_v9 = vmax.f32 %v4725_v58, 0.0  ;;  %v10439_v46 = vld [vmem:[#allocation12 + $0x6cc] ss:$28 sps:$4 sm:$0xff]   ;;  %v10442_v43 = vld [vmem:[#allocation12 + $0x6d4] ss:$28 sps:$4 sm:$0xff]  }
 0x4fa   :  { %v4824_v5 = vmax.f32 %v4727_v52, 0.0  ;;  %7394 = vmatprep.subr.bf16.mxu0 %v10391_v47  ;;  %7566 = vmatprep.subr.bf16.mxu1 %v10394_v56  ;;  %v10440_v52 = vld [vmem:[#allocation12 + $0x6d0] ss:$28 sps:$4 sm:$0xff]  }
 0x4fb   :  { %v4825_v10 = vmax.f32 %v4729_v63, 0.0 }
 0x4fc   :  { %v11482_v11 = vpack.c.bf16 %v4824_v5, %v4817_v3 }
 0x4fd   :  { %v11484_v13 = vpack.c.bf16 %v4825_v10, %v4818_v9  ;;  %7395 = vmatpush1.bf16.msra.mxu0 %v10389_v0  ;;  %7567 = vmatpush1.bf16.msra.mxu1 %v10392_v2  ;;  %v10445_v0 = vld [vmem:[#allocation12 + $0x704] ss:$28 sps:$4 sm:$0xff]   ;;  %v10448_v2 = vld [vmem:[#allocation12 + $0x70c] ss:$28 sps:$4 sm:$0xff]  }
 0x4fe   :  { %7396 = vmatprep.subr.bf16.mxu0 %v10397_v6  ;;  %7568 = vmatprep.subr.bf16.mxu1 %v10400_v8  ;;  %v10443_v9 = vld [vmem:[#allocation12 + $0x700] ss:$28 sps:$4 sm:$0xff]   ;;  %v10446_v10 = vld [vmem:[#allocation12 + $0x708] ss:$28 sps:$4 sm:$0xff]  }
 0x4ff   :  { %7412 = vmatprep.mubr.bf16.mxu0 %v11484_v13  ;;  %7584 = vmatprep.mubr.bf16.mxu1 %v11484_v13 }
 0x501   :  { %7397 = vmatpush1.bf16.msra.mxu0 %v10395_v14  ;;  %7569 = vmatpush1.bf16.msra.mxu1 %v10398_v15  ;;  %v10451_v14 = vld [vmem:[#allocation12 + $0x73c] ss:$28 sps:$4 sm:$0xff]   ;;  %v10454_v15 = vld [vmem:[#allocation12 + $0x744] ss:$28 sps:$4 sm:$0xff]  }
 0x502   :  { %7398 = vmatprep.subr.bf16.mxu0 %v10403_v16  ;;  %7570 = vmatprep.subr.bf16.mxu1 %v10406_v17  ;;  %v10449_v16 = vld [vmem:[#allocation12 + $0x738] ss:$28 sps:$4 sm:$0xff]   ;;  %v10452_v17 = vld [vmem:[#allocation12 + $0x740] ss:$28 sps:$4 sm:$0xff]  }
 0x505   :  { %7399 = vmatpush1.bf16.msra.mxu0 %v10401_v19  ;;  %7571 = vmatpush1.bf16.msra.mxu1 %v10404_v22  ;;  %v10457_v19 = vld [vmem:[#allocation12 + $0x774] ss:$28 sps:$4 sm:$0xff]   ;;  %v10460_v22 = vld [vmem:[#allocation12 + $0x77c] ss:$28 sps:$4 sm:$0xff]  }
 0x506   :  { %7400 = vmatprep.subr.bf16.mxu0 %v10409_v23  ;;  %7572 = vmatprep.subr.bf16.mxu1 %v10412_v4  ;;  %v10455_v23 = vld [vmem:[#allocation12 + $0x770] ss:$28 sps:$4 sm:$0xff]   ;;  %v10458_v4 = vld [vmem:[#allocation12 + $0x778] ss:$28 sps:$4 sm:$0xff]  }
 0x509   :  { %7401 = vmatpush1.bf16.msra.mxu0 %v10407_v27  ;;  %7573 = vmatpush1.bf16.msra.mxu1 %v10410_v50  ;;  %v10463_v27 = vld [vmem:[#allocation12 + $0x7ac] ss:$28 sps:$4 sm:$0xff]   ;;  %v10466_v50 = vld [vmem:[#allocation12 + $0x7b4] ss:$28 sps:$4 sm:$0xff]  }
 0x50a   :  { %7402 = vmatprep.subr.bf16.mxu0 %v10415_v7  ;;  %7574 = vmatprep.subr.bf16.mxu1 %v10418_v29  ;;  %v10461_v7 = vld [vmem:[#allocation12 + $0x7a8] ss:$28 sps:$4 sm:$0xff]   ;;  %v10464_v29 = vld [vmem:[#allocation12 + $0x7b0] ss:$28 sps:$4 sm:$0xff]  }
 0x50d   :  { %7403 = vmatpush1.bf16.msra.mxu0 %v10413_v30  ;;  %7575 = vmatpush1.bf16.msra.mxu1 %v10416_v31  ;;  %v10469_v30 = vld [vmem:[#allocation12 + $0x7e4] ss:$28 sps:$4 sm:$0xff]   ;;  %v10472_v31 = vld [vmem:[#allocation12 + $0x7ec] ss:$28 sps:$4 sm:$0xff]  }
 0x50e   :  { %7404 = vmatprep.subr.bf16.mxu0 %v10421_v33  ;;  %7576 = vmatprep.subr.bf16.mxu1 %v10424_v12  ;;  %v10467_v33 = vld [vmem:[#allocation12 + $0x7e0] ss:$28 sps:$4 sm:$0xff]   ;;  %v10470_v12 = vld [vmem:[#allocation12 + $0x7e8] ss:$28 sps:$4 sm:$0xff]  }
 0x511   :  { %7405 = vmatpush1.bf16.msra.mxu0 %v10419_v32  ;;  %7577 = vmatpush1.bf16.msra.mxu1 %v10422_v34  ;;  %v10475_v32 = vld [vmem:[#allocation12 + $0x81c] ss:$28 sps:$4 sm:$0xff]   ;;  %v10478_v34 = vld [vmem:[#allocation12 + $0x824] ss:$28 sps:$4 sm:$0xff]  }
 0x512   :  { %7406 = vmatprep.subr.bf16.mxu0 %v10427_v35  ;;  %7578 = vmatprep.subr.bf16.mxu1 %v10430_v36  ;;  %v10473_v35 = vld [vmem:[#allocation12 + $0x818] ss:$28 sps:$4 sm:$0xff]   ;;  %v10476_v36 = vld [vmem:[#allocation12 + $0x820] ss:$28 sps:$4 sm:$0xff]  }
 0x515   :  { %v4765_v41 = vpop.f32.mrb[16].mxu0  ;;  %7407 = vmatpush1.bf16.msra.mxu0 %v10425_v21  ;;  %7579 = vmatpush1.bf16.msra.mxu1 %v10428_v24  ;;  %v4349_v21 = vrot.slane %v11464_v49, %v11405_v57  ;;  %v10481_v24 = vld [vmem:[#allocation12 + $0x854] ss:$28 sps:$4 sm:$0xff]  }
 0x516   :  { %v4766_v51 = vadd.f32 %v4765_v41, %v4341_v37  ;;  %v4767_v45 = vpop.f32.mrb[17].mxu0  ;;  %7408 = vmatprep.subr.bf16.mxu0 %v10433_v38  ;;  %7580 = vmatprep.subr.bf16.mxu1 %v10436_v39  ;;  %v10479_v39 = vld [vmem:[#allocation12 + $0x850] ss:$28 sps:$4 sm:$0xff]  }
 0x517   :  { %v4768_v48 = vadd.f32 %v4767_v45, %v4345_v40  ;;  %v4769_v53 = vpop.f32.mrb[18].mxu0  ;;  %v10490_v45 = vld [vmem:[#allocation12 + $0x894] ss:$28 sps:$4 sm:$0xff]  }
 0x518   :  { %v4770_v47 = vadd.f32 %v4769_v53, %v4341_v37  ;;  %v4771_v56 = vpop.f32.mrb[19].mxu0  ;;  %v4819_v61 = vmax.f32 %v4766_v51, 0.0  ;;  %v10484_v37 = vld [vmem:[#allocation12 + $0x85c] ss:$28 sps:$4 sm:$0xff]  }
 0x519   :  { %v4772_v58 = vadd.f32 %v4771_v56, %v4345_v40  ;;  %7409 = vmatpush1.bf16.msra.mxu0 %v10431_v42  ;;  %7581 = vmatpush1.bf16.msra.mxu1 %v10434_v54  ;;  %v4820_v3 = vmax.f32 %v4768_v48, 0.0  ;;  %v10482_v42 = vld [vmem:[#allocation12 + $0x858] ss:$28 sps:$4 sm:$0xff]   ;;  %v10487_v54 = vld [vmem:[#allocation12 + $0x88c] ss:$28 sps:$4 sm:$0xff]  }
 0x51a   :  { %v4826_v63 = vmax.f32 %v4770_v47, 0.0  ;;  %7410 = vmatprep.subr.bf16.mxu0 %v10439_v46  ;;  %7582 = vmatprep.subr.bf16.mxu1 %v10442_v43  ;;  %v10485_v48 = vld [vmem:[#allocation12 + $0x888] ss:$28 sps:$4 sm:$0xff]   ;;  %v10488_v47 = vld [vmem:[#allocation12 + $0x890] ss:$28 sps:$4 sm:$0xff]  }
 0x51b   :  { %v4827_v5 = vmax.f32 %v4772_v58, 0.0  ;;  %v10493_v56 = vld [vmem:[#allocation12 + $0x8c4] ss:$28 sps:$4 sm:$0xff]   ;;  %v10496_v58 = vld [vmem:[#allocation12 + $0x8cc] ss:$28 sps:$4 sm:$0xff]  }
 0x51c   :  { %v11492_v6 = vpack.c.bf16 %v4826_v63, %v4819_v61  ;;  %v10494_v61 = vld [vmem:[#allocation12 + $0x8c8] ss:$28 sps:$4 sm:$0xff]   ;;  %v10499_v63 = vld [vmem:[#allocation12 + $0x8fc] ss:$28 sps:$4 sm:$0xff]  }
 0x51d   :  { %v11494_v8 = vpack.c.bf16 %v4827_v5, %v4820_v3  ;;  %7411 = vmatpush1.bf16.msra.mxu0 %v10437_v60  ;;  %7583 = vmatpush1.bf16.msra.mxu1 %v10440_v52  ;;  %v10491_v52 = vld [vmem:[#allocation12 + $0x8c0] ss:$28 sps:$4 sm:$0xff]   ;;  %v10505_v5 = vld [vmem:[#allocation12 + $0x934] ss:$28 sps:$4 sm:$0xff]  }
 0x51e   :  { %7423 = vmatprep.subr.bf16.mxu0 %v10445_v0  ;;  %7595 = vmatprep.subr.bf16.mxu1 %v10448_v2  ;;  %v10502_v0 = vld [vmem:[#allocation12 + $0x904] ss:$28 sps:$4 sm:$0xff]   ;;  %v10497_v2 = vld [vmem:[#allocation12 + $0x8f8] ss:$28 sps:$4 sm:$0xff]  }
 0x51f   :  { %v10500_v3 = vld [vmem:[#allocation12 + $0x900] ss:$28 sps:$4 sm:$0xff]  }
 0x520   :  { %7413 = vmatmul.mubr.bf16.vlgmr.msra.gmra.mrb[24].mxu0 %v11482_v11  ;;  %7585 = vmatmul.mubr.bf16.vlgmr.msra.gmra.mrb[28].mxu1 %v11482_v11 }
 0x521   :  { %7424 = vmatpush1.bf16.msra.mxu0 %v10443_v9  ;;  %7455 = vmatprep.mubr.bf16.mxu0 %v11494_v8  ;;  %v10508_v9 = vld [vmem:[#allocation12 + $0x93c] ss:$28 sps:$4 sm:$0xff]  }
 0x522   :  { %7596 = vmatpush1.bf16.msra.mxu1 %v10446_v10  ;;  %7627 = vmatprep.mubr.bf16.mxu1 %v11494_v8  ;;  %v10503_v10 = vld [vmem:[#allocation12 + $0x930] ss:$28 sps:$4 sm:$0xff]  }
 0x523   :  { %7425 = vmatprep.subr.bf16.mxu0 %v10451_v14  ;;  %7597 = vmatprep.subr.bf16.mxu1 %v10454_v15  ;;  %v10506_v14 = vld [vmem:[#allocation12 + $0x938] ss:$28 sps:$4 sm:$0xff]   ;;  %v10511_v15 = vld [vmem:[#allocation12 + $0x96c] ss:$28 sps:$4 sm:$0xff]  }
 0x525   :  { %7426 = vmatpush1.bf16.msra.mxu0 %v10449_v16  ;;  %v10514_v16 = vld [vmem:[#allocation12 + $0x974] ss:$28 sps:$4 sm:$0xff]  }
 0x526   :  { %7598 = vmatpush1.bf16.msra.mxu1 %v10452_v17  ;;  %7427 = vmatprep.subr.bf16.mxu0 %v10457_v19  ;;  %v10509_v17 = vld [vmem:[#allocation12 + $0x968] ss:$28 sps:$4 sm:$0xff]   ;;  %v10512_v19 = vld [vmem:[#allocation12 + $0x970] ss:$28 sps:$4 sm:$0xff]  }
 0x527   :  { %7599 = vmatprep.subr.bf16.mxu1 %v10460_v22  ;;  %v10517_v22 = vld [vmem:[#allocation12 + $0x9a4] ss:$28 sps:$4 sm:$0xff]  }
 0x529   :  { %7428 = vmatpush1.bf16.msra.mxu0 %v10455_v23  ;;  %v10520_v23 = vld [vmem:[#allocation12 + $0x9ac] ss:$28 sps:$4 sm:$0xff]  }
 0x52a   :  { %7600 = vmatpush1.bf16.msra.mxu1 %v10458_v4  ;;  %7429 = vmatprep.subr.bf16.mxu0 %v10463_v27  ;;  %v10515_v4 = vld [vmem:[#allocation12 + $0x9a0] ss:$28 sps:$4 sm:$0xff]   ;;  %v10518_v27 = vld [vmem:[#allocation12 + $0x9a8] ss:$28 sps:$4 sm:$0xff]  }
 0x52b   :  { %7601 = vmatprep.subr.bf16.mxu1 %v10466_v50  ;;  %v10523_v50 = vld [vmem:[#allocation12 + $0x9dc] ss:$28 sps:$4 sm:$0xff]  }
 0x52d   :  { %7430 = vmatpush1.bf16.msra.mxu0 %v10461_v7  ;;  %v10526_v7 = vld [vmem:[#allocation12 + $0x9e4] ss:$28 sps:$4 sm:$0xff]  }
 0x52e   :  { %7602 = vmatpush1.bf16.msra.mxu1 %v10464_v29  ;;  %7431 = vmatprep.subr.bf16.mxu0 %v10469_v30  ;;  %v10521_v29 = vld [vmem:[#allocation12 + $0x9d8] ss:$28 sps:$4 sm:$0xff]   ;;  %v10524_v30 = vld [vmem:[#allocation12 + $0x9e0] ss:$28 sps:$4 sm:$0xff]  }
 0x52f   :  { %7603 = vmatprep.subr.bf16.mxu1 %v10472_v31  ;;  %v10529_v31 = vld [vmem:[#allocation12 + $0xa14] ss:$28 sps:$4 sm:$0xff]  }
 0x531   :  { %7432 = vmatpush1.bf16.msra.mxu0 %v10467_v33  ;;  %v10532_v33 = vld [vmem:[#allocation12 + $0xa1c] ss:$28 sps:$4 sm:$0xff]  }
 0x532   :  { %7604 = vmatpush1.bf16.msra.mxu1 %v10470_v12  ;;  %7433 = vmatprep.subr.bf16.mxu0 %v10475_v32  ;;  %v10527_v12 = vld [vmem:[#allocation12 + $0xa10] ss:$28 sps:$4 sm:$0xff]   ;;  %v10530_v32 = vld [vmem:[#allocation12 + $0xa18] ss:$28 sps:$4 sm:$0xff]  }
 0x533   :  { %7605 = vmatprep.subr.bf16.mxu1 %v10478_v34  ;;  %v10535_v34 = vld [vmem:[#allocation12 + $0xa4c] ss:$28 sps:$4 sm:$0xff]  }
 0x535   :  { %v4808_v38 = vpop.f32.mrb[20].mxu0  ;;  %7434 = vmatpush1.bf16.msra.mxu0 %v10473_v35  ;;  %v10538_v35 = vld [vmem:[#allocation12 + $0xa54] ss:$28 sps:$4 sm:$0xff]  }
 0x536   :  { %v4809_v40 = vadd.f32 %v4808_v38, %v4349_v21  ;;  %7606 = vmatpush1.bf16.msra.mxu1 %v10476_v36  ;;  %v9284_v41 = vpop.f32.mrb[21].mxu0  ;;  %7435 = vmatprep.subr.bf16.mxu0 %v10481_v24  ;;  %v10533_v36 = vld [vmem:[#allocation12 + $0xa48] ss:$28 sps:$4 sm:$0xff]   ;;  %v10539_v38 = vld [vmem:[#allocation12 + $0xa80] ss:$28 sps:$4 sm:$0xff]  }
 0x537   :  { %v4811_v51 = vpop.f32.mrb[22].mxu0  ;;  %7607 = vmatprep.subr.bf16.mxu1 %v10484_v37  ;;  %v10541_v24 = vld [vmem:[#allocation12 + $0xa84] ss:$28 sps:$4 sm:$0xff]   ;;  %v10544_v37 = vld [vmem:[#allocation12 + $0xa8c] ss:$28 sps:$4 sm:$0xff]  }
 0x538   :  { %v4812_v46 = vadd.f32 %v4811_v51, %v4349_v21  ;;  %v9285_v43 = vpop.f32.mrb[23].mxu0  ;;  %v4821_v49 = vmax.f32 %v4809_v40, 0.0  ;;  %v10536_v21 = vld [vmem:[#allocation12 + $0xa50] ss:$28 sps:$4 sm:$0xff]   ;;  %v10547_v40 = vld [vmem:[#allocation12 + $0xabc] ss:$28 sps:$4 sm:$0xff]  }
 0x539   :  { %7436 = vmatpush1.bf16.msra.mxu0 %v10479_v39  ;;  %v10542_v39 = vld [vmem:[#allocation12 + $0xa88] ss:$28 sps:$4 sm:$0xff]   ;;  %v10553_v51 = vld [vmem:[#allocation12 + $0xaf4] ss:$28 sps:$4 sm:$0xff]  }
 0x53a   :  { %v4828_v53 = vmax.f32 %v4812_v46, 0.0  ;;  %7608 = vmatpush1.bf16.msra.mxu1 %v10482_v42  ;;  %7437 = vmatprep.subr.bf16.mxu0 %v10487_v54  ;;  %v10550_v41 = vld [vmem:[#allocation12 + $0xac4] ss:$28 sps:$4 sm:$0xff]   ;;  %v10545_v42 = vld [vmem:[#allocation12 + $0xab8] ss:$28 sps:$4 sm:$0xff]  }
 0x53b   :  { %7609 = vmatprep.subr.bf16.mxu1 %v10490_v45  ;;  %v10548_v54 = vld [vmem:[#allocation12 + $0xac0] ss:$28 sps:$4 sm:$0xff]   ;;  %v10551_v46 = vld [vmem:[#allocation12 + $0xaf0] ss:$28 sps:$4 sm:$0xff]   ;;  %v10554_v43 = vld [vmem:[#allocation12 + $0xaf8] ss:$28 sps:$4 sm:$0xff]  }
 0x53c   :  { %v11502_v60 = vpack.c.bf16 %v4828_v53, %v4821_v49  ;;  %v10556_v45 = vld [vmem:[#allocation12 + $0xafc] ss:$28 sps:$4 sm:$0xff]   ;;  %v10562_v49 = vld [vmem:[#allocation12 + $0xb34] ss:$28 sps:$4 sm:$0xff]   ;;  %v10557_v53 = vld [vmem:[#allocation12 + $0xb28] ss:$28 sps:$4 sm:$0xff]  }
 0x53d   :  { %7438 = vmatpush1.bf16.msra.mxu0 %v10485_v48  ;;  %v10559_v48 = vld [vmem:[#allocation12 + $0xb2c] ss:$28 sps:$4 sm:$0xff]  }
 0x53e   :  { %7610 = vmatpush1.bf16.msra.mxu1 %v10488_v47  ;;  %7439 = vmatprep.subr.bf16.mxu0 %v10493_v56  ;;  %v10560_v47 = vld [vmem:[#allocation12 + $0xb30] ss:$28 sps:$4 sm:$0xff]   ;;  %v10565_v56 = vld [vmem:[#allocation12 + $0xb64] ss:$28 sps:$4 sm:$0xff]  }
 0x53f   :  { %7611 = vmatprep.subr.bf16.mxu1 %v10496_v58  ;;  %v10568_v58 = vld [vmem:[#allocation12 + $0xb6c] ss:$28 sps:$4 sm:$0xff]  }
 0x541   :  { %7440 = vmatpush1.bf16.msra.mxu0 %v10491_v52  ;;  %v10563_v52 = vld [vmem:[#allocation12 + $0xb60] ss:$28 sps:$4 sm:$0xff]  }
 0x542   :  { %7612 = vmatpush1.bf16.msra.mxu1 %v10494_v61  ;;  %7441 = vmatprep.subr.bf16.mxu0 %v10499_v63  ;;  %v10566_v61 = vld [vmem:[#allocation12 + $0xb68] ss:$28 sps:$4 sm:$0xff]   ;;  %v10571_v63 = vld [vmem:[#allocation12 + $0xb9c] ss:$28 sps:$4 sm:$0xff]  }
 0x543   :  { %7613 = vmatprep.subr.bf16.mxu1 %v10502_v0  ;;  %v10574_v0 = vld [vmem:[#allocation12 + $0xba4] ss:$28 sps:$4 sm:$0xff]  }
 0x545   :  { %7442 = vmatpush1.bf16.msra.mxu0 %v10497_v2  ;;  %v10569_v2 = vld [vmem:[#allocation12 + $0xb98] ss:$28 sps:$4 sm:$0xff]  }
 0x546   :  { %7614 = vmatpush1.bf16.msra.mxu1 %v10500_v3  ;;  %7443 = vmatprep.subr.bf16.mxu0 %v10505_v5  ;;  %v10572_v3 = vld [vmem:[#allocation12 + $0xba0] ss:$28 sps:$4 sm:$0xff]   ;;  %v10577_v5 = vld [vmem:[#allocation12 + $0xbd4] ss:$28 sps:$4 sm:$0xff]  }
 0x547   :  { %7615 = vmatprep.subr.bf16.mxu1 %v10508_v9  ;;  %v10580_v9 = vld [vmem:[#allocation12 + $0xbdc] ss:$28 sps:$4 sm:$0xff]  }
 0x549   :  { %7444 = vmatpush1.bf16.msra.mxu0 %v10503_v10  ;;  %v10575_v10 = vld [vmem:[#allocation12 + $0xbd0] ss:$28 sps:$4 sm:$0xff]  }
 0x54a   :  { %7616 = vmatpush1.bf16.msra.mxu1 %v10506_v14  ;;  %7445 = vmatprep.subr.bf16.mxu0 %v10511_v15  ;;  %v10578_v14 = vld [vmem:[#allocation12 + $0xbd8] ss:$28 sps:$4 sm:$0xff]   ;;  %v10583_v15 = vld [vmem:[#allocation12 + $0xc0c] ss:$28 sps:$4 sm:$0xff]  }
 0x54b   :  { %7617 = vmatprep.subr.bf16.mxu1 %v10514_v16  ;;  %v10586_v16 = vld [vmem:[#allocation12 + $0xc14] ss:$28 sps:$4 sm:$0xff]  }
 0x54d   :  { %7446 = vmatpush1.bf16.msra.mxu0 %v10509_v17  ;;  %v10581_v17 = vld [vmem:[#allocation12 + $0xc08] ss:$28 sps:$4 sm:$0xff]  }
 0x54e   :  { %7618 = vmatpush1.bf16.msra.mxu1 %v10512_v19  ;;  %7447 = vmatprep.subr.bf16.mxu0 %v10517_v22  ;;  %v10584_v19 = vld [vmem:[#allocation12 + $0xc10] ss:$28 sps:$4 sm:$0xff]  }
 0x54f   :  { %7619 = vmatprep.subr.bf16.mxu1 %v10520_v23  ;;  %v10589_v22 = vld [vmem:[#allocation12 + $0x14] ss:$28 sps:$4 sm:$0xff]  }
 0x550   :  { %v10590_v23 = vld [vmem:[#allocation12 + $0x1d8] ss:$28 sps:$4 sm:$0xff]  }
 0x551   :  { %7448 = vmatpush1.bf16.msra.mxu0 %v10515_v4  ;;  %v10587_v4 = vld [vmem:[#allocation12 + $0x10] ss:$28 sps:$4 sm:$0xff]  }
 0x552   :  { %7620 = vmatpush1.bf16.msra.mxu1 %v10518_v27  ;;  %7449 = vmatprep.subr.bf16.mxu0 %v10523_v50  ;;  %v10591_v27 = vld [vmem:[#allocation12 + $0x18] ss:$28 sps:$4 sm:$0xff]   ;;  %v10594_v50 = vld [vmem:[#allocation12 + $0x4c] ss:$28 sps:$4 sm:$0xff]  }
 0x553   :  { %7621 = vmatprep.subr.bf16.mxu1 %v10526_v7  ;;  %v10595_v7 = vld [vmem:[#allocation12 + $0x210] ss:$28 sps:$4 sm:$0xff]  }
 0x555   :  { %7450 = vmatpush1.bf16.msra.mxu0 %v10521_v29  ;;  %v10592_v29 = vld [vmem:[#allocation12 + $0x48] ss:$28 sps:$4 sm:$0xff]  }
 0x556   :  { %7622 = vmatpush1.bf16.msra.mxu1 %v10524_v30  ;;  %7451 = vmatprep.subr.bf16.mxu0 %v10529_v31  ;;  %v10596_v30 = vld [vmem:[#allocation12 + $0x50] ss:$28 sps:$4 sm:$0xff]   ;;  %v10599_v31 = vld [vmem:[#allocation12 + $0x84] ss:$28 sps:$4 sm:$0xff]  }
 0x557   :  { %7623 = vmatprep.subr.bf16.mxu1 %v10532_v33  ;;  %v10600_v33 = vld [vmem:[#allocation12 + $0x248] ss:$28 sps:$4 sm:$0xff]  }
 0x559   :  { %7452 = vmatpush1.bf16.msra.mxu0 %v10527_v12  ;;  %v10597_v12 = vld [vmem:[#allocation12 + $0x80] ss:$28 sps:$4 sm:$0xff]  }
 0x55a   :  { %7624 = vmatpush1.bf16.msra.mxu1 %v10530_v32  ;;  %7453 = vmatprep.subr.bf16.mxu0 %v10535_v34  ;;  %v10601_v32 = vld [vmem:[#allocation12 + $0x88] ss:$28 sps:$4 sm:$0xff]   ;;  %v10604_v34 = vld [vmem:[#allocation12 + $0xbc] ss:$28 sps:$4 sm:$0xff]  }
 0x55b   :  { %7625 = vmatprep.subr.bf16.mxu1 %v10538_v35  ;;  %v10605_v35 = vld [vmem:[#allocation12 + $0x280] ss:$28 sps:$4 sm:$0xff]  }
 0x55d   :  { %7454 = vmatpush1.bf16.msra.mxu0 %v10533_v36  ;;  %v10602_v36 = vld [vmem:[#allocation12 + $0xb8] ss:$28 sps:$4 sm:$0xff]  }
 0x55e   :  { %7626 = vmatpush1.bf16.msra.mxu1 %v10536_v21  ;;  %7466 = vmatprep.subr.bf16.mxu0 %v10541_v24  ;;  %v10606_v21 = vld [vmem:[#allocation12 + $0xc0] ss:$28 sps:$4 sm:$0xff]   ;;  %v10609_v24 = vld [vmem:[#allocation12 + $0xf4] ss:$28 sps:$4 sm:$0xff]  }
 0x55f   :  { %7638 = vmatprep.subr.bf16.mxu1 %v10544_v37  ;;  %v10610_v37 = vld [vmem:[#allocation12 + $0x2b8] ss:$28 sps:$4 sm:$0xff]  }
 0x560   :  { %7456 = vmatmul.mubr.bf16.vlgmr.msra.gmra.mrb[24].mxu0 %v11492_v6 }
 0x561   :  { %7628 = vmatmul.mubr.bf16.vlgmr.msra.gmra.mrb[28].mxu1 %v11492_v6  ;;  %7467 = vmatpush1.bf16.msra.mxu0 %v10539_v38  ;;  %v10611_v38 = vld [vmem:[#allocation12 + $0xf8] ss:$28 sps:$4 sm:$0xff]  }
 0x562   :  { %7639 = vmatpush1.bf16.msra.mxu1 %v10542_v39  ;;  %7468 = vmatprep.subr.bf16.mxu0 %v10547_v40  ;;  %v10614_v39 = vld [vmem:[#allocation12 + $0x12c] ss:$28 sps:$4 sm:$0xff]  }
 0x563   :  { %7640 = vmatprep.subr.bf16.mxu1 %v10550_v41  ;;  %7498 = vmatprep.mubr.bf16.mxu0 %v11077_v20  ;;  %v10615_v40 = vld [vmem:[#allocation12 + $0x2f0] ss:$28 sps:$4 sm:$0xff]   ;;  %v10612_v41 = vld [vmem:[#allocation12 + $0x128] ss:$28 sps:$4 sm:$0xff]  }
 0x564   :  { %7670 = vmatprep.mubr.bf16.mxu1 %v11077_v20 }
 0x565   :  { %7469 = vmatpush1.bf16.msra.mxu0 %v10545_v42  ;;  %v10616_v42 = vld [vmem:[#allocation12 + $0x130] ss:$28 sps:$4 sm:$0xff]  }
 0x566   :  { %7641 = vmatpush1.bf16.msra.mxu1 %v10548_v54  ;;  %7470 = vmatprep.subr.bf16.mxu0 %v10553_v51  ;;  %v10619_v54 = vld [vmem:[#allocation12 + $0x164] ss:$28 sps:$4 sm:$0xff]  }
 0x567   :  { %7642 = vmatprep.subr.bf16.mxu1 %v10556_v45  ;;  %v10620_v51 = vld [vmem:[#allocation12 + $0x328] ss:$28 sps:$4 sm:$0xff]   ;;  %v10617_v45 = vld [vmem:[#allocation12 + $0x160] ss:$28 sps:$4 sm:$0xff]  }
 0x569   :  { %7471 = vmatpush1.bf16.msra.mxu0 %v10551_v46  ;;  %v10621_v46 = vld [vmem:[#allocation12 + $0x168] ss:$28 sps:$4 sm:$0xff]  }
 0x56a   :  { %7643 = vmatpush1.bf16.msra.mxu1 %v10554_v43  ;;  %7472 = vmatprep.subr.bf16.mxu0 %v10559_v48  ;;  %v10624_v43 = vld [vmem:[#allocation12 + $0x19c] ss:$28 sps:$4 sm:$0xff]  }
 0x56b   :  { %7644 = vmatprep.subr.bf16.mxu1 %v10562_v49  ;;  %v10625_v48 = vld [vmem:[#allocation12 + $0x360] ss:$28 sps:$4 sm:$0xff]   ;;  %v10622_v49 = vld [vmem:[#allocation12 + $0x198] ss:$28 sps:$4 sm:$0xff]  }
 0x56d   :  { %7473 = vmatpush1.bf16.msra.mxu0 %v10557_v53  ;;  %v10626_v53 = vld [vmem:[#allocation12 + $0x1a0] ss:$28 sps:$4 sm:$0xff]  }
 0x56e   :  { %7645 = vmatpush1.bf16.msra.mxu1 %v10560_v47  ;;  %7474 = vmatprep.subr.bf16.mxu0 %v10565_v56  ;;  %v10629_v47 = vld [vmem:[#allocation12 + $0x1d4] ss:$28 sps:$4 sm:$0xff]  }
 0x56f   :  { %7646 = vmatprep.subr.bf16.mxu1 %v10568_v58  ;;  %v10630_v56 = vld [vmem:[#allocation12 + $0x558] ss:$28 sps:$4 sm:$0xff]   ;;  %v10627_v58 = vld [vmem:[#allocation12 + $0x1d0] ss:$28 sps:$4 sm:$0xff]  }
 0x571   :  { %7475 = vmatpush1.bf16.msra.mxu0 %v10563_v52  ;;  %v10631_v52 = vld [vmem:[#allocation12 + $0x398] ss:$28 sps:$4 sm:$0xff]  }
 0x572   :  { %7647 = vmatpush1.bf16.msra.mxu1 %v10566_v61  ;;  %7476 = vmatprep.subr.bf16.mxu0 %v10571_v63  ;;  %v10634_v61 = vld [vmem:[#allocation12 + $0x20c] ss:$28 sps:$4 sm:$0xff]  }
 0x573   :  { %7648 = vmatprep.subr.bf16.mxu1 %v10574_v0  ;;  %v10635_v63 = vld [vmem:[#allocation12 + $0x590] ss:$28 sps:$4 sm:$0xff]   ;;  %v10632_v0 = vld [vmem:[#allocation12 + $0x208] ss:$28 sps:$4 sm:$0xff]  }
 0x575   :  { %7477 = vmatpush1.bf16.msra.mxu0 %v10569_v2  ;;  %v10636_v2 = vld [vmem:[#allocation12 + $0x3d0] ss:$28 sps:$4 sm:$0xff]  }
 0x576   :  { %7649 = vmatpush1.bf16.msra.mxu1 %v10572_v3  ;;  %7478 = vmatprep.subr.bf16.mxu0 %v10577_v5  ;;  %v10639_v3 = vld [vmem:[#allocation12 + $0x244] ss:$28 sps:$4 sm:$0xff]  }
 0x577   :  { %7650 = vmatprep.subr.bf16.mxu1 %v10580_v9  ;;  %v10640_v5 = vld [vmem:[#allocation12 + $0x5c8] ss:$28 sps:$4 sm:$0xff]   ;;  %v10637_v9 = vld [vmem:[#allocation12 + $0x240] ss:$28 sps:$4 sm:$0xff]  }
 0x579   :  { %7479 = vmatpush1.bf16.msra.mxu0 %v10575_v10  ;;  %v10641_v10 = vld [vmem:[#allocation12 + $0x408] ss:$28 sps:$4 sm:$0xff]  }
 0x57a   :  { %7651 = vmatpush1.bf16.msra.mxu1 %v10578_v14  ;;  %7480 = vmatprep.subr.bf16.mxu0 %v10583_v15  ;;  %v10644_v14 = vld [vmem:[#allocation12 + $0x27c] ss:$28 sps:$4 sm:$0xff]  }
 0x57b   :  { %7652 = vmatprep.subr.bf16.mxu1 %v10586_v16  ;;  %v10645_v15 = vld [vmem:[#allocation12 + $0x600] ss:$28 sps:$4 sm:$0xff]   ;;  %v10642_v16 = vld [vmem:[#allocation12 + $0x278] ss:$28 sps:$4 sm:$0xff]  }
 0x57d   :  { %7481 = vmatpush1.bf16.msra.mxu0 %v10581_v17  ;;  %v10646_v17 = vld [vmem:[#allocation12 + $0x440] ss:$28 sps:$4 sm:$0xff]  }
 0x57e   :  { %7653 = vmatpush1.bf16.msra.mxu1 %v10584_v19  ;;  %7681 = vmatprep.subr.bf16.mxu0 %v10589_v22  ;;  %v10649_v19 = vld [vmem:[#allocation12 + $0x2b4] ss:$28 sps:$4 sm:$0xff]  }
 0x57f   :  { %9171 = vmatprep.subr.bf16.mxu1 %v10590_v23  ;;  %v10650_v22 = vld [vmem:[#allocation12 + $0x638] ss:$28 sps:$4 sm:$0xff]   ;;  %v10647_v23 = vld [vmem:[#allocation12 + $0x2b0] ss:$28 sps:$4 sm:$0xff]  }
 0x580   :  { %7499 = vmatmul.mubr.bf16.vlgmr.msra.gmra.mrb[24].mxu0 %v11502_v60 }
 0x581   :  { %7671 = vmatmul.mubr.bf16.vlgmr.msra.gmra.mrb[28].mxu1 %v11502_v60  ;;  %7682 = vmatpush1.bf16.msra.mxu0 %v10587_v4  ;;  %v10651_v4 = vld [vmem:[#allocation12 + $0x478] ss:$28 sps:$4 sm:$0xff]  }
 0x582   :  { %7713 = vmatprep.mubr.bf16.mxu0 %v11472_v1  ;;  %9172 = vmatpush3.bf16.msra.mxu1 %v10591_v27  ;;  %v10654_v27 = vld [vmem:[#allocation12 + $0x2ec] ss:$28 sps:$4 sm:$0xff]  }
 0x583   :  { %7885 = vmatprep.mubr.bf16.mxu1 %v11472_v1  ;;  %7683 = vmatprep.subr.bf16.mxu0 %v10594_v50  ;;  %v10607_v1 = vld [vmem:[#allocation12 + $0xf0] ss:$28 sps:$4 sm:$0xff]  }
 0x584   :  { %9173 = vmatprep.subr.bf16.mxu1 %v10595_v7  ;;  %v10655_v50 = vld [vmem:[#allocation12 + $0x670] ss:$28 sps:$4 sm:$0xff]   ;;  %v10652_v7 = vld [vmem:[#allocation12 + $0x2e8] ss:$28 sps:$4 sm:$0xff]  }
 0x585   :  { %7684 = vmatpush1.bf16.msra.mxu0 %v10592_v29  ;;  %v10656_v29 = vld [vmem:[#allocation12 + $0x4b0] ss:$28 sps:$4 sm:$0xff]  }
 0x586   :  { %9174 = vmatpush3.bf16.msra.mxu1 %v10596_v30  ;;  %7685 = vmatprep.subr.bf16.mxu0 %v10599_v31  ;;  %v10659_v30 = vld [vmem:[#allocation12 + $0x324] ss:$28 sps:$4 sm:$0xff]  }
 0x587   :  { %9175 = vmatprep.subr.bf16.mxu1 %v10600_v33  ;;  %v10660_v31 = vld [vmem:[#allocation12 + $0x6a8] ss:$28 sps:$4 sm:$0xff]   ;;  %v10657_v33 = vld [vmem:[#allocation12 + $0x320] ss:$28 sps:$4 sm:$0xff]  }
 0x589   :  { %7686 = vmatpush1.bf16.msra.mxu0 %v10597_v12  ;;  %v10661_v12 = vld [vmem:[#allocation12 + $0x4e8] ss:$28 sps:$4 sm:$0xff]  }
 0x58a   :  { %9176 = vmatpush3.bf16.msra.mxu1 %v10601_v32  ;;  %7687 = vmatprep.subr.bf16.mxu0 %v10604_v34  ;;  %v10664_v32 = vld [vmem:[#allocation12 + $0x35c] ss:$28 sps:$4 sm:$0xff]  }
 0x58b   :  { %9177 = vmatprep.subr.bf16.mxu1 %v10605_v35  ;;  %v10665_v34 = vld [vmem:[#allocation12 + $0x6e0] ss:$28 sps:$4 sm:$0xff]   ;;  %v10662_v35 = vld [vmem:[#allocation12 + $0x358] ss:$28 sps:$4 sm:$0xff]  }
 0x58d   :  { %7688 = vmatpush1.bf16.msra.mxu0 %v10602_v36  ;;  %v10666_v36 = vld [vmem:[#allocation12 + $0x520] ss:$28 sps:$4 sm:$0xff]  }
 0x58e   :  { %9178 = vmatpush3.bf16.msra.mxu1 %v10606_v21  ;;  %7689 = vmatprep.subr.bf16.mxu0 %v10609_v24  ;;  %v10669_v21 = vld [vmem:[#allocation12 + $0x394] ss:$28 sps:$4 sm:$0xff]  }
 0x58f   :  { %9179 = vmatprep.subr.bf16.mxu1 %v10610_v37  ;;  %v10670_v24 = vld [vmem:[#allocation12 + $0x8d8] ss:$28 sps:$4 sm:$0xff]   ;;  %v10667_v37 = vld [vmem:[#allocation12 + $0x390] ss:$28 sps:$4 sm:$0xff]  }
 0x591   :  { %7690 = vmatpush1.bf16.msra.mxu0 %v10607_v1  ;;  %v10671_v1 = vld [vmem:[#allocation12 + $0x718] ss:$28 sps:$4 sm:$0xff]  }
 0x592   :  { %9180 = vmatpush3.bf16.msra.mxu1 %v10611_v38  ;;  %7691 = vmatprep.subr.bf16.mxu0 %v10614_v39  ;;  %v10674_v38 = vld [vmem:[#allocation12 + $0x3cc] ss:$28 sps:$4 sm:$0xff]  }
 0x593   :  { %9181 = vmatprep.subr.bf16.mxu1 %v10615_v40  ;;  %v10675_v39 = vld [vmem:[#allocation12 + $0x910] ss:$28 sps:$4 sm:$0xff]   ;;  %v10672_v40 = vld [vmem:[#allocation12 + $0x3c8] ss:$28 sps:$4 sm:$0xff]  }
 0x595   :  { %7692 = vmatpush1.bf16.msra.mxu0 %v10612_v41  ;;  %v10676_v41 = vld [vmem:[#allocation12 + $0x750] ss:$28 sps:$4 sm:$0xff]  }
 0x596   :  { %9182 = vmatpush3.bf16.msra.mxu1 %v10616_v42  ;;  %7693 = vmatprep.subr.bf16.mxu0 %v10619_v54  ;;  %v10679_v42 = vld [vmem:[#allocation12 + $0x404] ss:$28 sps:$4 sm:$0xff]  }
 0x597   :  { %9183 = vmatprep.subr.bf16.mxu1 %v10620_v51  ;;  %v10680_v54 = vld [vmem:[#allocation12 + $0x948] ss:$28 sps:$4 sm:$0xff]   ;;  %v10677_v51 = vld [vmem:[#allocation12 + $0x400] ss:$28 sps:$4 sm:$0xff]  }
 0x599   :  { %7694 = vmatpush1.bf16.msra.mxu0 %v10617_v45  ;;  %v10684_v45 = vld [vmem:[#allocation12 + $0x43c] ss:$28 sps:$4 sm:$0xff]  }
 0x59a   :  { %9184 = vmatpush3.bf16.msra.mxu1 %v10621_v46  ;;  %7695 = vmatprep.subr.bf16.mxu0 %v10624_v43  ;;  %v10685_v46 = vld [vmem:[#allocation12 + $0x980] ss:$28 sps:$4 sm:$0xff]   ;;  %v10682_v43 = vld [vmem:[#allocation12 + $0x438] ss:$28 sps:$4 sm:$0xff]  }
 0x59b   :  { %9185 = vmatprep.subr.bf16.mxu1 %v10625_v48  ;;  %v10689_v48 = vld [vmem:[#allocation12 + $0x474] ss:$28 sps:$4 sm:$0xff]  }
 0x59d   :  { %7696 = vmatpush1.bf16.msra.mxu0 %v10622_v49  ;;  %v10690_v49 = vld [vmem:[#allocation12 + $0x9b8] ss:$28 sps:$4 sm:$0xff]  }
 0x59e   :  { %9186 = vmatpush3.bf16.msra.mxu1 %v10626_v53  ;;  %7697 = vmatprep.subr.bf16.mxu0 %v10629_v47  ;;  %v10687_v53 = vld [vmem:[#allocation12 + $0x470] ss:$28 sps:$4 sm:$0xff]   ;;  %v10691_v47 = vld [vmem:[#allocation12 + $0x7f8] ss:$28 sps:$4 sm:$0xff]  }
 0x59f   :  { %9193 = vmatprep.subr.bf16.mxu1 %v10630_v56  ;;  %v10694_v56 = vld [vmem:[#allocation12 + $0x4ac] ss:$28 sps:$4 sm:$0xff]  }
 0x5a1   :  { %7886 = vmatmul.mubr.bf16.vlgmr.msra.gmra.mrb[32].mxu1 %v11470_v18  ;;  %7698 = vmatpush1.bf16.msra.mxu0 %v10627_v58  ;;  %v10695_v58 = vld [vmem:[#allocation12 + $0x9f0] ss:$28 sps:$4 sm:$0xff]  }
 0x5a2   :  { %9194 = vmatpush3.bf16.msra.mxu1 %v10631_v52  ;;  %7926 = vmatprep.mubr.bf16.mxu1 %v11484_v13  ;;  %v10692_v52 = vld [vmem:[#allocation12 + $0x4a8] ss:$28 sps:$4 sm:$0xff]  }
 0x5a3   :  { %7699 = vmatprep.subr.bf16.mxu0 %v10634_v61  ;;  %9195 = vmatprep.subr.bf16.mxu1 %v10635_v63  ;;  %v10696_v61 = vld [vmem:[#allocation12 + $0x830] ss:$28 sps:$4 sm:$0xff]   ;;  %v10699_v63 = vld [vmem:[#allocation12 + $0x4e4] ss:$28 sps:$4 sm:$0xff]  }
 0x5a5   :  { %7700 = vmatpush1.bf16.msra.mxu0 %v10632_v0  ;;  %v10700_v0 = vld [vmem:[#allocation12 + $0xa28] ss:$28 sps:$4 sm:$0xff]  }
 0x5a6   :  { %9196 = vmatpush3.bf16.msra.mxu1 %v10636_v2  ;;  %7701 = vmatprep.subr.bf16.mxu0 %v10639_v3  ;;  %v10697_v2 = vld [vmem:[#allocation12 + $0x4e0] ss:$28 sps:$4 sm:$0xff]   ;;  %v10701_v3 = vld [vmem:[#allocation12 + $0x868] ss:$28 sps:$4 sm:$0xff]  }
 0x5a7   :  { %9197 = vmatprep.subr.bf16.mxu1 %v10640_v5  ;;  %v10704_v5 = vld [vmem:[#allocation12 + $0x51c] ss:$28 sps:$4 sm:$0xff]  }
 0x5a9   :  { %7702 = vmatpush1.bf16.msra.mxu0 %v10637_v9  ;;  %v10705_v9 = vld [vmem:[#allocation12 + $0xa60] ss:$28 sps:$4 sm:$0xff]  }
 0x5aa   :  { %9198 = vmatpush3.bf16.msra.mxu1 %v10641_v10  ;;  %7703 = vmatprep.subr.bf16.mxu0 %v10644_v14  ;;  %v10702_v10 = vld [vmem:[#allocation12 + $0x518] ss:$28 sps:$4 sm:$0xff]   ;;  %v10706_v14 = vld [vmem:[#allocation12 + $0x8a0] ss:$28 sps:$4 sm:$0xff]  }
 0x5ab   :  { %9199 = vmatprep.subr.bf16.mxu1 %v10645_v15  ;;  %v10709_v15 = vld [vmem:[#allocation12 + $0x554] ss:$28 sps:$4 sm:$0xff]  }
 0x5ad   :  { %7704 = vmatpush1.bf16.msra.mxu0 %v10642_v16  ;;  %v10707_v16 = vld [vmem:[#allocation12 + $0x550] ss:$28 sps:$4 sm:$0xff]  }
 0x5ae   :  { %9200 = vmatpush3.bf16.msra.mxu1 %v10646_v17  ;;  %7705 = vmatprep.subr.bf16.mxu0 %v10649_v19  ;;  %v10710_v17 = vld [vmem:[#allocation12 + $0xa98] ss:$28 sps:$4 sm:$0xff]   ;;  %v10713_v19 = vld [vmem:[#allocation12 + $0x58c] ss:$28 sps:$4 sm:$0xff]  }
 0x5af   :  { %9201 = vmatprep.subr.bf16.mxu1 %v10650_v22  ;;  %v10711_v22 = vld [vmem:[#allocation12 + $0x588] ss:$28 sps:$4 sm:$0xff]  }
 0x5b1   :  { %7706 = vmatpush1.bf16.msra.mxu0 %v10647_v23  ;;  %v10714_v23 = vld [vmem:[#allocation12 + $0xad0] ss:$28 sps:$4 sm:$0xff]  }
 0x5b2   :  { %9202 = vmatpush3.bf16.msra.mxu1 %v10651_v4  ;;  %7707 = vmatprep.subr.bf16.mxu0 %v10654_v27  ;;  %v10717_v4 = vld [vmem:[#allocation12 + $0x5c4] ss:$28 sps:$4 sm:$0xff]  }
 0x5b3   :  { %9203 = vmatprep.subr.bf16.mxu1 %v10655_v50  ;;  %v10715_v27 = vld [vmem:[#allocation12 + $0x5c0] ss:$28 sps:$4 sm:$0xff]   ;;  %v10718_v50 = vld [vmem:[#allocation12 + $0xb08] ss:$28 sps:$4 sm:$0xff]  }
 0x5b5   :  { %7708 = vmatpush1.bf16.msra.mxu0 %v10652_v7  ;;  %v10721_v7 = vld [vmem:[#allocation12 + $0x5fc] ss:$28 sps:$4 sm:$0xff]  }
 0x5b6   :  { %9204 = vmatpush3.bf16.msra.mxu1 %v10656_v29  ;;  %7709 = vmatprep.subr.bf16.mxu0 %v10659_v30  ;;  %v10719_v29 = vld [vmem:[#allocation12 + $0x5f8] ss:$28 sps:$4 sm:$0xff]   ;;  %v10722_v30 = vld [vmem:[#allocation12 + $0xb40] ss:$28 sps:$4 sm:$0xff]  }
 0x5b7   :  { %9205 = vmatprep.subr.bf16.mxu1 %v10660_v31  ;;  %v10725_v31 = vld [vmem:[#allocation12 + $0x634] ss:$28 sps:$4 sm:$0xff]  }
 0x5b9   :  { %7710 = vmatpush1.bf16.msra.mxu0 %v10657_v33  ;;  %v10723_v33 = vld [vmem:[#allocation12 + $0x630] ss:$28 sps:$4 sm:$0xff]  }
 0x5ba   :  { %9206 = vmatpush3.bf16.msra.mxu1 %v10661_v12  ;;  %7711 = vmatprep.subr.bf16.mxu0 %v10664_v32  ;;  %v10726_v12 = vld [vmem:[#allocation12 + $0xb78] ss:$28 sps:$4 sm:$0xff]   ;;  %v10729_v32 = vld [vmem:[#allocation12 + $0x66c] ss:$28 sps:$4 sm:$0xff]  }
 0x5bb   :  { %9207 = vmatprep.subr.bf16.mxu1 %v10665_v34  ;;  %v10727_v34 = vld [vmem:[#allocation12 + $0x668] ss:$28 sps:$4 sm:$0xff]  }
 0x5bd   :  { %7712 = vmatpush1.bf16.msra.mxu0 %v10662_v35  ;;  %v10730_v35 = vld [vmem:[#allocation12 + $0xbb0] ss:$28 sps:$4 sm:$0xff]  }
 0x5be   :  { %9208 = vmatpush3.bf16.msra.mxu1 %v10666_v36  ;;  %7724 = vmatprep.subr.bf16.mxu0 %v10669_v21  ;;  %v10733_v36 = vld [vmem:[#allocation12 + $0x6a4] ss:$28 sps:$4 sm:$0xff]  }
 0x5bf   :  { %9215 = vmatprep.subr.bf16.mxu1 %v10670_v24  ;;  %v10731_v21 = vld [vmem:[#allocation12 + $0x6a0] ss:$28 sps:$4 sm:$0xff]   ;;  %v10734_v24 = vld [vmem:[#allocation12 + $0xbe8] ss:$28 sps:$4 sm:$0xff]  }
 0x5c0   :  { %7714 = vmatmul.mubr.bf16.vlgmr.msra.gmra.mrb[28].mxu0 %v11470_v18  ;;  %v10681_v18 = vld [vmem:[#allocation12 + $0x788] ss:$28 sps:$4 sm:$0xff]  }
 0x5c1   :  { %7927 = vmatmul.mubr.bf16.vlgmr.msra.gmra.mrb[36].mxu1 %v11482_v11  ;;  %7725 = vmatpush1.bf16.msra.mxu0 %v10667_v37  ;;  %v10737_v37 = vld [vmem:[#allocation12 + $0x6dc] ss:$28 sps:$4 sm:$0xff]  }
 0x5c2   :  { %7756 = vmatprep.mubr.bf16.mxu0 %v11484_v13  ;;  %9216 = vmatpush3.bf16.msra.mxu1 %v10671_v1  ;;  %v10686_v13 = vld [vmem:[#allocation12 + $0x7c0] ss:$28 sps:$4 sm:$0xff]   ;;  %v10735_v1 = vld [vmem:[#allocation12 + $0x6d8] ss:$28 sps:$4 sm:$0xff]  }
 0x5c3   :  { %7967 = vmatprep.mubr.bf16.mxu1 %v11494_v8  ;;  %7726 = vmatprep.subr.bf16.mxu0 %v10674_v38  ;;  %v10738_v38 = vld [vmem:[#allocation12 + $0xc20] ss:$28 sps:$4 sm:$0xff]  }
 0x5c4   :  { %9217 = vmatprep.subr.bf16.mxu1 %v10675_v39  ;;  %v10741_v39 = vld [vmem:[#allocation12 + $0x714] ss:$28 sps:$4 sm:$0xff]  }
 0x5c5   :  { %7727 = vmatpush1.bf16.msra.mxu0 %v10672_v40  ;;  %v10739_v40 = vld [vmem:[#allocation12 + $0x710] ss:$28 sps:$4 sm:$0xff]  }
 0x5c6   :  { %9218 = vmatpush3.bf16.msra.mxu1 %v10676_v41  ;;  %7728 = vmatprep.subr.bf16.mxu0 %v10679_v42  ;;  %v10744_v41 = vld [vmem:[#allocation12 + $0x74c] ss:$28 sps:$4 sm:$0xff]  }
 0x5c7   :  { %9219 = vmatprep.subr.bf16.mxu1 %v10680_v54  ;;  %v10742_v42 = vld [vmem:[#allocation12 + $0x748] ss:$28 sps:$4 sm:$0xff]  }
 0x5c8   :  { %v10747_v54 = vld [vmem:[#allocation12 + $0x784] ss:$28 sps:$4 sm:$0xff]  }
 0x5c9   :  { %7729 = vmatpush1.bf16.msra.mxu0 %v10677_v51  ;;  %v10745_v51 = vld [vmem:[#allocation12 + $0x780] ss:$28 sps:$4 sm:$0xff]  }
 0x5ca   :  { %9220 = vmatpush3.bf16.msra.mxu1 %v10681_v18  ;;  %7730 = vmatprep.subr.bf16.mxu0 %v10684_v45  ;;  %v10750_v18 = vld [vmem:[#allocation12 + $0x7bc] ss:$28 sps:$4 sm:$0xff]   ;;  %v10753_v45 = vld [vmem:[#allocation12 + $0x7f4] ss:$28 sps:$4 sm:$0xff]  }
 0x5cb   :  { %9221 = vmatprep.subr.bf16.mxu1 %v10685_v46  ;;  %v10751_v46 = vld [vmem:[#allocation12 + $0x7f0] ss:$28 sps:$4 sm:$0xff]  }
 0x5cd   :  { %7731 = vmatpush1.bf16.msra.mxu0 %v10682_v43  ;;  %v10754_v43 = vld [vmem:[#allocation12 + $0x828] ss:$28 sps:$4 sm:$0xff]  }
 0x5ce   :  { %9222 = vmatpush3.bf16.msra.mxu1 %v10686_v13  ;;  %7732 = vmatprep.subr.bf16.mxu0 %v10689_v48  ;;  %v10759_v13 = vld [vmem:[#allocation12 + $0x864] ss:$28 sps:$4 sm:$0xff]   ;;  %v10762_v48 = vld [vmem:[#allocation12 + $0x89c] ss:$28 sps:$4 sm:$0xff]  }
 0x5cf   :  { %9223 = vmatprep.subr.bf16.mxu1 %v10690_v49  ;;  %v10760_v49 = vld [vmem:[#allocation12 + $0x898] ss:$28 sps:$4 sm:$0xff]  }
 0x5d1   :  { %7733 = vmatpush1.bf16.msra.mxu0 %v10687_v53  ;;  %v10765_v53 = vld [vmem:[#allocation12 + $0x8d4] ss:$28 sps:$4 sm:$0xff]  }
 0x5d2   :  { %9224 = vmatpush3.bf16.msra.mxu1 %v10691_v47  ;;  %7734 = vmatprep.subr.bf16.mxu0 %v10694_v56  ;;  %v10763_v47 = vld [vmem:[#allocation12 + $0x8d0] ss:$28 sps:$4 sm:$0xff]  }
 0x5d3   :  { %9225 = vmatprep.subr.bf16.mxu1 %v10695_v58  ;;  %v10768_v56 = vld [vmem:[#allocation12 + $0x90c] ss:$28 sps:$4 sm:$0xff]  }
 0x5d4   :  { %v10766_v58 = vld [vmem:[#allocation12 + $0x908] ss:$28 sps:$4 sm:$0xff]  }
 0x5d5   :  { %7735 = vmatpush1.bf16.msra.mxu0 %v10692_v52  ;;  %v10771_v52 = vld [vmem:[#allocation12 + $0x944] ss:$28 sps:$4 sm:$0xff]  }
 0x5d6   :  { %9226 = vmatpush3.bf16.msra.mxu1 %v10696_v61  ;;  %7736 = vmatprep.subr.bf16.mxu0 %v10699_v63  ;;  %v10769_v61 = vld [vmem:[#allocation12 + $0x940] ss:$28 sps:$4 sm:$0xff]  }
 0x5d7   :  { %9227 = vmatprep.subr.bf16.mxu1 %v10700_v0  ;;  %v10774_v63 = vld [vmem:[#allocation12 + $0x97c] ss:$28 sps:$4 sm:$0xff]  }
 0x5d8   :  { %v10772_v0 = vld [vmem:[#allocation12 + $0x978] ss:$28 sps:$4 sm:$0xff]  }
 0x5d9   :  { %7737 = vmatpush1.bf16.msra.mxu0 %v10697_v2  ;;  %v10777_v2 = vld [vmem:[#allocation12 + $0x9b4] ss:$28 sps:$4 sm:$0xff]  }
 0x5da   :  { %9228 = vmatpush3.bf16.msra.mxu1 %v10701_v3  ;;  %7738 = vmatprep.subr.bf16.mxu0 %v10704_v5  ;;  %v10775_v3 = vld [vmem:[#allocation12 + $0x9b0] ss:$28 sps:$4 sm:$0xff]  }
 0x5db   :  { %9229 = vmatprep.subr.bf16.mxu1 %v10705_v9  ;;  %v10780_v5 = vld [vmem:[#allocation12 + $0x9ec] ss:$28 sps:$4 sm:$0xff]  }
 0x5dc   :  { %v10778_v9 = vld [vmem:[#allocation12 + $0x9e8] ss:$28 sps:$4 sm:$0xff]  }
 0x5dd   :  { %7739 = vmatpush1.bf16.msra.mxu0 %v10702_v10  ;;  %v10783_v10 = vld [vmem:[#allocation12 + $0xa24] ss:$28 sps:$4 sm:$0xff]  }
 0x5de   :  { %9230 = vmatpush3.bf16.msra.mxu1 %v10706_v14  ;;  %7740 = vmatprep.subr.bf16.mxu0 %v10709_v15  ;;  %v10781_v14 = vld [vmem:[#allocation12 + $0xa20] ss:$28 sps:$4 sm:$0xff]  }
 0x5df   :  { %9286 = vmatprep.subr.bf16.mxu1 %v11078_v62  ;;  %v10786_v15 = vld [vmem:[#allocation12 + $0xa5c] ss:$28 sps:$4 sm:$0xff]  }
 0x5e1   :  { %7968 = vmatmul.mubr.bf16.vlgmr.msra.gmra.mrb[40].mxu1 %v11492_v6  ;;  %7741 = vmatpush1.bf16.msra.mxu0 %v10707_v16  ;;  %v10784_v16 = vld [vmem:[#allocation12 + $0xa58] ss:$28 sps:$4 sm:$0xff]  }
 0x5e2   :  { %9287 = vmatpush3.bf16.msra.mxu1 %v10710_v17  ;;  %7742 = vmatprep.subr.bf16.mxu0 %v10713_v19  ;;  %v10789_v17 = vld [vmem:[#allocation12 + $0xa94] ss:$28 sps:$4 sm:$0xff]  }
 0x5e3   :  { %9288 = vmatprep.subr.bf16.mxu1 %v11078_v62  ;;  %9302 = vmatprep.mubr.msk.bf16.mxu1 %vm11079_vm0, %v11078_v62  ;;  %v10787_v19 = vld [vmem:[#allocation12 + $0xa90] ss:$28 sps:$4 sm:$0xff]  }
 0x5e5   :  { %7743 = vmatpush1.bf16.msra.mxu0 %v10711_v22  ;;  %v10792_v22 = vld [vmem:[#allocation12 + $0xacc] ss:$28 sps:$4 sm:$0xff]  }
 0x5e6   :  { %9289 = vmatpush3.bf16.msra.mxu1 %v10714_v23  ;;  %7744 = vmatprep.subr.bf16.mxu0 %v10717_v4  ;;  %v10790_v23 = vld [vmem:[#allocation12 + $0xac8] ss:$28 sps:$4 sm:$0xff]  }
 0x5e7   :  { %9290 = vmatprep.subr.bf16.mxu1 %v11078_v62  ;;  %v10795_v4 = vld [vmem:[#allocation12 + $0xb04] ss:$28 sps:$4 sm:$0xff]  }
 0x5e9   :  { %7745 = vmatpush1.bf16.msra.mxu0 %v10715_v27  ;;  %v10793_v27 = vld [vmem:[#allocation12 + $0xb00] ss:$28 sps:$4 sm:$0xff]  }
 0x5ea   :  { %9291 = vmatpush3.bf16.msra.mxu1 %v10718_v50  ;;  %7746 = vmatprep.subr.bf16.mxu0 %v10721_v7  ;;  %v10798_v50 = vld [vmem:[#allocation12 + $0xb3c] ss:$28 sps:$4 sm:$0xff]  }
 0x5eb   :  { %9292 = vmatprep.subr.bf16.mxu1 %v11078_v62  ;;  %v10796_v7 = vld [vmem:[#allocation12 + $0xb38] ss:$28 sps:$4 sm:$0xff]  }
 0x5ed   :  { %7747 = vmatpush1.bf16.msra.mxu0 %v10719_v29  ;;  %v10801_v29 = vld [vmem:[#allocation12 + $0xb74] ss:$28 sps:$4 sm:$0xff]  }
 0x5ee   :  { %9293 = vmatpush3.bf16.msra.mxu1 %v10722_v30  ;;  %7748 = vmatprep.subr.bf16.mxu0 %v10725_v31  ;;  %v10799_v30 = vld [vmem:[#allocation12 + $0xb70] ss:$28 sps:$4 sm:$0xff]   ;;  %v11534_v31 = vld [vmem:[#allocation13] sm:$0xff] }
 0x5ef   :  { %9294 = vmatprep.subr.bf16.mxu1 %v11078_v62 }
 0x5f1   :  { %7749 = vmatpush1.bf16.msra.mxu0 %v10723_v33  ;;  %v5289_v33 = vrot.slane %v11534_v31, %v11363_v26 }
 0x5f2   :  { %9295 = vmatpush3.bf16.msra.mxu1 %v10726_v12  ;;  %7750 = vmatprep.subr.bf16.mxu0 %v10729_v32  ;;  %v5293_v12 = vrot.slane %v11534_v31, %v11366_v44  ;;  %v10802_v32 = vld [vmem:[#allocation12 + $0xba8] ss:$28 sps:$4 sm:$0xff]  }
 0x5f3   :  { %9296 = vmatprep.subr.bf16.mxu1 %v11078_v62 }
 0x5f5   :  { %7751 = vmatpush1.bf16.msra.mxu0 %v10727_v34  ;;  %v5301_v34 = vrot.slane %v11534_v31, %v11396_v55 }
 0x5f6   :  { %9297 = vmatpush3.bf16.msra.mxu1 %v10730_v35  ;;  %7752 = vmatprep.subr.bf16.mxu0 %v10733_v36  ;;  %v10807_v35 = vld [vmem:[#allocation12 + $0xbe4] ss:$28 sps:$4 sm:$0xff]  }
 0x5f7   :  { %9298 = vmatprep.subr.bf16.mxu1 %v11078_v62 }
 0x5f9   :  { %7753 = vmatpush1.bf16.msra.mxu0 %v10731_v21 }
 0x5fa   :  { %9299 = vmatpush3.bf16.msra.mxu1 %v10734_v24  ;;  %7754 = vmatprep.subr.bf16.mxu0 %v10737_v37 }
 0x5fb   :  { %9300 = vmatprep.subr.bf16.mxu1 %v11078_v62  ;;  %v10748_v62 = vld [vmem:[#allocation12 + $0x7b8] ss:$28 sps:$4 sm:$0xff]  }
 0x5fd   :  { %7755 = vmatpush1.bf16.msra.mxu0 %v10735_v1 }
 0x5fe   :  { %9301 = vmatpush3.bf16.msra.mxu1 %v10738_v38  ;;  %7767 = vmatprep.subr.bf16.mxu0 %v10741_v39 }
 0x600   :  { %7757 = vmatmul.mubr.bf16.vlgmr.msra.gmra.mrb[28].mxu0 %v11482_v11  ;;  %v10756_v11 = vld [vmem:[#allocation12 + $0x82c] ss:$28 sps:$4 sm:$0xff]  }
 0x601   :  { %9303 = vmatmul.mubr.bf16.vlgmr.msra.gmra.mrb[44].mxu1 %v11502_v60  ;;  %7768 = vmatpush1.bf16.msra.mxu0 %v10739_v40  ;;  %v10805_v40 = vld [vmem:[#allocation12 + $0xbe0] ss:$28 sps:$4 sm:$0xff]  }
 0x602   :  { %7799 = vmatprep.mubr.bf16.mxu0 %v11494_v8  ;;  %7769 = vmatprep.subr.bf16.mxu0 %v10744_v41  ;;  %v10757_v8 = vld [vmem:[#allocation12 + $0x860] ss:$28 sps:$4 sm:$0xff]  }
 0x605   :  { %7770 = vmatpush1.bf16.msra.mxu0 %v10742_v42 }
 0x606   :  { %7771 = vmatprep.subr.bf16.mxu0 %v10747_v54 }
 0x609   :  { %7772 = vmatpush1.bf16.msra.mxu0 %v10745_v51  ;;  %v10810_v51 = vld [vmem:[#allocation12 + $0xc1c] ss:$28 sps:$4 sm:$0xff]  }
 0x60a   :  { %7773 = vmatprep.subr.bf16.mxu0 %v10750_v18 }
 0x60d   :  { %7774 = vmatpush1.bf16.msra.mxu0 %v10748_v62 }
 0x60e   :  { %7775 = vmatprep.subr.bf16.mxu0 %v10753_v45 }
 0x611   :  { %7776 = vmatpush1.bf16.msra.mxu0 %v10751_v46 }
 0x612   :  { %7777 = vmatprep.subr.bf16.mxu0 %v10756_v11 }
 0x615   :  { %7778 = vmatpush1.bf16.msra.mxu0 %v10754_v43 }
 0x616   :  { %7779 = vmatprep.subr.bf16.mxu0 %v10759_v13 }
 0x619   :  { %7780 = vmatpush1.bf16.msra.mxu0 %v10757_v8 }
 0x61a   :  { %7781 = vmatprep.subr.bf16.mxu0 %v10762_v48  ;;  %v10808_v48 = vld [vmem:[#allocation12 + $0xc18] ss:$28 sps:$4 sm:$0xff]  }
 0x61d   :  { %7782 = vmatpush1.bf16.msra.mxu0 %v10760_v49 }
 0x61e   :  { %7783 = vmatprep.subr.bf16.mxu0 %v10765_v53 }
 0x621   :  { %7784 = vmatpush1.bf16.msra.mxu0 %v10763_v47 }
 0x622   :  { %7785 = vmatprep.subr.bf16.mxu0 %v10768_v56 }
 0x625   :  { %7786 = vmatpush1.bf16.msra.mxu0 %v10766_v58 }
 0x626   :  { %7787 = vmatprep.subr.bf16.mxu0 %v10771_v52 }
 0x629   :  { %7788 = vmatpush1.bf16.msra.mxu0 %v10769_v61 }
 0x62a   :  { %7789 = vmatprep.subr.bf16.mxu0 %v10774_v63 }
 0x62d   :  { %7790 = vmatpush1.bf16.msra.mxu0 %v10772_v0 }
 0x62e   :  { %7791 = vmatprep.subr.bf16.mxu0 %v10777_v2 }
 0x631   :  { %7792 = vmatpush1.bf16.msra.mxu0 %v10775_v3 }
 0x632   :  { %7793 = vmatprep.subr.bf16.mxu0 %v10780_v5 }
 0x635   :  { %7794 = vmatpush1.bf16.msra.mxu0 %v10778_v9 }
 0x636   :  { %7795 = vmatprep.subr.bf16.mxu0 %v10783_v10 }
 0x639   :  { %7796 = vmatpush1.bf16.msra.mxu0 %v10781_v14 }
 0x63a   :  { %7797 = vmatprep.subr.bf16.mxu0 %v10786_v15 }
 0x63d   :  { %7798 = vmatpush1.bf16.msra.mxu0 %v10784_v16 }
 0x63e   :  { %7810 = vmatprep.subr.bf16.mxu0 %v10789_v17 }
 0x640   :  { %7800 = vmatmul.mubr.bf16.vlgmr.msra.gmra.mrb[28].mxu0 %v11492_v6  ;;  %v10804_v6 = vld [vmem:[#allocation12 + $0xbac] ss:$28 sps:$4 sm:$0xff]  }
 0x641   :  { %7811 = vmatpush1.bf16.msra.mxu0 %v10787_v19  ;;  %7842 = vmatprep.mubr.bf16.mxu0 %v11077_v20  ;;  %v5297_v20 = vrot.slane %v11534_v31, %v11393_v59 }
 0x642   :  { %7812 = vmatprep.subr.bf16.mxu0 %v10792_v22 }
 0x645   :  { %7813 = vmatpush1.bf16.msra.mxu0 %v10790_v23 }
 0x646   :  { %7814 = vmatprep.subr.bf16.mxu0 %v10795_v4 }
 0x649   :  { %7815 = vmatpush1.bf16.msra.mxu0 %v10793_v27 }
 0x64a   :  { %7816 = vmatprep.subr.bf16.mxu0 %v10798_v50 }
 0x64d   :  { %7817 = vmatpush1.bf16.msra.mxu0 %v10796_v7 }
 0x64e   :  { %7818 = vmatprep.subr.bf16.mxu0 %v10801_v29 }
 0x651   :  { %7819 = vmatpush1.bf16.msra.mxu0 %v10799_v30 }
 0x652   :  { %7820 = vmatprep.subr.bf16.mxu0 %v10804_v6 }
 0x653   :  { %v7500_v36 = vpop.f32.mrb[24].mxu0 }
 0x654   :  { %v9326_v21 = vadd.f32 %v7500_v36, %v5289_v33  ;;  %v7672_v24 = vpop.f32.mrb[28].mxu1  ;;  %v7502_v37 = vpop.f32.mrb[25].mxu0 }
 0x655   :  { %v9330_v1 = vadd.f32 %v7672_v24, %v5297_v20  ;;  %v9327_v38 = vadd.f32 %v7502_v37, %v5293_v12  ;;  %v7674_v26 = vpop.f32.mrb[29].mxu1  ;;  %v7504_v39 = vpop.f32.mrb[26].mxu0  ;;  %7821 = vmatpush1.bf16.msra.mxu0 %v10802_v32 }
 0x656   :  { %v8017_v59 = vsub.f32 0.0, %v9326_v21  ;;  %v9331_v41 = vadd.f32 %v7674_v26, %v5301_v34  ;;  %v9328_v42 = vadd.f32 %v7504_v39, %v5289_v33  ;;  %v7676_v44 = vpop.f32.mrb[30].mxu1  ;;  %v7506_v54 = vpop.f32.mrb[27].mxu0  ;;  %7822 = vmatprep.subr.bf16.mxu0 %v10807_v35 }
 0x657   :  { %v8019_v55 = vsub.f32 0.0, %v9330_v1  ;;  %v8018_v18 = vsub.f32 0.0, %v9327_v38  ;;  %v9332_v62 = vadd.f32 %v7676_v44, %v5297_v20  ;;  %v9329_v45 = vadd.f32 %v7506_v54, %v5293_v12  ;;  %v7678_v46 = vpop.f32.mrb[31].mxu1 }
 0x658   :  { %v8031_v11 = vmul.f32 1.442695, %v8017_v59  ;;  %v8020_v43 = vsub.f32 0.0, %v9331_v41  ;;  %v8024_v13 = vsub.f32 0.0, %v9328_v42  ;;  %v9333_v8 = vadd.f32 %v7678_v46, %v5301_v34 }
 0x659   :  { %v8035_v49 = vmul.f32 1.442695, %v8019_v55  ;;  %v8033_v53 = vmul.f32 1.442695, %v8018_v18  ;;  %v8026_v47 = vsub.f32 0.0, %v9332_v62  ;;  %v8025_v56 = vsub.f32 0.0, %v9329_v45  ;;  %7823 = vmatpush1.bf16.msra.mxu0 %v10805_v40 }
 0x65a   :  { %10815 = vpow2.f32 %v8031_v11  ;;  %v8037_v58 = vmul.f32 1.442695, %v8020_v43  ;;  %v8045_v52 = vmul.f32 1.442695, %v8024_v13  ;;  %v8027_v61 = vsub.f32 0.0, %v9333_v8  ;;  %7824 = vmatprep.subr.bf16.mxu0 %v10810_v51 }
 0x65b   :  { %10817 = vpow2.f32 %v8035_v49  ;;  %v8049_v63 = vmul.f32 1.442695, %v8026_v47  ;;  %v8047_v0 = vmul.f32 1.442695, %v8025_v56  ;;  %v5313_v38 = vrot.slane %v11534_v31, %v11405_v57 }
 0x65c   :  { %10819 = vpow2.f32 %v8033_v53  ;;  %v8051_v2 = vmul.f32 1.442695, %v8027_v61 }
 0x65d   :  { %10821 = vpow2.f32 %v8037_v58  ;;  %7825 = vmatpush1.bf16.msra.mxu0 %v10808_v48 }
 0x65e   :  { %10823 = vpow2.f32 %v8045_v52 }
 0x65f   :  { %10825 = vpow2.f32 %v8049_v63 }
 0x660   :  { %10827 = vpow2.f32 %v8047_v0  ;;  %7843 = vmatmul.mubr.bf16.vlgmr.msra.gmra.mrb[28].mxu0 %v11502_v60 }
 0x661   :  { %10829 = vpow2.f32 %v8051_v2 }
 0x664   :  { %v10816_v3 = vpop.eup %10815 }
 0x665   :  { %v10818_v5 = vpop.eup %10817  ;;  %v8059_v9 = vadd.f32 1.0, %v10816_v3 }
 0x666   :  { %v10820_v10 = vpop.eup %10819  ;;  %v8061_v14 = vadd.f32 1.0, %v10818_v5 }
 0x667   :  { %v10822_v15 = vpop.eup %10821  ;;  %10831 = vrcp.f32 %v8059_v9  ;;  %v8060_v16 = vadd.f32 1.0, %v10820_v10 }
 0x668   :  { %v10824_v17 = vpop.eup %10823  ;;  %10833 = vrcp.f32 %v8061_v14  ;;  %v8062_v19 = vadd.f32 1.0, %v10822_v15  ;;  %v5305_v14 = vrot.slane %v11534_v31, %v11410_v25  ;;  %v5309_v15 = vrot.slane %v11534_v31, %v11413_v28 }
 0x669   :  { %v10826_v22 = vpop.eup %10825  ;;  %10835 = vrcp.f32 %v8060_v16  ;;  %v8066_v23 = vadd.f32 1.0, %v10824_v17 }
 0x66a   :  { %v10828_v4 = vpop.eup %10827  ;;  %10837 = vrcp.f32 %v8062_v19  ;;  %v8068_v27 = vadd.f32 1.0, %v10826_v22 }
 0x66b   :  { %v10830_v50 = vpop.eup %10829  ;;  %10839 = vrcp.f32 %v8066_v23  ;;  %v8067_v60 = vadd.f32 1.0, %v10828_v4 }
 0x66c   :  { %10841 = vrcp.f32 %v8068_v27  ;;  %v8069_v7 = vadd.f32 1.0, %v10830_v50 }
 0x66d   :  { %10843 = vrcp.f32 %v8067_v60 }
 0x66e   :  { %10845 = vrcp.f32 %v8069_v7 }
 0x671   :  { %v10832_v29 = vpop.eup %10831 }
 0x672   :  { %v10834_v30 = vpop.eup %10833  ;;  %8087 = vst [vmem:[%s11603_s10] sm:$0xff] %v10832_v29 }
 0x673   :  { %v10836_v6 = vpop.eup %10835  ;;  %8089 = vst [vmem:[%s11603_s10 + $0x10] sm:$0xff] %v10834_v30 }
 0x674   :  { %v10838_v33 = vpop.eup %10837  ;;  %8088 = vst [vmem:[%s11603_s10 + $0x8] sm:$0xff] %v10836_v6  ;;  %v9187_v20 = vpop.f32.mrb[32].mxu1 }
 0x675   :  { %v10840_v12 = vpop.eup %10839  ;;  %8090 = vst [vmem:[%s11603_s10 + $0x18] sm:$0xff] %v10838_v33  ;;  %v9188_v32 = vpop.f32.mrb[33].mxu1 }
 0x676   :  { %v10842_v34 = vpop.eup %10841  ;;  %8094 = vst [vmem:[%s11603_s10 + $0x38] sm:$0xff] %v10840_v12  ;;  %v9189_v35 = vadd.f32 %v9188_v32, %v9187_v20  ;;  %v9190_v36 = vpop.f32.mrb[34].mxu1 }
 0x677   :  { %v10844_v21 = vpop.eup %10843  ;;  %8096 = vst [vmem:[%s11603_s10 + $0x48] sm:$0xff] %v10842_v34  ;;  %v9191_v24 = vpop.f32.mrb[35].mxu1 }
 0x678   :  { %v10846_v37 = vpop.eup %10845  ;;  %8095 = vst [vmem:[%s11603_s10 + $0x40] sm:$0xff] %v10844_v21  ;;  %v9192_v1 = vadd.f32 %v9191_v24, %v9190_v36  ;;  %v7888_v40 = vadd.f32 %v9189_v35, %v5313_v38 }
 0x679   :  { %8097 = vst [vmem:[%s11603_s10 + $0x50] sm:$0xff] %v10846_v37 }
 0x67a   :  { %v7891_v44 = vadd.f32 %v9192_v1, %v5313_v38 }
 0x694   :  { %v9209_v26 = vpop.f32.mrb[36].mxu1 }
 0x695   :  { %v9210_v39 = vpop.f32.mrb[37].mxu1 }
 0x696   :  { %v9211_v59 = vadd.f32 %v9210_v39, %v9209_v26  ;;  %v9212_v41 = vpop.f32.mrb[38].mxu1 }
 0x697   :  { %v9213_v42 = vpop.f32.mrb[39].mxu1 }
 0x698   :  { %v7929_v54 = vadd.f32 %v9211_v59, %v7888_v40  ;;  %v9214_v51 = vadd.f32 %v9213_v42, %v9212_v41 }
 0x69a   :  { %v7932_v55 = vadd.f32 %v9214_v51, %v7891_v44 }
 0x6b4   :  { %v9231_v18 = vpop.f32.mrb[40].mxu1 }
 0x6b5   :  { %v9232_v62 = vpop.f32.mrb[41].mxu1 }
 0x6b6   :  { %v9233_v45 = vadd.f32 %v9232_v62, %v9231_v18  ;;  %v9234_v46 = vpop.f32.mrb[42].mxu1 }
 0x6b7   :  { %v9235_v11 = vpop.f32.mrb[43].mxu1 }
 0x6b8   :  { %v9236_v43 = vadd.f32 %v9235_v11, %v9234_v46  ;;  %v7970_v13 = vadd.f32 %v9233_v45, %v7929_v54 }
 0x6ba   :  { %v7973_v8 = vadd.f32 %v9236_v43, %v7932_v55 }
 0x6d4   :  { %v8010_v48 = vpop.f32.mrb[44].mxu1 }
 0x6d5   :  { %v8011_v57 = vadd.f32 %v8010_v48, %v7970_v13  ;;  %v9304_v49 = vpop.f32.mrb[45].mxu1 }
 0x6d6   :  { %v8013_v53 = vpop.f32.mrb[46].mxu1 }
 0x6d7   :  { %v8023_v47 = vsub.f32 0.0, %v8011_v57  ;;  %v8014_v56 = vadd.f32 %v8013_v53, %v7973_v8  ;;  %v9305_v58 = vpop.f32.mrb[47].mxu1 }
 0x6d9   :  { %v8043_v52 = vmul.f32 1.442695, %v8023_v47  ;;  %v8030_v61 = vsub.f32 0.0, %v8014_v56 }
 0x6db   :  { %10847 = vpow2.f32 %v8043_v52  ;;  %v8057_v63 = vmul.f32 1.442695, %v8030_v61 }
 0x6dd   :  { %10849 = vpow2.f32 %v8057_v63 }
 0x6e5   :  { %v10848_v0 = vpop.eup %10847 }
 0x6e6   :  { %v8065_v2 = vadd.f32 1.0, %v10848_v0 }
 0x6e7   :  { %v10850_v3 = vpop.eup %10849 }
 0x6e8   :  { %10851 = vrcp.f32 %v8065_v2  ;;  %v8072_v5 = vadd.f32 1.0, %v10850_v3 }
 0x6ea   :  { %10853 = vrcp.f32 %v8072_v5 }
 0x6f2   :  { %v10852_v9 = vpop.eup %10851 }
 0x6f3   :  { %8093 = vst [vmem:[%s11603_s10 + $0x30] sm:$0xff] %v10852_v9 }
 0x6f4   :  { %v10854_v10 = vpop.eup %10853 }
 0x6f5   :  { %8100 = vst [vmem:[%s11603_s10 + $0x68] sm:$0xff] %v10854_v10 }
 0x733   :  { %v7844_v16 = vpop.f32.mrb[28].mxu0 }
 0x734   :  { %v9334_v17 = vadd.f32 %v7844_v16, %v5305_v14  ;;  %v7846_v19 = vpop.f32.mrb[29].mxu0 }
 0x735   :  { %v9335_v22 = vadd.f32 %v7846_v19, %v5309_v15  ;;  %v7848_v23 = vpop.f32.mrb[30].mxu0 }
 0x736   :  { %v8021_v4 = vsub.f32 0.0, %v9334_v17  ;;  %v9336_v27 = vadd.f32 %v7848_v23, %v5305_v14  ;;  %v7850_v50 = vpop.f32.mrb[31].mxu0 }
 0x737   :  { %v8022_v60 = vsub.f32 0.0, %v9335_v22  ;;  %v9337_v7 = vadd.f32 %v7850_v50, %v5309_v15 }
 0x738   :  { %v8039_v29 = vmul.f32 1.442695, %v8021_v4  ;;  %v8028_v30 = vsub.f32 0.0, %v9336_v27 }
 0x739   :  { %v8041_v6 = vmul.f32 1.442695, %v8022_v60  ;;  %v8029_v33 = vsub.f32 0.0, %v9337_v7 }
 0x73a   :  { %10855 = vpow2.f32 %v8039_v29  ;;  %v8053_v20 = vmul.f32 1.442695, %v8028_v30 }
 0x73b   :  { %10857 = vpow2.f32 %v8041_v6  ;;  %v8055_v25 = vmul.f32 1.442695, %v8029_v33 }
 0x73c   :  { %10859 = vpow2.f32 %v8053_v20 }
 0x73d   :  { %10861 = vpow2.f32 %v8055_v25 }
 0x744   :  { %v10856_v28 = vpop.eup %10855 }
 0x745   :  { %v10858_v31 = vpop.eup %10857  ;;  %v8063_v12 = vadd.f32 1.0, %v10856_v28 }
 0x746   :  { %v10860_v32 = vpop.eup %10859  ;;  %v8064_v34 = vadd.f32 1.0, %v10858_v31 }
 0x747   :  { %v10862_v35 = vpop.eup %10861  ;;  %10863 = vrcp.f32 %v8063_v12  ;;  %v8070_v36 = vadd.f32 1.0, %v10860_v32 }
 0x748   :  { %10865 = vrcp.f32 %v8064_v34  ;;  %v8071_v21 = vadd.f32 1.0, %v10862_v35 }
 0x749   :  { %10867 = vrcp.f32 %v8070_v36 }
 0x74a   :  { %10869 = vrcp.f32 %v8071_v21 }
 0x751   :  { %v10864_v24 = vpop.eup %10863 }
 0x752   :  { %v10866_v37 = vpop.eup %10865  ;;  %8091 = vst [vmem:[%s11603_s10 + $0x20] sm:$0xff] %v10864_v24 }
 0x753   :  { %v10868_v1 = vpop.eup %10867  ;;  %8092 = vst [vmem:[%s11603_s10 + $0x28] sm:$0xff] %v10866_v37 }
 0x754   :  { %v10870_v38 = vpop.eup %10869  ;;  %8098 = vst [vmem:[%s11603_s10 + $0x58] sm:$0xff] %v10868_v1 }
 0x755   :  { %8099 = vst [vmem:[%s11603_s10 + $0x60] sm:$0xff] %v10870_v38 }
 0x756   :  { %8123 = vsyncpa [#allocation3], 1 }
 0x757   :  { %8124 = vsyncpa [#allocation5], 1 }
 0x758   :  { %8125 = vsyncpa [#allocation8], 1 }
 0x759   :  { %8126 = vsyncpa [#allocation11], 1 }
 0x75a   :  { %8127 = vsyncpa [#allocation14], 1 }

</bundles_post_ra>
